<compile_context>
chip_gen: v6e
topology: v6e:2x2x1
jax: 0.10.0
libtpu: 0.0.40
codegen_flags: <defaults>
</compile_context>

<pallas_src>
import numpy as np
import jax
import jax.numpy as jnp
from jax import lax
from jax.experimental import pallas as pl
from jax.experimental.pallas import tpu as pltpu


# ---------------------------------------------------------------------------
# Deterministic filter constants (trace time, no checkpoints).
# ---------------------------------------------------------------------------
def _gaussian_kernel1d(ks, sigma):
    x = np.arange(ks, dtype=np.float64) - (ks - 1) / 2.0
    g = np.exp(-(x ** 2) / (2.0 * sigma ** 2))
    return g / g.sum()


_G5 = _gaussian_kernel1d(5, 1.0)    # canny pre-blur (2-D kernel is outer(g, g) -> separable)
_G7 = _gaussian_kernel1d(7, 1.5)    # ssim window

# 8 neighbour directions (dy, dx) matching kornia's canny NMS / hysteresis kernel order.
_DIRS = [(0, 1), (1, 1), (1, 0), (1, -1), (0, -1), (-1, -1), (-1, 0), (-1, 1)]

_LOW_T = 0.1
_HIGH_T = 0.2
_CANNY_EPS = 1e-6
_TAN22_5 = 0.41421356237309503  # tan(22.5 deg) = sqrt(2) - 1

_SSIM_C1 = 0.01 ** 2
_SSIM_C2 = 0.03 ** 2


# ---------------------------------------------------------------------------
# Register-resident padding helpers (one concatenate, no masked scratch stores).
# ---------------------------------------------------------------------------
def _reflect_pad_rows(x, p):
    h = x.shape[0]
    rows = ([x[p - r:p - r + 1, :] for r in range(p)] + [x] +
            [x[h - 2 - r:h - 1 - r, :] for r in range(p)])
    return jnp.concatenate(rows, axis=0)


def _reflect_pad_cols(x, p):
    w = x.shape[1]
    cols = ([x[:, p - c:p - c + 1] for c in range(p)] + [x] +
            [x[:, w - 2 - c:w - 1 - c] for c in range(p)])
    return jnp.concatenate(cols, axis=1)


def _replicate_pad_rows(x):
    h = x.shape[0]
    return jnp.concatenate([x[0:1, :], x, x[h - 1:h, :]], axis=0)


def _replicate_pad_cols(x):
    w = x.shape[1]
    return jnp.concatenate([x[:, 0:1], x, x[:, w - 1:w]], axis=1)


def _zero_pad1(x):
    h, w = x.shape
    zr = jnp.zeros((1, w), x.dtype)
    xr = jnp.concatenate([zr, x, zr], axis=0)
    zc = jnp.zeros((h + 2, 1), x.dtype)
    return jnp.concatenate([zc, xr, zc], axis=1)


def _sep_gaussian_reflect(x, g):
    """Separable gaussian (outer(g, g)) with reflect 'same' padding: 2*k MACs/px vs k*k."""
    k = g.shape[0]
    p = k // 2
    h, w = x.shape
    xp = _reflect_pad_rows(x, p)
    v = None
    for i in range(k):
        t = xp[i:i + h, :] * float(g[i])
        v = t if v is None else v + t
    vp = _reflect_pad_cols(v, p)
    out = None
    for j in range(k):
        t = vp[:, j:j + w] * float(g[j])
        out = t if out is None else out + t
    return out


def _sobel_replicate(x):
    """Unnormalized Sobel gradients (kornia spatial_gradient, replicate pad), separable."""
    h, w = x.shape
    xp = _replicate_pad_rows(x)
    vs = xp[0:h, :] + 2.0 * xp[1:h + 1, :] + xp[2:h + 2, :]   # vertical [1, 2, 1]
    vd = xp[2:h + 2, :] - xp[0:h, :]                          # vertical [-1, 0, 1]
    vsp = _replicate_pad_cols(vs)
    vdp = _replicate_pad_cols(vd)
    gx = vsp[:, 2:w + 2] - vsp[:, 0:w]                        # horizontal [-1, 0, 1]
    gy = vdp[:, 0:w] + 2.0 * vdp[:, 1:w + 1] + vdp[:, 2:w + 2]  # horizontal [1, 2, 1]
    return gx, gy


# ---------------------------------------------------------------------------
# In-kernel Canny (HSV-V -> blur -> sobel -> NMS -> threshold -> hysteresis).
# ---------------------------------------------------------------------------
def _canny_edges(x_ref, hyst_ref, h, w):
    # HSV value channel.
    v = jnp.maximum(jnp.maximum(x_ref[0, 0], x_ref[0, 1]), x_ref[0, 2])

    # 5x5 gaussian blur (sigma=1, reflect border) then sobel magnitude.
    blurred = _sep_gaussian_reflect(v, _G5)
    gx, gy = _sobel_replicate(blurred)
    mag = jnp.sqrt(gx * gx + gy * gy + _CANNY_EPS)

    # Zero-padded neighbour magnitudes for directional non-max suppression.
    magp = _zero_pad1(mag)
    nb = [magp[1 + dy:1 + dy + h, 1 + dx:1 + dx + w] for (dy, dx) in _DIRS]

    # Octant of round(atan2(gy, gx) / 45deg) via comparisons (no atan2 needed).
    ax = jnp.abs(gx)
    ay = jnp.abs(gy)
    horiz = ay <= _TAN22_5 * ax
    vert = ax <= _TAN22_5 * ay

    def _sel(n):
        diag = jnp.where(gx > 0,
                         jnp.where(gy > 0, n[1], n[7]),
                         jnp.where(gy > 0, n[3], n[5]))
        return jnp.where(horiz,
                         jnp.where(gx >= 0, n[0], n[4]),
                         jnp.where(vert, jnp.where(gy >= 0, n[2], n[6]), diag))

    pos_nb = _sel(nb)
    neg_nb = _sel([nb[(k + 4) % 8] for k in range(8)])
    is_max = jnp.logical_and(mag - pos_nb > 0.0, mag - neg_nb > 0.0)
    mag_nms = jnp.where(is_max, mag, 0.0)

    # Double threshold: 0 / 0.5 (weak) / 1.0 (strong).
    low = mag_nms > _LOW_T
    high = mag_nms > _HIGH_T
    edges0 = jnp.where(high, 1.0, jnp.where(low, 0.5, 0.0)).astype(jnp.float32)

    # Hysteresis: promote weak pixels 8-connected to a strong pixel, iterated to a
    # fixpoint. lax.while_loop exits as soon as an iteration promotes nothing (kornia
    # loops until the edge map stops changing); h*w is a mathematically safe cap.
    hyst_ref[...] = _zero_pad1(edges0)   # single full-tile store with the zero border baked in

    def _cond(carry):
        it, changed = carry
        return jnp.logical_and(changed > 0.0, it < h * w)

    def _body(carry):
        it, _ = carry
        e = hyst_ref[1:h + 1, 1:w + 1]
        weak = e == 0.5
        strong = e == 1.0
        nbr_strong = None
        for (dy, dx) in _DIRS:
            s = hyst_ref[1 + dy:1 + dy + h, 1 + dx:1 + dx + w] == 1.0
            nbr_strong = s if nbr_strong is None else jnp.logical_or(nbr_strong, s)
        promote = jnp.logical_and(weak, nbr_strong)
        new_e = jnp.where(jnp.logical_or(strong, promote), 1.0,
                          jnp.where(weak, 0.5, 0.0)).astype(jnp.float32)
        hyst_ref[1:h + 1, 1:w + 1] = new_e
        return it + 1, jnp.sum(promote.astype(jnp.float32))

    lax.while_loop(_cond, _body, (jnp.int32(0), jnp.float32(1.0)))

    # kornia's canny returns the converged map with unpromoted weak pixels kept at 0.5.
    return hyst_ref[1:h + 1, 1:w + 1]


# ---------------------------------------------------------------------------
# Fused SeamLoss kernel: canny(img1) + canny(img2) + SSIM partial sum per image.
# ---------------------------------------------------------------------------
def _seam_loss_kernel(x1_ref, x2_ref, o_ref, hyst_ref):
    h, w = x1_ref.shape[2], x1_ref.shape[3]

    e1 = _canny_edges(x1_ref, hyst_ref, h, w)   # value snapshot; scratch is reused below
    e2 = _canny_edges(x2_ref, hyst_ref, h, w)

    def filt(x):
        return _sep_gaussian_reflect(x, _G7)    # 7+7 taps instead of 49

    mu1 = filt(e1)
    mu2 = filt(e2)
    mu1_sq = mu1 * mu1
    mu2_sq = mu2 * mu2
    mu1_mu2 = mu1 * mu2
    sigma1_sq = filt(e1 * e1) - mu1_sq
    sigma2_sq = filt(e2 * e2) - mu2_sq
    sigma12 = filt(e1 * e2) - mu1_mu2

    num = (2.0 * mu1_mu2 + _SSIM_C1) * (2.0 * sigma12 + _SSIM_C2)
    den = (mu1_sq + mu2_sq + _SSIM_C1) * (sigma1_sq + sigma2_sq + _SSIM_C2)
    ssim_map = num / den
    loss_map = jnp.clip((1.0 - ssim_map) * 0.5, 0.0, 1.0)

    # Per-image partial sum; the mean is finished in JAX (keeps the batch grid 'parallel').
    o_ref[...] = jnp.sum(loss_map, keepdims=True).reshape(1, 1, 1)


def seam_loss(img1, img2):
    b, c, h, w = img1.shape
    # TODO(synk): for large H*W add a row-strip grid axis with a small halo and pack rows
    # along the lane axis when W < 128 (lane-dense layout); whole-image tiles are fine at
    # the small shapes exercised here and fit comfortably in VMEM on v5e/v6e/v7x.
    partial = pl.pallas_call(
        _seam_loss_kernel,
        out_shape=jax.ShapeDtypeStruct((b, 1, 1), jnp.float32),
        grid=(b,),
        in_specs=[pl.BlockSpec((1, c, h, w), lambda i: (i, 0, 0, 0)),
                  pl.BlockSpec((1, c, h, w), lambda i: (i, 0, 0, 0))],
        out_specs=pl.BlockSpec((1, 1, 1), lambda i: (i, 0, 0)),
        scratch_shapes=[pltpu.VMEM((h + 2, w + 2), jnp.float32)],  # hysteresis state (reused)
        compiler_params=pltpu.CompilerParams(dimension_semantics=("parallel",)),
    )(img1, img2)
    # kornia ssim_loss reduction='mean' over the (B, 1, H, W) edge maps.
    return jnp.sum(partial) / float(b * h * w)


seam_loss_jit = jax.jit(seam_loss)


if __name__ == "__main__":
    key = jax.random.PRNGKey(0)
    k1, k2 = jax.random.split(key)
    B, C, H, W = 2, 3, 16, 16
    img1 = jax.random.uniform(k1, (B, C, H, W), dtype=jnp.float32)
    img2 = jax.random.uniform(k2, (B, C, H, W), dtype=jnp.float32)

    loss = seam_loss_jit(img1, img2)
    jax.block_until_ready(loss)
    print("KERNEL_OK")
</pallas_src>

<mosaic_0001>
module attributes {stable_mosaic.version = 11 : i64} {
  func.func @_seam_loss_kernel(%arg0: i32, %arg1: memref<1x3x16x16xf32, #tpu.memory_space<vmem>>, %arg2: memref<1x3x16x16xf32, #tpu.memory_space<vmem>>, %arg3: memref<1x1x1xf32, #tpu.memory_space<vmem>>, %arg4: memref<18x18xf32, #tpu.memory_space<vmem>>) attributes {dimension_semantics = [#tpu.dimension_semantics<parallel>], iteration_bounds = array<i64: 2>, scalar_prefetch = 0 : i64, scratch_operands = 1 : i64, tpu.core_type = #tpu.core_type<tc>, window_params = [{transform_indices = @transform_0, window_bounds = array<i64: 1, 3, 16, 16>}, {transform_indices = @transform_1, window_bounds = array<i64: 1, 3, 16, 16>}, {transform_indices = @transform_2, window_bounds = array<i64: 1, 1, 1>}]} {
    %c0 = arith.constant 0 : index
    %c0_0 = arith.constant 0 : index
    %c0_1 = arith.constant 0 : index
    %c0_2 = arith.constant 0 : index
    %0 = vector.load %arg1[%c0, %c0_0, %c0_1, %c0_2] : memref<1x3x16x16xf32, #tpu.memory_space<vmem>>, vector<1x1x16x16xf32>
    %1 = vector.shape_cast %0 : vector<1x1x16x16xf32> to vector<16x16xf32>
    %c0_3 = arith.constant 0 : index
    %c1 = arith.constant 1 : index
    %c0_4 = arith.constant 0 : index
    %c0_5 = arith.constant 0 : index
    %2 = vector.load %arg1[%c0_3, %c1, %c0_4, %c0_5] : memref<1x3x16x16xf32, #tpu.memory_space<vmem>>, vector<1x1x16x16xf32>
    %3 = vector.shape_cast %2 : vector<1x1x16x16xf32> to vector<16x16xf32>
    %4 = arith.maximumf %1, %3 : vector<16x16xf32>
    %c0_6 = arith.constant 0 : index
    %c2 = arith.constant 2 : index
    %c0_7 = arith.constant 0 : index
    %c0_8 = arith.constant 0 : index
    %5 = vector.load %arg1[%c0_6, %c2, %c0_7, %c0_8] : memref<1x3x16x16xf32, #tpu.memory_space<vmem>>, vector<1x1x16x16xf32>
    %6 = vector.shape_cast %5 : vector<1x1x16x16xf32> to vector<16x16xf32>
    %7 = arith.maximumf %4, %6 : vector<16x16xf32>
    %8 = vector.extract_strided_slice %7 {offsets = [2, 0], sizes = [1, 16], strides = [1, 1]} : vector<16x16xf32> to vector<1x16xf32>
    %9 = vector.extract_strided_slice %7 {offsets = [1, 0], sizes = [1, 16], strides = [1, 1]} : vector<16x16xf32> to vector<1x16xf32>
    %10 = vector.extract_strided_slice %7 {offsets = [14, 0], sizes = [1, 16], strides = [1, 1]} : vector<16x16xf32> to vector<1x16xf32>
    %11 = vector.extract_strided_slice %7 {offsets = [13, 0], sizes = [1, 16], strides = [1, 1]} : vector<16x16xf32> to vector<1x16xf32>
    %12 = tpu.concatenate %8, %9, %7, %10, %11 in 0 : vector<1x16xf32>, vector<1x16xf32>, vector<16x16xf32>, vector<1x16xf32>, vector<1x16xf32> -> vector<20x16xf32>
    %13 = vector.extract_strided_slice %12 {offsets = [0, 0], sizes = [16, 16], strides = [1, 1]} : vector<20x16xf32> to vector<16x16xf32>
    %cst = arith.constant 0.054488685 : f32
    %14 = vector.broadcast %cst : f32 to vector<16x16xf32>
    %15 = arith.mulf %13, %14 : vector<16x16xf32>
    %16 = vector.extract_strided_slice %12 {offsets = [1, 0], sizes = [16, 16], strides = [1, 1]} : vector<20x16xf32> to vector<16x16xf32>
    %cst_9 = arith.constant 0.244201347 : f32
    %17 = vector.broadcast %cst_9 : f32 to vector<16x16xf32>
    %18 = arith.mulf %16, %17 : vector<16x16xf32>
    %19 = arith.addf %15, %18 : vector<16x16xf32>
    %20 = vector.extract_strided_slice %12 {offsets = [2, 0], sizes = [16, 16], strides = [1, 1]} : vector<20x16xf32> to vector<16x16xf32>
    %cst_10 = arith.constant 0.402619958 : f32
    %21 = vector.broadcast %cst_10 : f32 to vector<16x16xf32>
    %22 = arith.mulf %20, %21 : vector<16x16xf32>
    %23 = arith.addf %19, %22 : vector<16x16xf32>
    %24 = vector.extract_strided_slice %12 {offsets = [3, 0], sizes = [16, 16], strides = [1, 1]} : vector<20x16xf32> to vector<16x16xf32>
    %cst_11 = arith.constant 0.244201347 : f32
    %25 = vector.broadcast %cst_11 : f32 to vector<16x16xf32>
    %26 = arith.mulf %24, %25 : vector<16x16xf32>
    %27 = arith.addf %23, %26 : vector<16x16xf32>
    %28 = vector.extract_strided_slice %12 {offsets = [4, 0], sizes = [16, 16], strides = [1, 1]} : vector<20x16xf32> to vector<16x16xf32>
    %cst_12 = arith.constant 0.054488685 : f32
    %29 = vector.broadcast %cst_12 : f32 to vector<16x16xf32>
    %30 = arith.mulf %28, %29 : vector<16x16xf32>
    %31 = arith.addf %27, %30 : vector<16x16xf32>
    %32 = vector.extract_strided_slice %31 {offsets = [0, 2], sizes = [16, 1], strides = [1, 1]} : vector<16x16xf32> to vector<16x1xf32>
    %33 = vector.extract_strided_slice %31 {offsets = [0, 1], sizes = [16, 1], strides = [1, 1]} : vector<16x16xf32> to vector<16x1xf32>
    %34 = vector.extract_strided_slice %31 {offsets = [0, 14], sizes = [16, 1], strides = [1, 1]} : vector<16x16xf32> to vector<16x1xf32>
    %35 = vector.extract_strided_slice %31 {offsets = [0, 13], sizes = [16, 1], strides = [1, 1]} : vector<16x16xf32> to vector<16x1xf32>
    %36 = tpu.concatenate %32, %33, %31, %34, %35 in 1 : vector<16x1xf32>, vector<16x1xf32>, vector<16x16xf32>, vector<16x1xf32>, vector<16x1xf32> -> vector<16x20xf32>
    %37 = vector.extract_strided_slice %36 {offsets = [0, 0], sizes = [16, 16], strides = [1, 1]} : vector<16x20xf32> to vector<16x16xf32>
    %cst_13 = arith.constant 0.054488685 : f32
    %38 = vector.broadcast %cst_13 : f32 to vector<16x16xf32>
    %39 = arith.mulf %37, %38 : vector<16x16xf32>
    %40 = vector.extract_strided_slice %36 {offsets = [0, 1], sizes = [16, 16], strides = [1, 1]} : vector<16x20xf32> to vector<16x16xf32>
    %cst_14 = arith.constant 0.244201347 : f32
    %41 = vector.broadcast %cst_14 : f32 to vector<16x16xf32>
    %42 = arith.mulf %40, %41 : vector<16x16xf32>
    %43 = arith.addf %39, %42 : vector<16x16xf32>
    %44 = vector.extract_strided_slice %36 {offsets = [0, 2], sizes = [16, 16], strides = [1, 1]} : vector<16x20xf32> to vector<16x16xf32>
    %cst_15 = arith.constant 0.402619958 : f32
    %45 = vector.broadcast %cst_15 : f32 to vector<16x16xf32>
    %46 = arith.mulf %44, %45 : vector<16x16xf32>
    %47 = arith.addf %43, %46 : vector<16x16xf32>
    %48 = vector.extract_strided_slice %36 {offsets = [0, 3], sizes = [16, 16], strides = [1, 1]} : vector<16x20xf32> to vector<16x16xf32>
    %cst_16 = arith.constant 0.244201347 : f32
    %49 = vector.broadcast %cst_16 : f32 to vector<16x16xf32>
    %50 = arith.mulf %48, %49 : vector<16x16xf32>
    %51 = arith.addf %47, %50 : vector<16x16xf32>
    %52 = vector.extract_strided_slice %36 {offsets = [0, 4], sizes = [16, 16], strides = [1, 1]} : vector<16x20xf32> to vector<16x16xf32>
    %cst_17 = arith.constant 0.054488685 : f32
    %53 = vector.broadcast %cst_17 : f32 to vector<16x16xf32>
    %54 = arith.mulf %52, %53 : vector<16x16xf32>
    %55 = arith.addf %51, %54 : vector<16x16xf32>
    %56 = vector.extract_strided_slice %55 {offsets = [0, 0], sizes = [1, 16], strides = [1, 1]} : vector<16x16xf32> to vector<1x16xf32>
    %57 = vector.extract_strided_slice %55 {offsets = [15, 0], sizes = [1, 16], strides = [1, 1]} : vector<16x16xf32> to vector<1x16xf32>
    %58 = tpu.concatenate %56, %55, %57 in 0 : vector<1x16xf32>, vector<16x16xf32>, vector<1x16xf32> -> vector<18x16xf32>
    %59 = vector.extract_strided_slice %58 {offsets = [0, 0], sizes = [16, 16], strides = [1, 1]} : vector<18x16xf32> to vector<16x16xf32>
    %60 = vector.extract_strided_slice %58 {offsets = [1, 0], sizes = [16, 16], strides = [1, 1]} : vector<18x16xf32> to vector<16x16xf32>
    %cst_18 = arith.constant 2.000000e+00 : f32
    %61 = vector.broadcast %cst_18 : f32 to vector<16x16xf32>
    %62 = arith.mulf %61, %60 : vector<16x16xf32>
    %63 = arith.addf %59, %62 : vector<16x16xf32>
    %64 = vector.extract_strided_slice %58 {offsets = [2, 0], sizes = [16, 16], strides = [1, 1]} : vector<18x16xf32> to vector<16x16xf32>
    %65 = arith.addf %63, %64 : vector<16x16xf32>
    %66 = vector.extract_strided_slice %58 {offsets = [2, 0], sizes = [16, 16], strides = [1, 1]} : vector<18x16xf32> to vector<16x16xf32>
    %67 = vector.extract_strided_slice %58 {offsets = [0, 0], sizes = [16, 16], strides = [1, 1]} : vector<18x16xf32> to vector<16x16xf32>
    %68 = arith.subf %66, %67 : vector<16x16xf32>
    %69 = vector.extract_strided_slice %65 {offsets = [0, 0], sizes = [16, 1], strides = [1, 1]} : vector<16x16xf32> to vector<16x1xf32>
    %70 = vector.extract_strided_slice %65 {offsets = [0, 15], sizes = [16, 1], strides = [1, 1]} : vector<16x16xf32> to vector<16x1xf32>
    %71 = tpu.concatenate %69, %65, %70 in 1 : vector<16x1xf32>, vector<16x16xf32>, vector<16x1xf32> -> vector<16x18xf32>
    %72 = vector.extract_strided_slice %68 {offsets = [0, 0], sizes = [16, 1], strides = [1, 1]} : vector<16x16xf32> to vector<16x1xf32>
    %73 = vector.extract_strided_slice %68 {offsets = [0, 15], sizes = [16, 1], strides = [1, 1]} : vector<16x16xf32> to vector<16x1xf32>
    %74 = tpu.concatenate %72, %68, %73 in 1 : vector<16x1xf32>, vector<16x16xf32>, vector<16x1xf32> -> vector<16x18xf32>
    %75 = vector.extract_strided_slice %71 {offsets = [0, 2], sizes = [16, 16], strides = [1, 1]} : vector<16x18xf32> to vector<16x16xf32>
    %76 = vector.extract_strided_slice %71 {offsets = [0, 0], sizes = [16, 16], strides = [1, 1]} : vector<16x18xf32> to vector<16x16xf32>
    %77 = arith.subf %75, %76 : vector<16x16xf32>
    %78 = vector.extract_strided_slice %74 {offsets = [0, 0], sizes = [16, 16], strides = [1, 1]} : vector<16x18xf32> to vector<16x16xf32>
    %79 = vector.extract_strided_slice %74 {offsets = [0, 1], sizes = [16, 16], strides = [1, 1]} : vector<16x18xf32> to vector<16x16xf32>
    %cst_19 = arith.constant 2.000000e+00 : f32
    %80 = vector.broadcast %cst_19 : f32 to vector<16x16xf32>
    %81 = arith.mulf %80, %79 : vector<16x16xf32>
    %82 = arith.addf %78, %81 : vector<16x16xf32>
    %83 = vector.extract_strided_slice %74 {offsets = [0, 2], sizes = [16, 16], strides = [1, 1]} : vector<16x18xf32> to vector<16x16xf32>
    %84 = arith.addf %82, %83 : vector<16x16xf32>
    %85 = arith.mulf %77, %77 : vector<16x16xf32>
    %86 = arith.mulf %84, %84 : vector<16x16xf32>
    %87 = arith.addf %85, %86 : vector<16x16xf32>
    %cst_20 = arith.constant 9.99999997E-7 : f32
    %88 = vector.broadcast %cst_20 : f32 to vector<16x16xf32>
    %89 = arith.addf %87, %88 : vector<16x16xf32>
    %90 = math.sqrt %89 : vector<16x16xf32>
    %cst_21 = arith.constant 0.000000e+00 : f32
    %91 = vector.broadcast %cst_21 : f32 to vector<1x16xf32>
    %92 = tpu.concatenate %91, %90, %91 in 0 : vector<1x16xf32>, vector<16x16xf32>, vector<1x16xf32> -> vector<18x16xf32>
    %cst_22 = arith.constant 0.000000e+00 : f32
    %93 = vector.broadcast %cst_22 : f32 to vector<18x1xf32>
    %94 = tpu.concatenate %93, %92, %93 in 1 : vector<18x1xf32>, vector<18x16xf32>, vector<18x1xf32> -> vector<18x18xf32>
    %95 = vector.extract_strided_slice %94 {offsets = [1, 2], sizes = [16, 16], strides = [1, 1]} : vector<18x18xf32> to vector<16x16xf32>
    %96 = vector.extract_strided_slice %94 {offsets = [2, 2], sizes = [16, 16], strides = [1, 1]} : vector<18x18xf32> to vector<16x16xf32>
    %97 = vector.extract_strided_slice %94 {offsets = [2, 1], sizes = [16, 16], strides = [1, 1]} : vector<18x18xf32> to vector<16x16xf32>
    %98 = vector.extract_strided_slice %94 {offsets = [2, 0], sizes = [16, 16], strides = [1, 1]} : vector<18x18xf32> to vector<16x16xf32>
    %99 = vector.extract_strided_slice %94 {offsets = [1, 0], sizes = [16, 16], strides = [1, 1]} : vector<18x18xf32> to vector<16x16xf32>
    %100 = vector.extract_strided_slice %94 {offsets = [0, 0], sizes = [16, 16], strides = [1, 1]} : vector<18x18xf32> to vector<16x16xf32>
    %101 = vector.extract_strided_slice %94 {offsets = [0, 1], sizes = [16, 16], strides = [1, 1]} : vector<18x18xf32> to vector<16x16xf32>
    %102 = vector.extract_strided_slice %94 {offsets = [0, 2], sizes = [16, 16], strides = [1, 1]} : vector<18x18xf32> to vector<16x16xf32>
    %103 = math.absf %77 : vector<16x16xf32>
    %104 = math.absf %84 : vector<16x16xf32>
    %cst_23 = arith.constant 0.414213568 : f32
    %105 = vector.broadcast %cst_23 : f32 to vector<16x16xf32>
    %106 = arith.mulf %105, %103 : vector<16x16xf32>
    %107 = arith.cmpf ole, %104, %106 : vector<16x16xf32>
    %cst_24 = arith.constant 0.414213568 : f32
    %108 = vector.broadcast %cst_24 : f32 to vector<16x16xf32>
    %109 = arith.mulf %108, %104 : vector<16x16xf32>
    %110 = arith.cmpf ole, %103, %109 : vector<16x16xf32>
    %cst_25 = arith.constant 0.000000e+00 : f32
    %111 = vector.broadcast %cst_25 : f32 to vector<16x16xf32>
    %112 = arith.cmpf ogt, %77, %111 : vector<16x16xf32>
    %cst_26 = arith.constant 0.000000e+00 : f32
    %113 = vector.broadcast %cst_26 : f32 to vector<16x16xf32>
    %114 = arith.cmpf ogt, %84, %113 : vector<16x16xf32>
    %115 = arith.select %114, %96, %102 : vector<16x16xi1>, vector<16x16xf32>
    %cst_27 = arith.constant 0.000000e+00 : f32
    %116 = vector.broadcast %cst_27 : f32 to vector<16x16xf32>
    %117 = arith.cmpf ogt, %84, %116 : vector<16x16xf32>
    %118 = arith.select %117, %98, %100 : vector<16x16xi1>, vector<16x16xf32>
    %119 = arith.select %112, %115, %118 : vector<16x16xi1>, vector<16x16xf32>
    %cst_28 = arith.constant 0.000000e+00 : f32
    %120 = vector.broadcast %cst_28 : f32 to vector<16x16xf32>
    %121 = arith.cmpf oge, %77, %120 : vector<16x16xf32>
    %122 = arith.select %121, %95, %99 : vector<16x16xi1>, vector<16x16xf32>
    %cst_29 = arith.constant 0.000000e+00 : f32
    %123 = vector.broadcast %cst_29 : f32 to vector<16x16xf32>
    %124 = arith.cmpf oge, %84, %123 : vector<16x16xf32>
    %125 = arith.select %124, %97, %101 : vector<16x16xi1>, vector<16x16xf32>
    %126 = arith.select %110, %125, %119 : vector<16x16xi1>, vector<16x16xf32>
    %127 = arith.select %107, %122, %126 : vector<16x16xi1>, vector<16x16xf32>
    %cst_30 = arith.constant 0.000000e+00 : f32
    %128 = vector.broadcast %cst_30 : f32 to vector<16x16xf32>
    %129 = arith.cmpf ogt, %77, %128 : vector<16x16xf32>
    %cst_31 = arith.constant 0.000000e+00 : f32
    %130 = vector.broadcast %cst_31 : f32 to vector<16x16xf32>
    %131 = arith.cmpf ogt, %84, %130 : vector<16x16xf32>
    %132 = arith.select %131, %100, %98 : vector<16x16xi1>, vector<16x16xf32>
    %cst_32 = arith.constant 0.000000e+00 : f32
    %133 = vector.broadcast %cst_32 : f32 to vector<16x16xf32>
    %134 = arith.cmpf ogt, %84, %133 : vector<16x16xf32>
    %135 = arith.select %134, %102, %96 : vector<16x16xi1>, vector<16x16xf32>
    %136 = arith.select %129, %132, %135 : vector<16x16xi1>, vector<16x16xf32>
    %cst_33 = arith.constant 0.000000e+00 : f32
    %137 = vector.broadcast %cst_33 : f32 to vector<16x16xf32>
    %138 = arith.cmpf oge, %77, %137 : vector<16x16xf32>
    %139 = arith.select %138, %99, %95 : vector<16x16xi1>, vector<16x16xf32>
    %cst_34 = arith.constant 0.000000e+00 : f32
    %140 = vector.broadcast %cst_34 : f32 to vector<16x16xf32>
    %141 = arith.cmpf oge, %84, %140 : vector<16x16xf32>
    %142 = arith.select %141, %101, %97 : vector<16x16xi1>, vector<16x16xf32>
    %143 = arith.select %110, %142, %136 : vector<16x16xi1>, vector<16x16xf32>
    %144 = arith.select %107, %139, %143 : vector<16x16xi1>, vector<16x16xf32>
    %145 = arith.subf %90, %127 : vector<16x16xf32>
    %cst_35 = arith.constant 0.000000e+00 : f32
    %146 = vector.broadcast %cst_35 : f32 to vector<16x16xf32>
    %147 = arith.cmpf ogt, %145, %146 : vector<16x16xf32>
    %148 = arith.subf %90, %144 : vector<16x16xf32>
    %cst_36 = arith.constant 0.000000e+00 : f32
    %149 = vector.broadcast %cst_36 : f32 to vector<16x16xf32>
    %150 = arith.cmpf ogt, %148, %149 : vector<16x16xf32>
    %151 = arith.andi %147, %150 : vector<16x16xi1>
    %cst_37 = arith.constant 0.000000e+00 : f32
    %152 = vector.broadcast %cst_37 : f32 to vector<16x16xf32>
    %153 = arith.select %151, %90, %152 : vector<16x16xi1>, vector<16x16xf32>
    %cst_38 = arith.constant 1.000000e-01 : f32
    %154 = vector.broadcast %cst_38 : f32 to vector<16x16xf32>
    %155 = arith.cmpf ogt, %153, %154 : vector<16x16xf32>
    %cst_39 = arith.constant 2.000000e-01 : f32
    %156 = vector.broadcast %cst_39 : f32 to vector<16x16xf32>
    %157 = arith.cmpf ogt, %153, %156 : vector<16x16xf32>
    %cst_40 = arith.constant 5.000000e-01 : f32
    %cst_41 = arith.constant 0.000000e+00 : f32
    %158 = vector.broadcast %cst_40 : f32 to vector<16x16xf32>
    %159 = vector.broadcast %cst_41 : f32 to vector<16x16xf32>
    %160 = arith.select %155, %158, %159 : vector<16x16xi1>, vector<16x16xf32>
    %cst_42 = arith.constant 1.000000e+00 : f32
    %161 = vector.broadcast %cst_42 : f32 to vector<16x16xf32>
    %162 = arith.select %157, %161, %160 : vector<16x16xi1>, vector<16x16xf32>
    %cst_43 = arith.constant 0.000000e+00 : f32
    %163 = vector.broadcast %cst_43 : f32 to vector<1x16xf32>
    %164 = tpu.concatenate %163, %162, %163 in 0 : vector<1x16xf32>, vector<16x16xf32>, vector<1x16xf32> -> vector<18x16xf32>
    %cst_44 = arith.constant 0.000000e+00 : f32
    %165 = vector.broadcast %cst_44 : f32 to vector<18x1xf32>
    %166 = tpu.concatenate %165, %164, %165 in 1 : vector<18x1xf32>, vector<18x16xf32>, vector<18x1xf32> -> vector<18x18xf32>
    %c0_45 = arith.constant 0 : index
    %c0_46 = arith.constant 0 : index
    %167 = vector.load %arg4[%c0_45, %c0_46] : memref<18x18xf32, #tpu.memory_space<vmem>>, vector<18x18xf32>
    tpu.vector_store %arg4[%c0_45, %c0_46], %166 {strides = array<i32>} : memref<18x18xf32, #tpu.memory_space<vmem>>, vector<18x18xf32>,
    %c0_i32 = arith.constant 0 : i32
    %cst_47 = arith.constant 1.000000e+00 : f32
    %168:2 = scf.while (%arg5 = %c0_i32, %arg6 = %cst_47) : (i32, f32) -> (i32, f32) {
      %cst_189 = arith.constant 0.000000e+00 : f32
      %721 = arith.cmpf ogt, %arg6, %cst_189 : f32
      %c256_i32 = arith.constant 256 : i32
      %722 = arith.cmpi slt, %arg5, %c256_i32 : i32
      %723 = arith.andi %721, %722 : i1
      scf.condition(%723) %arg5, %arg6 : i32, f32
    } do {
    ^bb0(%arg5: i32, %arg6: f32):
      %c1_189 = arith.constant 1 : index
      %c1_190 = arith.constant 1 : index
      %721 = vector.load %arg4[%c1_189, %c1_190] : memref<18x18xf32, #tpu.memory_space<vmem>>, vector<16x16xf32>
      %cst_191 = arith.constant 5.000000e-01 : f32
      %722 = vector.broadcast %cst_191 : f32 to vector<16x16xf32>
      %723 = arith.cmpf oeq, %721, %722 : vector<16x16xf32>
      %cst_192 = arith.constant 1.000000e+00 : f32
      %724 = vector.broadcast %cst_192 : f32 to vector<16x16xf32>
      %725 = arith.cmpf oeq, %721, %724 : vector<16x16xf32>
      %c1_193 = arith.constant 1 : index
      %c2_194 = arith.constant 2 : index
      %726 = vector.load %arg4[%c1_193, %c2_194] : memref<18x18xf32, #tpu.memory_space<vmem>>, vector<16x16xf32>
      %cst_195 = arith.constant 1.000000e+00 : f32
      %727 = vector.broadcast %cst_195 : f32 to vector<16x16xf32>
      %728 = arith.cmpf oeq, %726, %727 : vector<16x16xf32>
      %c2_196 = arith.constant 2 : index
      %c2_197 = arith.constant 2 : index
      %729 = vector.load %arg4[%c2_196, %c2_197] : memref<18x18xf32, #tpu.memory_space<vmem>>, vector<16x16xf32>
      %cst_198 = arith.constant 1.000000e+00 : f32
      %730 = vector.broadcast %cst_198 : f32 to vector<16x16xf32>
      %731 = arith.cmpf oeq, %729, %730 : vector<16x16xf32>
      %732 = arith.ori %728, %731 : vector<16x16xi1>
      %c2_199 = arith.constant 2 : index
      %c1_200 = arith.constant 1 : index
      %733 = vector.load %arg4[%c2_199, %c1_200] : memref<18x18xf32, #tpu.memory_space<vmem>>, vector<16x16xf32>
      %cst_201 = arith.constant 1.000000e+00 : f32
      %734 = vector.broadcast %cst_201 : f32 to vector<16x16xf32>
      %735 = arith.cmpf oeq, %733, %734 : vector<16x16xf32>
      %736 = arith.ori %732, %735 : vector<16x16xi1>
      %c2_202 = arith.constant 2 : index
      %c0_203 = arith.constant 0 : index
      %737 = vector.load %arg4[%c2_202, %c0_203] : memref<18x18xf32, #tpu.memory_space<vmem>>, vector<16x16xf32>
      %cst_204 = arith.constant 1.000000e+00 : f32
      %738 = vector.broadcast %cst_204 : f32 to vector<16x16xf32>
      %739 = arith.cmpf oeq, %737, %738 : vector<16x16xf32>
      %740 = arith.ori %736, %739 : vector<16x16xi1>
      %c1_205 = arith.constant 1 : index
      %c0_206 = arith.constant 0 : index
      %741 = vector.load %arg4[%c1_205, %c0_206] : memref<18x18xf32, #tpu.memory_space<vmem>>, vector<16x16xf32>
      %cst_207 = arith.constant 1.000000e+00 : f32
      %742 = vector.broadcast %cst_207 : f32 to vector<16x16xf32>
      %743 = arith.cmpf oeq, %741, %742 : vector<16x16xf32>
      %744 = arith.ori %740, %743 : vector<16x16xi1>
      %c0_208 = arith.constant 0 : index
      %c0_209 = arith.constant 0 : index
      %745 = vector.load %arg4[%c0_208, %c0_209] : memref<18x18xf32, #tpu.memory_space<vmem>>, vector<16x16xf32>
      %cst_210 = arith.constant 1.000000e+00 : f32
      %746 = vector.broadcast %cst_210 : f32 to vector<16x16xf32>
      %747 = arith.cmpf oeq, %745, %746 : vector<16x16xf32>
      %748 = arith.ori %744, %747 : vector<16x16xi1>
      %c0_211 = arith.constant 0 : index
      %c1_212 = arith.constant 1 : index
      %749 = vector.load %arg4[%c0_211, %c1_212] : memref<18x18xf32, #tpu.memory_space<vmem>>, vector<16x16xf32>
      %cst_213 = arith.constant 1.000000e+00 : f32
      %750 = vector.broadcast %cst_213 : f32 to vector<16x16xf32>
      %751 = arith.cmpf oeq, %749, %750 : vector<16x16xf32>
      %752 = arith.ori %748, %751 : vector<16x16xi1>
      %c0_214 = arith.constant 0 : index
      %c2_215 = arith.constant 2 : index
      %753 = vector.load %arg4[%c0_214, %c2_215] : memref<18x18xf32, #tpu.memory_space<vmem>>, vector<16x16xf32>
      %cst_216 = arith.constant 1.000000e+00 : f32
      %754 = vector.broadcast %cst_216 : f32 to vector<16x16xf32>
      %755 = arith.cmpf oeq, %753, %754 : vector<16x16xf32>
      %756 = arith.ori %752, %755 : vector<16x16xi1>
      %757 = arith.andi %723, %756 : vector<16x16xi1>
      %758 = arith.ori %725, %757 : vector<16x16xi1>
      %cst_217 = arith.constant 5.000000e-01 : f32
      %cst_218 = arith.constant 0.000000e+00 : f32
      %759 = vector.broadcast %cst_217 : f32 to vector<16x16xf32>
      %760 = vector.broadcast %cst_218 : f32 to vector<16x16xf32>
      %761 = arith.select %723, %759, %760 : vector<16x16xi1>, vector<16x16xf32>
      %cst_219 = arith.constant 1.000000e+00 : f32
      %762 = vector.broadcast %cst_219 : f32 to vector<16x16xf32>
      %763 = arith.select %758, %762, %761 : vector<16x16xi1>, vector<16x16xf32>
      %c1_220 = arith.constant 1 : index
      %c1_221 = arith.constant 1 : index
      %764 = vector.load %arg4[%c1_220, %c1_221] : memref<18x18xf32, #tpu.memory_space<vmem>>, vector<16x16xf32>
      tpu.vector_store %arg4[%c1_220, %c1_221], %763 {strides = array<i32>} : memref<18x18xf32, #tpu.memory_space<vmem>>, vector<16x16xf32>,
      %c1_i32 = arith.constant 1 : i32
      %765 = arith.addi %arg5, %c1_i32 : i32
      %766 = arith.extui %757 : vector<16x16xi1> to vector<16x16xi32>
      %767 = arith.sitofp %766 : vector<16x16xi32> to vector<16x16xf32>
      %768 = vector.shape_cast %767 : vector<16x16xf32> to vector<1x16x16xf32>
      %cst_222 = arith.constant dense<0.000000e+00> : vector<1xf32>
      %769 = vector.multi_reduction <add>, %768, %cst_222 [1, 2] : vector<1x16x16xf32> to vector<1xf32>
      %770 = vector.shape_cast %769 : vector<1xf32> to vector<1x1x1xf32>
      %771 = vector.extract %770[0, 0, 0] : f32 from vector<1x1x1xf32>
      scf.yield %765, %771 : i32, f32
    }
    %c1_48 = arith.constant 1 : index
    %c1_49 = arith.constant 1 : index
    %169 = vector.load %arg4[%c1_48, %c1_49] : memref<18x18xf32, #tpu.memory_space<vmem>>, vector<16x16xf32>
    %c0_50 = arith.constant 0 : index
    %c0_51 = arith.constant 0 : index
    %c0_52 = arith.constant 0 : index
    %c0_53 = arith.constant 0 : index
    %170 = vector.load %arg2[%c0_50, %c0_51, %c0_52, %c0_53] : memref<1x3x16x16xf32, #tpu.memory_space<vmem>>, vector<1x1x16x16xf32>
    %171 = vector.shape_cast %170 : vector<1x1x16x16xf32> to vector<16x16xf32>
    %c0_54 = arith.constant 0 : index
    %c1_55 = arith.constant 1 : index
    %c0_56 = arith.constant 0 : index
    %c0_57 = arith.constant 0 : index
    %172 = vector.load %arg2[%c0_54, %c1_55, %c0_56, %c0_57] : memref<1x3x16x16xf32, #tpu.memory_space<vmem>>, vector<1x1x16x16xf32>
    %173 = vector.shape_cast %172 : vector<1x1x16x16xf32> to vector<16x16xf32>
    %174 = arith.maximumf %171, %173 : vector<16x16xf32>
    %c0_58 = arith.constant 0 : index
    %c2_59 = arith.constant 2 : index
    %c0_60 = arith.constant 0 : index
    %c0_61 = arith.constant 0 : index
    %175 = vector.load %arg2[%c0_58, %c2_59, %c0_60, %c0_61] : memref<1x3x16x16xf32, #tpu.memory_space<vmem>>, vector<1x1x16x16xf32>
    %176 = vector.shape_cast %175 : vector<1x1x16x16xf32> to vector<16x16xf32>
    %177 = arith.maximumf %174, %176 : vector<16x16xf32>
    %178 = vector.extract_strided_slice %177 {offsets = [2, 0], sizes = [1, 16], strides = [1, 1]} : vector<16x16xf32> to vector<1x16xf32>
    %179 = vector.extract_strided_slice %177 {offsets = [1, 0], sizes = [1, 16], strides = [1, 1]} : vector<16x16xf32> to vector<1x16xf32>
    %180 = vector.extract_strided_slice %177 {offsets = [14, 0], sizes = [1, 16], strides = [1, 1]} : vector<16x16xf32> to vector<1x16xf32>
    %181 = vector.extract_strided_slice %177 {offsets = [13, 0], sizes = [1, 16], strides = [1, 1]} : vector<16x16xf32> to vector<1x16xf32>
    %182 = tpu.concatenate %178, %179, %177, %180, %181 in 0 : vector<1x16xf32>, vector<1x16xf32>, vector<16x16xf32>, vector<1x16xf32>, vector<1x16xf32> -> vector<20x16xf32>
    %183 = vector.extract_strided_slice %182 {offsets = [0, 0], sizes = [16, 16], strides = [1, 1]} : vector<20x16xf32> to vector<16x16xf32>
    %cst_62 = arith.constant 0.054488685 : f32
    %184 = vector.broadcast %cst_62 : f32 to vector<16x16xf32>
    %185 = arith.mulf %183, %184 : vector<16x16xf32>
    %186 = vector.extract_strided_slice %182 {offsets = [1, 0], sizes = [16, 16], strides = [1, 1]} : vector<20x16xf32> to vector<16x16xf32>
    %cst_63 = arith.constant 0.244201347 : f32
    %187 = vector.broadcast %cst_63 : f32 to vector<16x16xf32>
    %188 = arith.mulf %186, %187 : vector<16x16xf32>
    %189 = arith.addf %185, %188 : vector<16x16xf32>
    %190 = vector.extract_strided_slice %182 {offsets = [2, 0], sizes = [16, 16], strides = [1, 1]} : vector<20x16xf32> to vector<16x16xf32>
    %cst_64 = arith.constant 0.402619958 : f32
    %191 = vector.broadcast %cst_64 : f32 to vector<16x16xf32>
    %192 = arith.mulf %190, %191 : vector<16x16xf32>
    %193 = arith.addf %189, %192 : vector<16x16xf32>
    %194 = vector.extract_strided_slice %182 {offsets = [3, 0], sizes = [16, 16], strides = [1, 1]} : vector<20x16xf32> to vector<16x16xf32>
    %cst_65 = arith.constant 0.244201347 : f32
    %195 = vector.broadcast %cst_65 : f32 to vector<16x16xf32>
    %196 = arith.mulf %194, %195 : vector<16x16xf32>
    %197 = arith.addf %193, %196 : vector<16x16xf32>
    %198 = vector.extract_strided_slice %182 {offsets = [4, 0], sizes = [16, 16], strides = [1, 1]} : vector<20x16xf32> to vector<16x16xf32>
    %cst_66 = arith.constant 0.054488685 : f32
    %199 = vector.broadcast %cst_66 : f32 to vector<16x16xf32>
    %200 = arith.mulf %198, %199 : vector<16x16xf32>
    %201 = arith.addf %197, %200 : vector<16x16xf32>
    %202 = vector.extract_strided_slice %201 {offsets = [0, 2], sizes = [16, 1], strides = [1, 1]} : vector<16x16xf32> to vector<16x1xf32>
    %203 = vector.extract_strided_slice %201 {offsets = [0, 1], sizes = [16, 1], strides = [1, 1]} : vector<16x16xf32> to vector<16x1xf32>
    %204 = vector.extract_strided_slice %201 {offsets = [0, 14], sizes = [16, 1], strides = [1, 1]} : vector<16x16xf32> to vector<16x1xf32>
    %205 = vector.extract_strided_slice %201 {offsets = [0, 13], sizes = [16, 1], strides = [1, 1]} : vector<16x16xf32> to vector<16x1xf32>
    %206 = tpu.concatenate %202, %203, %201, %204, %205 in 1 : vector<16x1xf32>, vector<16x1xf32>, vector<16x16xf32>, vector<16x1xf32>, vector<16x1xf32> -> vector<16x20xf32>
    %207 = vector.extract_strided_slice %206 {offsets = [0, 0], sizes = [16, 16], strides = [1, 1]} : vector<16x20xf32> to vector<16x16xf32>
    %cst_67 = arith.constant 0.054488685 : f32
    %208 = vector.broadcast %cst_67 : f32 to vector<16x16xf32>
    %209 = arith.mulf %207, %208 : vector<16x16xf32>
    %210 = vector.extract_strided_slice %206 {offsets = [0, 1], sizes = [16, 16], strides = [1, 1]} : vector<16x20xf32> to vector<16x16xf32>
    %cst_68 = arith.constant 0.244201347 : f32
    %211 = vector.broadcast %cst_68 : f32 to vector<16x16xf32>
    %212 = arith.mulf %210, %211 : vector<16x16xf32>
    %213 = arith.addf %209, %212 : vector<16x16xf32>
    %214 = vector.extract_strided_slice %206 {offsets = [0, 2], sizes = [16, 16], strides = [1, 1]} : vector<16x20xf32> to vector<16x16xf32>
    %cst_69 = arith.constant 0.402619958 : f32
    %215 = vector.broadcast %cst_69 : f32 to vector<16x16xf32>
    %216 = arith.mulf %214, %215 : vector<16x16xf32>
    %217 = arith.addf %213, %216 : vector<16x16xf32>
    %218 = vector.extract_strided_slice %206 {offsets = [0, 3], sizes = [16, 16], strides = [1, 1]} : vector<16x20xf32> to vector<16x16xf32>
    %cst_70 = arith.constant 0.244201347 : f32
    %219 = vector.broadcast %cst_70 : f32 to vector<16x16xf32>
    %220 = arith.mulf %218, %219 : vector<16x16xf32>
    %221 = arith.addf %217, %220 : vector<16x16xf32>
    %222 = vector.extract_strided_slice %206 {offsets = [0, 4], sizes = [16, 16], strides = [1, 1]} : vector<16x20xf32> to vector<16x16xf32>
    %cst_71 = arith.constant 0.054488685 : f32
    %223 = vector.broadcast %cst_71 : f32 to vector<16x16xf32>
    %224 = arith.mulf %222, %223 : vector<16x16xf32>
    %225 = arith.addf %221, %224 : vector<16x16xf32>
    %226 = vector.extract_strided_slice %225 {offsets = [0, 0], sizes = [1, 16], strides = [1, 1]} : vector<16x16xf32> to vector<1x16xf32>
    %227 = vector.extract_strided_slice %225 {offsets = [15, 0], sizes = [1, 16], strides = [1, 1]} : vector<16x16xf32> to vector<1x16xf32>
    %228 = tpu.concatenate %226, %225, %227 in 0 : vector<1x16xf32>, vector<16x16xf32>, vector<1x16xf32> -> vector<18x16xf32>
    %229 = vector.extract_strided_slice %228 {offsets = [0, 0], sizes = [16, 16], strides = [1, 1]} : vector<18x16xf32> to vector<16x16xf32>
    %230 = vector.extract_strided_slice %228 {offsets = [1, 0], sizes = [16, 16], strides = [1, 1]} : vector<18x16xf32> to vector<16x16xf32>
    %cst_72 = arith.constant 2.000000e+00 : f32
    %231 = vector.broadcast %cst_72 : f32 to vector<16x16xf32>
    %232 = arith.mulf %231, %230 : vector<16x16xf32>
    %233 = arith.addf %229, %232 : vector<16x16xf32>
    %234 = vector.extract_strided_slice %228 {offsets = [2, 0], sizes = [16, 16], strides = [1, 1]} : vector<18x16xf32> to vector<16x16xf32>
    %235 = arith.addf %233, %234 : vector<16x16xf32>
    %236 = vector.extract_strided_slice %228 {offsets = [2, 0], sizes = [16, 16], strides = [1, 1]} : vector<18x16xf32> to vector<16x16xf32>
    %237 = vector.extract_strided_slice %228 {offsets = [0, 0], sizes = [16, 16], strides = [1, 1]} : vector<18x16xf32> to vector<16x16xf32>
    %238 = arith.subf %236, %237 : vector<16x16xf32>
    %239 = vector.extract_strided_slice %235 {offsets = [0, 0], sizes = [16, 1], strides = [1, 1]} : vector<16x16xf32> to vector<16x1xf32>
    %240 = vector.extract_strided_slice %235 {offsets = [0, 15], sizes = [16, 1], strides = [1, 1]} : vector<16x16xf32> to vector<16x1xf32>
    %241 = tpu.concatenate %239, %235, %240 in 1 : vector<16x1xf32>, vector<16x16xf32>, vector<16x1xf32> -> vector<16x18xf32>
    %242 = vector.extract_strided_slice %238 {offsets = [0, 0], sizes = [16, 1], strides = [1, 1]} : vector<16x16xf32> to vector<16x1xf32>
    %243 = vector.extract_strided_slice %238 {offsets = [0, 15], sizes = [16, 1], strides = [1, 1]} : vector<16x16xf32> to vector<16x1xf32>
    %244 = tpu.concatenate %242, %238, %243 in 1 : vector<16x1xf32>, vector<16x16xf32>, vector<16x1xf32> -> vector<16x18xf32>
    %245 = vector.extract_strided_slice %241 {offsets = [0, 2], sizes = [16, 16], strides = [1, 1]} : vector<16x18xf32> to vector<16x16xf32>
    %246 = vector.extract_strided_slice %241 {offsets = [0, 0], sizes = [16, 16], strides = [1, 1]} : vector<16x18xf32> to vector<16x16xf32>
    %247 = arith.subf %245, %246 : vector<16x16xf32>
    %248 = vector.extract_strided_slice %244 {offsets = [0, 0], sizes = [16, 16], strides = [1, 1]} : vector<16x18xf32> to vector<16x16xf32>
    %249 = vector.extract_strided_slice %244 {offsets = [0, 1], sizes = [16, 16], strides = [1, 1]} : vector<16x18xf32> to vector<16x16xf32>
    %cst_73 = arith.constant 2.000000e+00 : f32
    %250 = vector.broadcast %cst_73 : f32 to vector<16x16xf32>
    %251 = arith.mulf %250, %249 : vector<16x16xf32>
    %252 = arith.addf %248, %251 : vector<16x16xf32>
    %253 = vector.extract_strided_slice %244 {offsets = [0, 2], sizes = [16, 16], strides = [1, 1]} : vector<16x18xf32> to vector<16x16xf32>
    %254 = arith.addf %252, %253 : vector<16x16xf32>
    %255 = arith.mulf %247, %247 : vector<16x16xf32>
    %256 = arith.mulf %254, %254 : vector<16x16xf32>
    %257 = arith.addf %255, %256 : vector<16x16xf32>
    %cst_74 = arith.constant 9.99999997E-7 : f32
    %258 = vector.broadcast %cst_74 : f32 to vector<16x16xf32>
    %259 = arith.addf %257, %258 : vector<16x16xf32>
    %260 = math.sqrt %259 : vector<16x16xf32>
    %cst_75 = arith.constant 0.000000e+00 : f32
    %261 = vector.broadcast %cst_75 : f32 to vector<1x16xf32>
    %262 = tpu.concatenate %261, %260, %261 in 0 : vector<1x16xf32>, vector<16x16xf32>, vector<1x16xf32> -> vector<18x16xf32>
    %cst_76 = arith.constant 0.000000e+00 : f32
    %263 = vector.broadcast %cst_76 : f32 to vector<18x1xf32>
    %264 = tpu.concatenate %263, %262, %263 in 1 : vector<18x1xf32>, vector<18x16xf32>, vector<18x1xf32> -> vector<18x18xf32>
    %265 = vector.extract_strided_slice %264 {offsets = [1, 2], sizes = [16, 16], strides = [1, 1]} : vector<18x18xf32> to vector<16x16xf32>
    %266 = vector.extract_strided_slice %264 {offsets = [2, 2], sizes = [16, 16], strides = [1, 1]} : vector<18x18xf32> to vector<16x16xf32>
    %267 = vector.extract_strided_slice %264 {offsets = [2, 1], sizes = [16, 16], strides = [1, 1]} : vector<18x18xf32> to vector<16x16xf32>
    %268 = vector.extract_strided_slice %264 {offsets = [2, 0], sizes = [16, 16], strides = [1, 1]} : vector<18x18xf32> to vector<16x16xf32>
    %269 = vector.extract_strided_slice %264 {offsets = [1, 0], sizes = [16, 16], strides = [1, 1]} : vector<18x18xf32> to vector<16x16xf32>
    %270 = vector.extract_strided_slice %264 {offsets = [0, 0], sizes = [16, 16], strides = [1, 1]} : vector<18x18xf32> to vector<16x16xf32>
    %271 = vector.extract_strided_slice %264 {offsets = [0, 1], sizes = [16, 16], strides = [1, 1]} : vector<18x18xf32> to vector<16x16xf32>
    %272 = vector.extract_strided_slice %264 {offsets = [0, 2], sizes = [16, 16], strides = [1, 1]} : vector<18x18xf32> to vector<16x16xf32>
    %273 = math.absf %247 : vector<16x16xf32>
    %274 = math.absf %254 : vector<16x16xf32>
    %cst_77 = arith.constant 0.414213568 : f32
    %275 = vector.broadcast %cst_77 : f32 to vector<16x16xf32>
    %276 = arith.mulf %275, %273 : vector<16x16xf32>
    %277 = arith.cmpf ole, %274, %276 : vector<16x16xf32>
    %cst_78 = arith.constant 0.414213568 : f32
    %278 = vector.broadcast %cst_78 : f32 to vector<16x16xf32>
    %279 = arith.mulf %278, %274 : vector<16x16xf32>
    %280 = arith.cmpf ole, %273, %279 : vector<16x16xf32>
    %cst_79 = arith.constant 0.000000e+00 : f32
    %281 = vector.broadcast %cst_79 : f32 to vector<16x16xf32>
    %282 = arith.cmpf ogt, %247, %281 : vector<16x16xf32>
    %cst_80 = arith.constant 0.000000e+00 : f32
    %283 = vector.broadcast %cst_80 : f32 to vector<16x16xf32>
    %284 = arith.cmpf ogt, %254, %283 : vector<16x16xf32>
    %285 = arith.select %284, %266, %272 : vector<16x16xi1>, vector<16x16xf32>
    %cst_81 = arith.constant 0.000000e+00 : f32
    %286 = vector.broadcast %cst_81 : f32 to vector<16x16xf32>
    %287 = arith.cmpf ogt, %254, %286 : vector<16x16xf32>
    %288 = arith.select %287, %268, %270 : vector<16x16xi1>, vector<16x16xf32>
    %289 = arith.select %282, %285, %288 : vector<16x16xi1>, vector<16x16xf32>
    %cst_82 = arith.constant 0.000000e+00 : f32
    %290 = vector.broadcast %cst_82 : f32 to vector<16x16xf32>
    %291 = arith.cmpf oge, %247, %290 : vector<16x16xf32>
    %292 = arith.select %291, %265, %269 : vector<16x16xi1>, vector<16x16xf32>
    %cst_83 = arith.constant 0.000000e+00 : f32
    %293 = vector.broadcast %cst_83 : f32 to vector<16x16xf32>
    %294 = arith.cmpf oge, %254, %293 : vector<16x16xf32>
    %295 = arith.select %294, %267, %271 : vector<16x16xi1>, vector<16x16xf32>
    %296 = arith.select %280, %295, %289 : vector<16x16xi1>, vector<16x16xf32>
    %297 = arith.select %277, %292, %296 : vector<16x16xi1>, vector<16x16xf32>
    %cst_84 = arith.constant 0.000000e+00 : f32
    %298 = vector.broadcast %cst_84 : f32 to vector<16x16xf32>
    %299 = arith.cmpf ogt, %247, %298 : vector<16x16xf32>
    %cst_85 = arith.constant 0.000000e+00 : f32
    %300 = vector.broadcast %cst_85 : f32 to vector<16x16xf32>
    %301 = arith.cmpf ogt, %254, %300 : vector<16x16xf32>
    %302 = arith.select %301, %270, %268 : vector<16x16xi1>, vector<16x16xf32>
    %cst_86 = arith.constant 0.000000e+00 : f32
    %303 = vector.broadcast %cst_86 : f32 to vector<16x16xf32>
    %304 = arith.cmpf ogt, %254, %303 : vector<16x16xf32>
    %305 = arith.select %304, %272, %266 : vector<16x16xi1>, vector<16x16xf32>
    %306 = arith.select %299, %302, %305 : vector<16x16xi1>, vector<16x16xf32>
    %cst_87 = arith.constant 0.000000e+00 : f32
    %307 = vector.broadcast %cst_87 : f32 to vector<16x16xf32>
    %308 = arith.cmpf oge, %247, %307 : vector<16x16xf32>
    %309 = arith.select %308, %269, %265 : vector<16x16xi1>, vector<16x16xf32>
    %cst_88 = arith.constant 0.000000e+00 : f32
    %310 = vector.broadcast %cst_88 : f32 to vector<16x16xf32>
    %311 = arith.cmpf oge, %254, %310 : vector<16x16xf32>
    %312 = arith.select %311, %271, %267 : vector<16x16xi1>, vector<16x16xf32>
    %313 = arith.select %280, %312, %306 : vector<16x16xi1>, vector<16x16xf32>
    %314 = arith.select %277, %309, %313 : vector<16x16xi1>, vector<16x16xf32>
    %315 = arith.subf %260, %297 : vector<16x16xf32>
    %cst_89 = arith.constant 0.000000e+00 : f32
    %316 = vector.broadcast %cst_89 : f32 to vector<16x16xf32>
    %317 = arith.cmpf ogt, %315, %316 : vector<16x16xf32>
    %318 = arith.subf %260, %314 : vector<16x16xf32>
    %cst_90 = arith.constant 0.000000e+00 : f32
    %319 = vector.broadcast %cst_90 : f32 to vector<16x16xf32>
    %320 = arith.cmpf ogt, %318, %319 : vector<16x16xf32>
    %321 = arith.andi %317, %320 : vector<16x16xi1>
    %cst_91 = arith.constant 0.000000e+00 : f32
    %322 = vector.broadcast %cst_91 : f32 to vector<16x16xf32>
    %323 = arith.select %321, %260, %322 : vector<16x16xi1>, vector<16x16xf32>
    %cst_92 = arith.constant 1.000000e-01 : f32
    %324 = vector.broadcast %cst_92 : f32 to vector<16x16xf32>
    %325 = arith.cmpf ogt, %323, %324 : vector<16x16xf32>
    %cst_93 = arith.constant 2.000000e-01 : f32
    %326 = vector.broadcast %cst_93 : f32 to vector<16x16xf32>
    %327 = arith.cmpf ogt, %323, %326 : vector<16x16xf32>
    %cst_94 = arith.constant 5.000000e-01 : f32
    %cst_95 = arith.constant 0.000000e+00 : f32
    %328 = vector.broadcast %cst_94 : f32 to vector<16x16xf32>
    %329 = vector.broadcast %cst_95 : f32 to vector<16x16xf32>
    %330 = arith.select %325, %328, %329 : vector<16x16xi1>, vector<16x16xf32>
    %cst_96 = arith.constant 1.000000e+00 : f32
    %331 = vector.broadcast %cst_96 : f32 to vector<16x16xf32>
    %332 = arith.select %327, %331, %330 : vector<16x16xi1>, vector<16x16xf32>
    %cst_97 = arith.constant 0.000000e+00 : f32
    %333 = vector.broadcast %cst_97 : f32 to vector<1x16xf32>
    %334 = tpu.concatenate %333, %332, %333 in 0 : vector<1x16xf32>, vector<16x16xf32>, vector<1x16xf32> -> vector<18x16xf32>
    %cst_98 = arith.constant 0.000000e+00 : f32
    %335 = vector.broadcast %cst_98 : f32 to vector<18x1xf32>
    %336 = tpu.concatenate %335, %334, %335 in 1 : vector<18x1xf32>, vector<18x16xf32>, vector<18x1xf32> -> vector<18x18xf32>
    %c0_99 = arith.constant 0 : index
    %c0_100 = arith.constant 0 : index
    %337 = vector.load %arg4[%c0_99, %c0_100] : memref<18x18xf32, #tpu.memory_space<vmem>>, vector<18x18xf32>
    tpu.vector_store %arg4[%c0_99, %c0_100], %336 {strides = array<i32>} : memref<18x18xf32, #tpu.memory_space<vmem>>, vector<18x18xf32>,
    %c0_i32_101 = arith.constant 0 : i32
    %cst_102 = arith.constant 1.000000e+00 : f32
    %338:2 = scf.while (%arg5 = %c0_i32_101, %arg6 = %cst_102) : (i32, f32) -> (i32, f32) {
      %cst_189 = arith.constant 0.000000e+00 : f32
      %721 = arith.cmpf ogt, %arg6, %cst_189 : f32
      %c256_i32 = arith.constant 256 : i32
      %722 = arith.cmpi slt, %arg5, %c256_i32 : i32
      %723 = arith.andi %721, %722 : i1
      scf.condition(%723) %arg5, %arg6 : i32, f32
    } do {
    ^bb0(%arg5: i32, %arg6: f32):
      %c1_189 = arith.constant 1 : index
      %c1_190 = arith.constant 1 : index
      %721 = vector.load %arg4[%c1_189, %c1_190] : memref<18x18xf32, #tpu.memory_space<vmem>>, vector<16x16xf32>
      %cst_191 = arith.constant 5.000000e-01 : f32
      %722 = vector.broadcast %cst_191 : f32 to vector<16x16xf32>
      %723 = arith.cmpf oeq, %721, %722 : vector<16x16xf32>
      %cst_192 = arith.constant 1.000000e+00 : f32
      %724 = vector.broadcast %cst_192 : f32 to vector<16x16xf32>
      %725 = arith.cmpf oeq, %721, %724 : vector<16x16xf32>
      %c1_193 = arith.constant 1 : index
      %c2_194 = arith.constant 2 : index
      %726 = vector.load %arg4[%c1_193, %c2_194] : memref<18x18xf32, #tpu.memory_space<vmem>>, vector<16x16xf32>
      %cst_195 = arith.constant 1.000000e+00 : f32
      %727 = vector.broadcast %cst_195 : f32 to vector<16x16xf32>
      %728 = arith.cmpf oeq, %726, %727 : vector<16x16xf32>
      %c2_196 = arith.constant 2 : index
      %c2_197 = arith.constant 2 : index
      %729 = vector.load %arg4[%c2_196, %c2_197] : memref<18x18xf32, #tpu.memory_space<vmem>>, vector<16x16xf32>
      %cst_198 = arith.constant 1.000000e+00 : f32
      %730 = vector.broadcast %cst_198 : f32 to vector<16x16xf32>
      %731 = arith.cmpf oeq, %729, %730 : vector<16x16xf32>
      %732 = arith.ori %728, %731 : vector<16x16xi1>
      %c2_199 = arith.constant 2 : index
      %c1_200 = arith.constant 1 : index
      %733 = vector.load %arg4[%c2_199, %c1_200] : memref<18x18xf32, #tpu.memory_space<vmem>>, vector<16x16xf32>
      %cst_201 = arith.constant 1.000000e+00 : f32
      %734 = vector.broadcast %cst_201 : f32 to vector<16x16xf32>
      %735 = arith.cmpf oeq, %733, %734 : vector<16x16xf32>
      %736 = arith.ori %732, %735 : vector<16x16xi1>
      %c2_202 = arith.constant 2 : index
      %c0_203 = arith.constant 0 : index
      %737 = vector.load %arg4[%c2_202, %c0_203] : memref<18x18xf32, #tpu.memory_space<vmem>>, vector<16x16xf32>
      %cst_204 = arith.constant 1.000000e+00 : f32
      %738 = vector.broadcast %cst_204 : f32 to vector<16x16xf32>
      %739 = arith.cmpf oeq, %737, %738 : vector<16x16xf32>
      %740 = arith.ori %736, %739 : vector<16x16xi1>
      %c1_205 = arith.constant 1 : index
      %c0_206 = arith.constant 0 : index
      %741 = vector.load %arg4[%c1_205, %c0_206] : memref<18x18xf32, #tpu.memory_space<vmem>>, vector<16x16xf32>
      %cst_207 = arith.constant 1.000000e+00 : f32
      %742 = vector.broadcast %cst_207 : f32 to vector<16x16xf32>
      %743 = arith.cmpf oeq, %741, %742 : vector<16x16xf32>
      %744 = arith.ori %740, %743 : vector<16x16xi1>
      %c0_208 = arith.constant 0 : index
      %c0_209 = arith.constant 0 : index
      %745 = vector.load %arg4[%c0_208, %c0_209] : memref<18x18xf32, #tpu.memory_space<vmem>>, vector<16x16xf32>
      %cst_210 = arith.constant 1.000000e+00 : f32
      %746 = vector.broadcast %cst_210 : f32 to vector<16x16xf32>
      %747 = arith.cmpf oeq, %745, %746 : vector<16x16xf32>
      %748 = arith.ori %744, %747 : vector<16x16xi1>
      %c0_211 = arith.constant 0 : index
      %c1_212 = arith.constant 1 : index
      %749 = vector.load %arg4[%c0_211, %c1_212] : memref<18x18xf32, #tpu.memory_space<vmem>>, vector<16x16xf32>
      %cst_213 = arith.constant 1.000000e+00 : f32
      %750 = vector.broadcast %cst_213 : f32 to vector<16x16xf32>
      %751 = arith.cmpf oeq, %749, %750 : vector<16x16xf32>
      %752 = arith.ori %748, %751 : vector<16x16xi1>
      %c0_214 = arith.constant 0 : index
      %c2_215 = arith.constant 2 : index
      %753 = vector.load %arg4[%c0_214, %c2_215] : memref<18x18xf32, #tpu.memory_space<vmem>>, vector<16x16xf32>
      %cst_216 = arith.constant 1.000000e+00 : f32
      %754 = vector.broadcast %cst_216 : f32 to vector<16x16xf32>
      %755 = arith.cmpf oeq, %753, %754 : vector<16x16xf32>
      %756 = arith.ori %752, %755 : vector<16x16xi1>
      %757 = arith.andi %723, %756 : vector<16x16xi1>
      %758 = arith.ori %725, %757 : vector<16x16xi1>
      %cst_217 = arith.constant 5.000000e-01 : f32
      %cst_218 = arith.constant 0.000000e+00 : f32
      %759 = vector.broadcast %cst_217 : f32 to vector<16x16xf32>
      %760 = vector.broadcast %cst_218 : f32 to vector<16x16xf32>
      %761 = arith.select %723, %759, %760 : vector<16x16xi1>, vector<16x16xf32>
      %cst_219 = arith.constant 1.000000e+00 : f32
      %762 = vector.broadcast %cst_219 : f32 to vector<16x16xf32>
      %763 = arith.select %758, %762, %761 : vector<16x16xi1>, vector<16x16xf32>
      %c1_220 = arith.constant 1 : index
      %c1_221 = arith.constant 1 : index
      %764 = vector.load %arg4[%c1_220, %c1_221] : memref<18x18xf32, #tpu.memory_space<vmem>>, vector<16x16xf32>
      tpu.vector_store %arg4[%c1_220, %c1_221], %763 {strides = array<i32>} : memref<18x18xf32, #tpu.memory_space<vmem>>, vector<16x16xf32>,
      %c1_i32 = arith.constant 1 : i32
      %765 = arith.addi %arg5, %c1_i32 : i32
      %766 = arith.extui %757 : vector<16x16xi1> to vector<16x16xi32>
      %767 = arith.sitofp %766 : vector<16x16xi32> to vector<16x16xf32>
      %768 = vector.shape_cast %767 : vector<16x16xf32> to vector<1x16x16xf32>
      %cst_222 = arith.constant dense<0.000000e+00> : vector<1xf32>
      %769 = vector.multi_reduction <add>, %768, %cst_222 [1, 2] : vector<1x16x16xf32> to vector<1xf32>
      %770 = vector.shape_cast %769 : vector<1xf32> to vector<1x1x1xf32>
      %771 = vector.extract %770[0, 0, 0] : f32 from vector<1x1x1xf32>
      scf.yield %765, %771 : i32, f32
    }
    %c1_103 = arith.constant 1 : index
    %c1_104 = arith.constant 1 : index
    %339 = vector.load %arg4[%c1_103, %c1_104] : memref<18x18xf32, #tpu.memory_space<vmem>>, vector<16x16xf32>
    %340 = vector.extract_strided_slice %169 {offsets = [3, 0], sizes = [1, 16], strides = [1, 1]} : vector<16x16xf32> to vector<1x16xf32>
    %341 = vector.extract_strided_slice %169 {offsets = [2, 0], sizes = [1, 16], strides = [1, 1]} : vector<16x16xf32> to vector<1x16xf32>
    %342 = vector.extract_strided_slice %169 {offsets = [1, 0], sizes = [1, 16], strides = [1, 1]} : vector<16x16xf32> to vector<1x16xf32>
    %343 = vector.extract_strided_slice %169 {offsets = [14, 0], sizes = [1, 16], strides = [1, 1]} : vector<16x16xf32> to vector<1x16xf32>
    %344 = vector.extract_strided_slice %169 {offsets = [13, 0], sizes = [1, 16], strides = [1, 1]} : vector<16x16xf32> to vector<1x16xf32>
    %345 = vector.extract_strided_slice %169 {offsets = [12, 0], sizes = [1, 16], strides = [1, 1]} : vector<16x16xf32> to vector<1x16xf32>
    %346 = tpu.concatenate %340, %341, %342, %169, %343, %344, %345 in 0 : vector<1x16xf32>, vector<1x16xf32>, vector<1x16xf32>, vector<16x16xf32>, vector<1x16xf32>, vector<1x16xf32>, vector<1x16xf32> -> vector<22x16xf32>
    %347 = vector.extract_strided_slice %346 {offsets = [0, 0], sizes = [16, 16], strides = [1, 1]} : vector<22x16xf32> to vector<16x16xf32>
    %cst_105 = arith.constant 0.036632847 : f32
    %348 = vector.broadcast %cst_105 : f32 to vector<16x16xf32>
    %349 = arith.mulf %347, %348 : vector<16x16xf32>
    %350 = vector.extract_strided_slice %346 {offsets = [1, 0], sizes = [16, 16], strides = [1, 1]} : vector<22x16xf32> to vector<16x16xf32>
    %cst_106 = arith.constant 0.111280762 : f32
    %351 = vector.broadcast %cst_106 : f32 to vector<16x16xf32>
    %352 = arith.mulf %350, %351 : vector<16x16xf32>
    %353 = arith.addf %349, %352 : vector<16x16xf32>
    %354 = vector.extract_strided_slice %346 {offsets = [2, 0], sizes = [16, 16], strides = [1, 1]} : vector<22x16xf32> to vector<16x16xf32>
    %cst_107 = arith.constant 0.216745317 : f32
    %355 = vector.broadcast %cst_107 : f32 to vector<16x16xf32>
    %356 = arith.mulf %354, %355 : vector<16x16xf32>
    %357 = arith.addf %353, %356 : vector<16x16xf32>
    %358 = vector.extract_strided_slice %346 {offsets = [3, 0], sizes = [16, 16], strides = [1, 1]} : vector<22x16xf32> to vector<16x16xf32>
    %cst_108 = arith.constant 0.270682156 : f32
    %359 = vector.broadcast %cst_108 : f32 to vector<16x16xf32>
    %360 = arith.mulf %358, %359 : vector<16x16xf32>
    %361 = arith.addf %357, %360 : vector<16x16xf32>
    %362 = vector.extract_strided_slice %346 {offsets = [4, 0], sizes = [16, 16], strides = [1, 1]} : vector<22x16xf32> to vector<16x16xf32>
    %cst_109 = arith.constant 0.216745317 : f32
    %363 = vector.broadcast %cst_109 : f32 to vector<16x16xf32>
    %364 = arith.mulf %362, %363 : vector<16x16xf32>
    %365 = arith.addf %361, %364 : vector<16x16xf32>
    %366 = vector.extract_strided_slice %346 {offsets = [5, 0], sizes = [16, 16], strides = [1, 1]} : vector<22x16xf32> to vector<16x16xf32>
    %cst_110 = arith.constant 0.111280762 : f32
    %367 = vector.broadcast %cst_110 : f32 to vector<16x16xf32>
    %368 = arith.mulf %366, %367 : vector<16x16xf32>
    %369 = arith.addf %365, %368 : vector<16x16xf32>
    %370 = vector.extract_strided_slice %346 {offsets = [6, 0], sizes = [16, 16], strides = [1, 1]} : vector<22x16xf32> to vector<16x16xf32>
    %cst_111 = arith.constant 0.036632847 : f32
    %371 = vector.broadcast %cst_111 : f32 to vector<16x16xf32>
    %372 = arith.mulf %370, %371 : vector<16x16xf32>
    %373 = arith.addf %369, %372 : vector<16x16xf32>
    %374 = vector.extract_strided_slice %373 {offsets = [0, 3], sizes = [16, 1], strides = [1, 1]} : vector<16x16xf32> to vector<16x1xf32>
    %375 = vector.extract_strided_slice %373 {offsets = [0, 2], sizes = [16, 1], strides = [1, 1]} : vector<16x16xf32> to vector<16x1xf32>
    %376 = vector.extract_strided_slice %373 {offsets = [0, 1], sizes = [16, 1], strides = [1, 1]} : vector<16x16xf32> to vector<16x1xf32>
    %377 = vector.extract_strided_slice %373 {offsets = [0, 14], sizes = [16, 1], strides = [1, 1]} : vector<16x16xf32> to vector<16x1xf32>
    %378 = vector.extract_strided_slice %373 {offsets = [0, 13], sizes = [16, 1], strides = [1, 1]} : vector<16x16xf32> to vector<16x1xf32>
    %379 = vector.extract_strided_slice %373 {offsets = [0, 12], sizes = [16, 1], strides = [1, 1]} : vector<16x16xf32> to vector<16x1xf32>
    %380 = tpu.concatenate %374, %375, %376, %373, %377, %378, %379 in 1 : vector<16x1xf32>, vector<16x1xf32>, vector<16x1xf32>, vector<16x16xf32>, vector<16x1xf32>, vector<16x1xf32>, vector<16x1xf32> -> vector<16x22xf32>
    %381 = vector.extract_strided_slice %380 {offsets = [0, 0], sizes = [16, 16], strides = [1, 1]} : vector<16x22xf32> to vector<16x16xf32>
    %cst_112 = arith.constant 0.036632847 : f32
    %382 = vector.broadcast %cst_112 : f32 to vector<16x16xf32>
    %383 = arith.mulf %381, %382 : vector<16x16xf32>
    %384 = vector.extract_strided_slice %380 {offsets = [0, 1], sizes = [16, 16], strides = [1, 1]} : vector<16x22xf32> to vector<16x16xf32>
    %cst_113 = arith.constant 0.111280762 : f32
    %385 = vector.broadcast %cst_113 : f32 to vector<16x16xf32>
    %386 = arith.mulf %384, %385 : vector<16x16xf32>
    %387 = arith.addf %383, %386 : vector<16x16xf32>
    %388 = vector.extract_strided_slice %380 {offsets = [0, 2], sizes = [16, 16], strides = [1, 1]} : vector<16x22xf32> to vector<16x16xf32>
    %cst_114 = arith.constant 0.216745317 : f32
    %389 = vector.broadcast %cst_114 : f32 to vector<16x16xf32>
    %390 = arith.mulf %388, %389 : vector<16x16xf32>
    %391 = arith.addf %387, %390 : vector<16x16xf32>
    %392 = vector.extract_strided_slice %380 {offsets = [0, 3], sizes = [16, 16], strides = [1, 1]} : vector<16x22xf32> to vector<16x16xf32>
    %cst_115 = arith.constant 0.270682156 : f32
    %393 = vector.broadcast %cst_115 : f32 to vector<16x16xf32>
    %394 = arith.mulf %392, %393 : vector<16x16xf32>
    %395 = arith.addf %391, %394 : vector<16x16xf32>
    %396 = vector.extract_strided_slice %380 {offsets = [0, 4], sizes = [16, 16], strides = [1, 1]} : vector<16x22xf32> to vector<16x16xf32>
    %cst_116 = arith.constant 0.216745317 : f32
    %397 = vector.broadcast %cst_116 : f32 to vector<16x16xf32>
    %398 = arith.mulf %396, %397 : vector<16x16xf32>
    %399 = arith.addf %395, %398 : vector<16x16xf32>
    %400 = vector.extract_strided_slice %380 {offsets = [0, 5], sizes = [16, 16], strides = [1, 1]} : vector<16x22xf32> to vector<16x16xf32>
    %cst_117 = arith.constant 0.111280762 : f32
    %401 = vector.broadcast %cst_117 : f32 to vector<16x16xf32>
    %402 = arith.mulf %400, %401 : vector<16x16xf32>
    %403 = arith.addf %399, %402 : vector<16x16xf32>
    %404 = vector.extract_strided_slice %380 {offsets = [0, 6], sizes = [16, 16], strides = [1, 1]} : vector<16x22xf32> to vector<16x16xf32>
    %cst_118 = arith.constant 0.036632847 : f32
    %405 = vector.broadcast %cst_118 : f32 to vector<16x16xf32>
    %406 = arith.mulf %404, %405 : vector<16x16xf32>
    %407 = arith.addf %403, %406 : vector<16x16xf32>
    %408 = vector.extract_strided_slice %339 {offsets = [3, 0], sizes = [1, 16], strides = [1, 1]} : vector<16x16xf32> to vector<1x16xf32>
    %409 = vector.extract_strided_slice %339 {offsets = [2, 0], sizes = [1, 16], strides = [1, 1]} : vector<16x16xf32> to vector<1x16xf32>
    %410 = vector.extract_strided_slice %339 {offsets = [1, 0], sizes = [1, 16], strides = [1, 1]} : vector<16x16xf32> to vector<1x16xf32>
    %411 = vector.extract_strided_slice %339 {offsets = [14, 0], sizes = [1, 16], strides = [1, 1]} : vector<16x16xf32> to vector<1x16xf32>
    %412 = vector.extract_strided_slice %339 {offsets = [13, 0], sizes = [1, 16], strides = [1, 1]} : vector<16x16xf32> to vector<1x16xf32>
    %413 = vector.extract_strided_slice %339 {offsets = [12, 0], sizes = [1, 16], strides = [1, 1]} : vector<16x16xf32> to vector<1x16xf32>
    %414 = tpu.concatenate %408, %409, %410, %339, %411, %412, %413 in 0 : vector<1x16xf32>, vector<1x16xf32>, vector<1x16xf32>, vector<16x16xf32>, vector<1x16xf32>, vector<1x16xf32>, vector<1x16xf32> -> vector<22x16xf32>
    %415 = vector.extract_strided_slice %414 {offsets = [0, 0], sizes = [16, 16], strides = [1, 1]} : vector<22x16xf32> to vector<16x16xf32>
    %cst_119 = arith.constant 0.036632847 : f32
    %416 = vector.broadcast %cst_119 : f32 to vector<16x16xf32>
    %417 = arith.mulf %415, %416 : vector<16x16xf32>
    %418 = vector.extract_strided_slice %414 {offsets = [1, 0], sizes = [16, 16], strides = [1, 1]} : vector<22x16xf32> to vector<16x16xf32>
    %cst_120 = arith.constant 0.111280762 : f32
    %419 = vector.broadcast %cst_120 : f32 to vector<16x16xf32>
    %420 = arith.mulf %418, %419 : vector<16x16xf32>
    %421 = arith.addf %417, %420 : vector<16x16xf32>
    %422 = vector.extract_strided_slice %414 {offsets = [2, 0], sizes = [16, 16], strides = [1, 1]} : vector<22x16xf32> to vector<16x16xf32>
    %cst_121 = arith.constant 0.216745317 : f32
    %423 = vector.broadcast %cst_121 : f32 to vector<16x16xf32>
    %424 = arith.mulf %422, %423 : vector<16x16xf32>
    %425 = arith.addf %421, %424 : vector<16x16xf32>
    %426 = vector.extract_strided_slice %414 {offsets = [3, 0], sizes = [16, 16], strides = [1, 1]} : vector<22x16xf32> to vector<16x16xf32>
    %cst_122 = arith.constant 0.270682156 : f32
    %427 = vector.broadcast %cst_122 : f32 to vector<16x16xf32>
    %428 = arith.mulf %426, %427 : vector<16x16xf32>
    %429 = arith.addf %425, %428 : vector<16x16xf32>
    %430 = vector.extract_strided_slice %414 {offsets = [4, 0], sizes = [16, 16], strides = [1, 1]} : vector<22x16xf32> to vector<16x16xf32>
    %cst_123 = arith.constant 0.216745317 : f32
    %431 = vector.broadcast %cst_123 : f32 to vector<16x16xf32>
    %432 = arith.mulf %430, %431 : vector<16x16xf32>
    %433 = arith.addf %429, %432 : vector<16x16xf32>
    %434 = vector.extract_strided_slice %414 {offsets = [5, 0], sizes = [16, 16], strides = [1, 1]} : vector<22x16xf32> to vector<16x16xf32>
    %cst_124 = arith.constant 0.111280762 : f32
    %435 = vector.broadcast %cst_124 : f32 to vector<16x16xf32>
    %436 = arith.mulf %434, %435 : vector<16x16xf32>
    %437 = arith.addf %433, %436 : vector<16x16xf32>
    %438 = vector.extract_strided_slice %414 {offsets = [6, 0], sizes = [16, 16], strides = [1, 1]} : vector<22x16xf32> to vector<16x16xf32>
    %cst_125 = arith.constant 0.036632847 : f32
    %439 = vector.broadcast %cst_125 : f32 to vector<16x16xf32>
    %440 = arith.mulf %438, %439 : vector<16x16xf32>
    %441 = arith.addf %437, %440 : vector<16x16xf32>
    %442 = vector.extract_strided_slice %441 {offsets = [0, 3], sizes = [16, 1], strides = [1, 1]} : vector<16x16xf32> to vector<16x1xf32>
    %443 = vector.extract_strided_slice %441 {offsets = [0, 2], sizes = [16, 1], strides = [1, 1]} : vector<16x16xf32> to vector<16x1xf32>
    %444 = vector.extract_strided_slice %441 {offsets = [0, 1], sizes = [16, 1], strides = [1, 1]} : vector<16x16xf32> to vector<16x1xf32>
    %445 = vector.extract_strided_slice %441 {offsets = [0, 14], sizes = [16, 1], strides = [1, 1]} : vector<16x16xf32> to vector<16x1xf32>
    %446 = vector.extract_strided_slice %441 {offsets = [0, 13], sizes = [16, 1], strides = [1, 1]} : vector<16x16xf32> to vector<16x1xf32>
    %447 = vector.extract_strided_slice %441 {offsets = [0, 12], sizes = [16, 1], strides = [1, 1]} : vector<16x16xf32> to vector<16x1xf32>
    %448 = tpu.concatenate %442, %443, %444, %441, %445, %446, %447 in 1 : vector<16x1xf32>, vector<16x1xf32>, vector<16x1xf32>, vector<16x16xf32>, vector<16x1xf32>, vector<16x1xf32>, vector<16x1xf32> -> vector<16x22xf32>
    %449 = vector.extract_strided_slice %448 {offsets = [0, 0], sizes = [16, 16], strides = [1, 1]} : vector<16x22xf32> to vector<16x16xf32>
    %cst_126 = arith.constant 0.036632847 : f32
    %450 = vector.broadcast %cst_126 : f32 to vector<16x16xf32>
    %451 = arith.mulf %449, %450 : vector<16x16xf32>
    %452 = vector.extract_strided_slice %448 {offsets = [0, 1], sizes = [16, 16], strides = [1, 1]} : vector<16x22xf32> to vector<16x16xf32>
    %cst_127 = arith.constant 0.111280762 : f32
    %453 = vector.broadcast %cst_127 : f32 to vector<16x16xf32>
    %454 = arith.mulf %452, %453 : vector<16x16xf32>
    %455 = arith.addf %451, %454 : vector<16x16xf32>
    %456 = vector.extract_strided_slice %448 {offsets = [0, 2], sizes = [16, 16], strides = [1, 1]} : vector<16x22xf32> to vector<16x16xf32>
    %cst_128 = arith.constant 0.216745317 : f32
    %457 = vector.broadcast %cst_128 : f32 to vector<16x16xf32>
    %458 = arith.mulf %456, %457 : vector<16x16xf32>
    %459 = arith.addf %455, %458 : vector<16x16xf32>
    %460 = vector.extract_strided_slice %448 {offsets = [0, 3], sizes = [16, 16], strides = [1, 1]} : vector<16x22xf32> to vector<16x16xf32>
    %cst_129 = arith.constant 0.270682156 : f32
    %461 = vector.broadcast %cst_129 : f32 to vector<16x16xf32>
    %462 = arith.mulf %460, %461 : vector<16x16xf32>
    %463 = arith.addf %459, %462 : vector<16x16xf32>
    %464 = vector.extract_strided_slice %448 {offsets = [0, 4], sizes = [16, 16], strides = [1, 1]} : vector<16x22xf32> to vector<16x16xf32>
    %cst_130 = arith.constant 0.216745317 : f32
    %465 = vector.broadcast %cst_130 : f32 to vector<16x16xf32>
    %466 = arith.mulf %464, %465 : vector<16x16xf32>
    %467 = arith.addf %463, %466 : vector<16x16xf32>
    %468 = vector.extract_strided_slice %448 {offsets = [0, 5], sizes = [16, 16], strides = [1, 1]} : vector<16x22xf32> to vector<16x16xf32>
    %cst_131 = arith.constant 0.111280762 : f32
    %469 = vector.broadcast %cst_131 : f32 to vector<16x16xf32>
    %470 = arith.mulf %468, %469 : vector<16x16xf32>
    %471 = arith.addf %467, %470 : vector<16x16xf32>
    %472 = vector.extract_strided_slice %448 {offsets = [0, 6], sizes = [16, 16], strides = [1, 1]} : vector<16x22xf32> to vector<16x16xf32>
    %cst_132 = arith.constant 0.036632847 : f32
    %473 = vector.broadcast %cst_132 : f32 to vector<16x16xf32>
    %474 = arith.mulf %472, %473 : vector<16x16xf32>
    %475 = arith.addf %471, %474 : vector<16x16xf32>
    %476 = arith.mulf %407, %407 : vector<16x16xf32>
    %477 = arith.mulf %475, %475 : vector<16x16xf32>
    %478 = arith.mulf %407, %475 : vector<16x16xf32>
    %479 = arith.mulf %169, %169 : vector<16x16xf32>
    %480 = vector.extract_strided_slice %479 {offsets = [3, 0], sizes = [1, 16], strides = [1, 1]} : vector<16x16xf32> to vector<1x16xf32>
    %481 = vector.extract_strided_slice %479 {offsets = [2, 0], sizes = [1, 16], strides = [1, 1]} : vector<16x16xf32> to vector<1x16xf32>
    %482 = vector.extract_strided_slice %479 {offsets = [1, 0], sizes = [1, 16], strides = [1, 1]} : vector<16x16xf32> to vector<1x16xf32>
    %483 = vector.extract_strided_slice %479 {offsets = [14, 0], sizes = [1, 16], strides = [1, 1]} : vector<16x16xf32> to vector<1x16xf32>
    %484 = vector.extract_strided_slice %479 {offsets = [13, 0], sizes = [1, 16], strides = [1, 1]} : vector<16x16xf32> to vector<1x16xf32>
    %485 = vector.extract_strided_slice %479 {offsets = [12, 0], sizes = [1, 16], strides = [1, 1]} : vector<16x16xf32> to vector<1x16xf32>
    %486 = tpu.concatenate %480, %481, %482, %479, %483, %484, %485 in 0 : vector<1x16xf32>, vector<1x16xf32>, vector<1x16xf32>, vector<16x16xf32>, vector<1x16xf32>, vector<1x16xf32>, vector<1x16xf32> -> vector<22x16xf32>
    %487 = vector.extract_strided_slice %486 {offsets = [0, 0], sizes = [16, 16], strides = [1, 1]} : vector<22x16xf32> to vector<16x16xf32>
    %cst_133 = arith.constant 0.036632847 : f32
    %488 = vector.broadcast %cst_133 : f32 to vector<16x16xf32>
    %489 = arith.mulf %487, %488 : vector<16x16xf32>
    %490 = vector.extract_strided_slice %486 {offsets = [1, 0], sizes = [16, 16], strides = [1, 1]} : vector<22x16xf32> to vector<16x16xf32>
    %cst_134 = arith.constant 0.111280762 : f32
    %491 = vector.broadcast %cst_134 : f32 to vector<16x16xf32>
    %492 = arith.mulf %490, %491 : vector<16x16xf32>
    %493 = arith.addf %489, %492 : vector<16x16xf32>
    %494 = vector.extract_strided_slice %486 {offsets = [2, 0], sizes = [16, 16], strides = [1, 1]} : vector<22x16xf32> to vector<16x16xf32>
    %cst_135 = arith.constant 0.216745317 : f32
    %495 = vector.broadcast %cst_135 : f32 to vector<16x16xf32>
    %496 = arith.mulf %494, %495 : vector<16x16xf32>
    %497 = arith.addf %493, %496 : vector<16x16xf32>
    %498 = vector.extract_strided_slice %486 {offsets = [3, 0], sizes = [16, 16], strides = [1, 1]} : vector<22x16xf32> to vector<16x16xf32>
    %cst_136 = arith.constant 0.270682156 : f32
    %499 = vector.broadcast %cst_136 : f32 to vector<16x16xf32>
    %500 = arith.mulf %498, %499 : vector<16x16xf32>
    %501 = arith.addf %497, %500 : vector<16x16xf32>
    %502 = vector.extract_strided_slice %486 {offsets = [4, 0], sizes = [16, 16], strides = [1, 1]} : vector<22x16xf32> to vector<16x16xf32>
    %cst_137 = arith.constant 0.216745317 : f32
    %503 = vector.broadcast %cst_137 : f32 to vector<16x16xf32>
    %504 = arith.mulf %502, %503 : vector<16x16xf32>
    %505 = arith.addf %501, %504 : vector<16x16xf32>
    %506 = vector.extract_strided_slice %486 {offsets = [5, 0], sizes = [16, 16], strides = [1, 1]} : vector<22x16xf32> to vector<16x16xf32>
    %cst_138 = arith.constant 0.111280762 : f32
    %507 = vector.broadcast %cst_138 : f32 to vector<16x16xf32>
    %508 = arith.mulf %506, %507 : vector<16x16xf32>
    %509 = arith.addf %505, %508 : vector<16x16xf32>
    %510 = vector.extract_strided_slice %486 {offsets = [6, 0], sizes = [16, 16], strides = [1, 1]} : vector<22x16xf32> to vector<16x16xf32>
    %cst_139 = arith.constant 0.036632847 : f32
    %511 = vector.broadcast %cst_139 : f32 to vector<16x16xf32>
    %512 = arith.mulf %510, %511 : vector<16x16xf32>
    %513 = arith.addf %509, %512 : vector<16x16xf32>
    %514 = vector.extract_strided_slice %513 {offsets = [0, 3], sizes = [16, 1], strides = [1, 1]} : vector<16x16xf32> to vector<16x1xf32>
    %515 = vector.extract_strided_slice %513 {offsets = [0, 2], sizes = [16, 1], strides = [1, 1]} : vector<16x16xf32> to vector<16x1xf32>
    %516 = vector.extract_strided_slice %513 {offsets = [0, 1], sizes = [16, 1], strides = [1, 1]} : vector<16x16xf32> to vector<16x1xf32>
    %517 = vector.extract_strided_slice %513 {offsets = [0, 14], sizes = [16, 1], strides = [1, 1]} : vector<16x16xf32> to vector<16x1xf32>
    %518 = vector.extract_strided_slice %513 {offsets = [0, 13], sizes = [16, 1], strides = [1, 1]} : vector<16x16xf32> to vector<16x1xf32>
    %519 = vector.extract_strided_slice %513 {offsets = [0, 12], sizes = [16, 1], strides = [1, 1]} : vector<16x16xf32> to vector<16x1xf32>
    %520 = tpu.concatenate %514, %515, %516, %513, %517, %518, %519 in 1 : vector<16x1xf32>, vector<16x1xf32>, vector<16x1xf32>, vector<16x16xf32>, vector<16x1xf32>, vector<16x1xf32>, vector<16x1xf32> -> vector<16x22xf32>
    %521 = vector.extract_strided_slice %520 {offsets = [0, 0], sizes = [16, 16], strides = [1, 1]} : vector<16x22xf32> to vector<16x16xf32>
    %cst_140 = arith.constant 0.036632847 : f32
    %522 = vector.broadcast %cst_140 : f32 to vector<16x16xf32>
    %523 = arith.mulf %521, %522 : vector<16x16xf32>
    %524 = vector.extract_strided_slice %520 {offsets = [0, 1], sizes = [16, 16], strides = [1, 1]} : vector<16x22xf32> to vector<16x16xf32>
    %cst_141 = arith.constant 0.111280762 : f32
    %525 = vector.broadcast %cst_141 : f32 to vector<16x16xf32>
    %526 = arith.mulf %524, %525 : vector<16x16xf32>
    %527 = arith.addf %523, %526 : vector<16x16xf32>
    %528 = vector.extract_strided_slice %520 {offsets = [0, 2], sizes = [16, 16], strides = [1, 1]} : vector<16x22xf32> to vector<16x16xf32>
    %cst_142 = arith.constant 0.216745317 : f32
    %529 = vector.broadcast %cst_142 : f32 to vector<16x16xf32>
    %530 = arith.mulf %528, %529 : vector<16x16xf32>
    %531 = arith.addf %527, %530 : vector<16x16xf32>
    %532 = vector.extract_strided_slice %520 {offsets = [0, 3], sizes = [16, 16], strides = [1, 1]} : vector<16x22xf32> to vector<16x16xf32>
    %cst_143 = arith.constant 0.270682156 : f32
    %533 = vector.broadcast %cst_143 : f32 to vector<16x16xf32>
    %534 = arith.mulf %532, %533 : vector<16x16xf32>
    %535 = arith.addf %531, %534 : vector<16x16xf32>
    %536 = vector.extract_strided_slice %520 {offsets = [0, 4], sizes = [16, 16], strides = [1, 1]} : vector<16x22xf32> to vector<16x16xf32>
    %cst_144 = arith.constant 0.216745317 : f32
    %537 = vector.broadcast %cst_144 : f32 to vector<16x16xf32>
    %538 = arith.mulf %536, %537 : vector<16x16xf32>
    %539 = arith.addf %535, %538 : vector<16x16xf32>
    %540 = vector.extract_strided_slice %520 {offsets = [0, 5], sizes = [16, 16], strides = [1, 1]} : vector<16x22xf32> to vector<16x16xf32>
    %cst_145 = arith.constant 0.111280762 : f32
    %541 = vector.broadcast %cst_145 : f32 to vector<16x16xf32>
    %542 = arith.mulf %540, %541 : vector<16x16xf32>
    %543 = arith.addf %539, %542 : vector<16x16xf32>
    %544 = vector.extract_strided_slice %520 {offsets = [0, 6], sizes = [16, 16], strides = [1, 1]} : vector<16x22xf32> to vector<16x16xf32>
    %cst_146 = arith.constant 0.036632847 : f32
    %545 = vector.broadcast %cst_146 : f32 to vector<16x16xf32>
    %546 = arith.mulf %544, %545 : vector<16x16xf32>
    %547 = arith.addf %543, %546 : vector<16x16xf32>
    %548 = arith.subf %547, %476 : vector<16x16xf32>
    %549 = arith.mulf %339, %339 : vector<16x16xf32>
    %550 = vector.extract_strided_slice %549 {offsets = [3, 0], sizes = [1, 16], strides = [1, 1]} : vector<16x16xf32> to vector<1x16xf32>
    %551 = vector.extract_strided_slice %549 {offsets = [2, 0], sizes = [1, 16], strides = [1, 1]} : vector<16x16xf32> to vector<1x16xf32>
    %552 = vector.extract_strided_slice %549 {offsets = [1, 0], sizes = [1, 16], strides = [1, 1]} : vector<16x16xf32> to vector<1x16xf32>
    %553 = vector.extract_strided_slice %549 {offsets = [14, 0], sizes = [1, 16], strides = [1, 1]} : vector<16x16xf32> to vector<1x16xf32>
    %554 = vector.extract_strided_slice %549 {offsets = [13, 0], sizes = [1, 16], strides = [1, 1]} : vector<16x16xf32> to vector<1x16xf32>
    %555 = vector.extract_strided_slice %549 {offsets = [12, 0], sizes = [1, 16], strides = [1, 1]} : vector<16x16xf32> to vector<1x16xf32>
    %556 = tpu.concatenate %550, %551, %552, %549, %553, %554, %555 in 0 : vector<1x16xf32>, vector<1x16xf32>, vector<1x16xf32>, vector<16x16xf32>, vector<1x16xf32>, vector<1x16xf32>, vector<1x16xf32> -> vector<22x16xf32>
    %557 = vector.extract_strided_slice %556 {offsets = [0, 0], sizes = [16, 16], strides = [1, 1]} : vector<22x16xf32> to vector<16x16xf32>
    %cst_147 = arith.constant 0.036632847 : f32
    %558 = vector.broadcast %cst_147 : f32 to vector<16x16xf32>
    %559 = arith.mulf %557, %558 : vector<16x16xf32>
    %560 = vector.extract_strided_slice %556 {offsets = [1, 0], sizes = [16, 16], strides = [1, 1]} : vector<22x16xf32> to vector<16x16xf32>
    %cst_148 = arith.constant 0.111280762 : f32
    %561 = vector.broadcast %cst_148 : f32 to vector<16x16xf32>
    %562 = arith.mulf %560, %561 : vector<16x16xf32>
    %563 = arith.addf %559, %562 : vector<16x16xf32>
    %564 = vector.extract_strided_slice %556 {offsets = [2, 0], sizes = [16, 16], strides = [1, 1]} : vector<22x16xf32> to vector<16x16xf32>
    %cst_149 = arith.constant 0.216745317 : f32
    %565 = vector.broadcast %cst_149 : f32 to vector<16x16xf32>
    %566 = arith.mulf %564, %565 : vector<16x16xf32>
    %567 = arith.addf %563, %566 : vector<16x16xf32>
    %568 = vector.extract_strided_slice %556 {offsets = [3, 0], sizes = [16, 16], strides = [1, 1]} : vector<22x16xf32> to vector<16x16xf32>
    %cst_150 = arith.constant 0.270682156 : f32
    %569 = vector.broadcast %cst_150 : f32 to vector<16x16xf32>
    %570 = arith.mulf %568, %569 : vector<16x16xf32>
    %571 = arith.addf %567, %570 : vector<16x16xf32>
    %572 = vector.extract_strided_slice %556 {offsets = [4, 0], sizes = [16, 16], strides = [1, 1]} : vector<22x16xf32> to vector<16x16xf32>
    %cst_151 = arith.constant 0.216745317 : f32
    %573 = vector.broadcast %cst_151 : f32 to vector<16x16xf32>
    %574 = arith.mulf %572, %573 : vector<16x16xf32>
    %575 = arith.addf %571, %574 : vector<16x16xf32>
    %576 = vector.extract_strided_slice %556 {offsets = [5, 0], sizes = [16, 16], strides = [1, 1]} : vector<22x16xf32> to vector<16x16xf32>
    %cst_152 = arith.constant 0.111280762 : f32
    %577 = vector.broadcast %cst_152 : f32 to vector<16x16xf32>
    %578 = arith.mulf %576, %577 : vector<16x16xf32>
    %579 = arith.addf %575, %578 : vector<16x16xf32>
    %580 = vector.extract_strided_slice %556 {offsets = [6, 0], sizes = [16, 16], strides = [1, 1]} : vector<22x16xf32> to vector<16x16xf32>
    %cst_153 = arith.constant 0.036632847 : f32
    %581 = vector.broadcast %cst_153 : f32 to vector<16x16xf32>
    %582 = arith.mulf %580, %581 : vector<16x16xf32>
    %583 = arith.addf %579, %582 : vector<16x16xf32>
    %584 = vector.extract_strided_slice %583 {offsets = [0, 3], sizes = [16, 1], strides = [1, 1]} : vector<16x16xf32> to vector<16x1xf32>
    %585 = vector.extract_strided_slice %583 {offsets = [0, 2], sizes = [16, 1], strides = [1, 1]} : vector<16x16xf32> to vector<16x1xf32>
    %586 = vector.extract_strided_slice %583 {offsets = [0, 1], sizes = [16, 1], strides = [1, 1]} : vector<16x16xf32> to vector<16x1xf32>
    %587 = vector.extract_strided_slice %583 {offsets = [0, 14], sizes = [16, 1], strides = [1, 1]} : vector<16x16xf32> to vector<16x1xf32>
    %588 = vector.extract_strided_slice %583 {offsets = [0, 13], sizes = [16, 1], strides = [1, 1]} : vector<16x16xf32> to vector<16x1xf32>
    %589 = vector.extract_strided_slice %583 {offsets = [0, 12], sizes = [16, 1], strides = [1, 1]} : vector<16x16xf32> to vector<16x1xf32>
    %590 = tpu.concatenate %584, %585, %586, %583, %587, %588, %589 in 1 : vector<16x1xf32>, vector<16x1xf32>, vector<16x1xf32>, vector<16x16xf32>, vector<16x1xf32>, vector<16x1xf32>, vector<16x1xf32> -> vector<16x22xf32>
    %591 = vector.extract_strided_slice %590 {offsets = [0, 0], sizes = [16, 16], strides = [1, 1]} : vector<16x22xf32> to vector<16x16xf32>
    %cst_154 = arith.constant 0.036632847 : f32
    %592 = vector.broadcast %cst_154 : f32 to vector<16x16xf32>
    %593 = arith.mulf %591, %592 : vector<16x16xf32>
    %594 = vector.extract_strided_slice %590 {offsets = [0, 1], sizes = [16, 16], strides = [1, 1]} : vector<16x22xf32> to vector<16x16xf32>
    %cst_155 = arith.constant 0.111280762 : f32
    %595 = vector.broadcast %cst_155 : f32 to vector<16x16xf32>
    %596 = arith.mulf %594, %595 : vector<16x16xf32>
    %597 = arith.addf %593, %596 : vector<16x16xf32>
    %598 = vector.extract_strided_slice %590 {offsets = [0, 2], sizes = [16, 16], strides = [1, 1]} : vector<16x22xf32> to vector<16x16xf32>
    %cst_156 = arith.constant 0.216745317 : f32
    %599 = vector.broadcast %cst_156 : f32 to vector<16x16xf32>
    %600 = arith.mulf %598, %599 : vector<16x16xf32>
    %601 = arith.addf %597, %600 : vector<16x16xf32>
    %602 = vector.extract_strided_slice %590 {offsets = [0, 3], sizes = [16, 16], strides = [1, 1]} : vector<16x22xf32> to vector<16x16xf32>
    %cst_157 = arith.constant 0.270682156 : f32
    %603 = vector.broadcast %cst_157 : f32 to vector<16x16xf32>
    %604 = arith.mulf %602, %603 : vector<16x16xf32>
    %605 = arith.addf %601, %604 : vector<16x16xf32>
    %606 = vector.extract_strided_slice %590 {offsets = [0, 4], sizes = [16, 16], strides = [1, 1]} : vector<16x22xf32> to vector<16x16xf32>
    %cst_158 = arith.constant 0.216745317 : f32
    %607 = vector.broadcast %cst_158 : f32 to vector<16x16xf32>
    %608 = arith.mulf %606, %607 : vector<16x16xf32>
    %609 = arith.addf %605, %608 : vector<16x16xf32>
    %610 = vector.extract_strided_slice %590 {offsets = [0, 5], sizes = [16, 16], strides = [1, 1]} : vector<16x22xf32> to vector<16x16xf32>
    %cst_159 = arith.constant 0.111280762 : f32
    %611 = vector.broadcast %cst_159 : f32 to vector<16x16xf32>
    %612 = arith.mulf %610, %611 : vector<16x16xf32>
    %613 = arith.addf %609, %612 : vector<16x16xf32>
    %614 = vector.extract_strided_slice %590 {offsets = [0, 6], sizes = [16, 16], strides = [1, 1]} : vector<16x22xf32> to vector<16x16xf32>
    %cst_160 = arith.constant 0.036632847 : f32
    %615 = vector.broadcast %cst_160 : f32 to vector<16x16xf32>
    %616 = arith.mulf %614, %615 : vector<16x16xf32>
    %617 = arith.addf %613, %616 : vector<16x16xf32>
    %618 = arith.subf %617, %477 : vector<16x16xf32>
    %619 = arith.mulf %169, %339 : vector<16x16xf32>
    %620 = vector.extract_strided_slice %619 {offsets = [3, 0], sizes = [1, 16], strides = [1, 1]} : vector<16x16xf32> to vector<1x16xf32>
    %621 = vector.extract_strided_slice %619 {offsets = [2, 0], sizes = [1, 16], strides = [1, 1]} : vector<16x16xf32> to vector<1x16xf32>
    %622 = vector.extract_strided_slice %619 {offsets = [1, 0], sizes = [1, 16], strides = [1, 1]} : vector<16x16xf32> to vector<1x16xf32>
    %623 = vector.extract_strided_slice %619 {offsets = [14, 0], sizes = [1, 16], strides = [1, 1]} : vector<16x16xf32> to vector<1x16xf32>
    %624 = vector.extract_strided_slice %619 {offsets = [13, 0], sizes = [1, 16], strides = [1, 1]} : vector<16x16xf32> to vector<1x16xf32>
    %625 = vector.extract_strided_slice %619 {offsets = [12, 0], sizes = [1, 16], strides = [1, 1]} : vector<16x16xf32> to vector<1x16xf32>
    %626 = tpu.concatenate %620, %621, %622, %619, %623, %624, %625 in 0 : vector<1x16xf32>, vector<1x16xf32>, vector<1x16xf32>, vector<16x16xf32>, vector<1x16xf32>, vector<1x16xf32>, vector<1x16xf32> -> vector<22x16xf32>
    %627 = vector.extract_strided_slice %626 {offsets = [0, 0], sizes = [16, 16], strides = [1, 1]} : vector<22x16xf32> to vector<16x16xf32>
    %cst_161 = arith.constant 0.036632847 : f32
    %628 = vector.broadcast %cst_161 : f32 to vector<16x16xf32>
    %629 = arith.mulf %627, %628 : vector<16x16xf32>
    %630 = vector.extract_strided_slice %626 {offsets = [1, 0], sizes = [16, 16], strides = [1, 1]} : vector<22x16xf32> to vector<16x16xf32>
    %cst_162 = arith.constant 0.111280762 : f32
    %631 = vector.broadcast %cst_162 : f32 to vector<16x16xf32>
    %632 = arith.mulf %630, %631 : vector<16x16xf32>
    %633 = arith.addf %629, %632 : vector<16x16xf32>
    %634 = vector.extract_strided_slice %626 {offsets = [2, 0], sizes = [16, 16], strides = [1, 1]} : vector<22x16xf32> to vector<16x16xf32>
    %cst_163 = arith.constant 0.216745317 : f32
    %635 = vector.broadcast %cst_163 : f32 to vector<16x16xf32>
    %636 = arith.mulf %634, %635 : vector<16x16xf32>
    %637 = arith.addf %633, %636 : vector<16x16xf32>
    %638 = vector.extract_strided_slice %626 {offsets = [3, 0], sizes = [16, 16], strides = [1, 1]} : vector<22x16xf32> to vector<16x16xf32>
    %cst_164 = arith.constant 0.270682156 : f32
    %639 = vector.broadcast %cst_164 : f32 to vector<16x16xf32>
    %640 = arith.mulf %638, %639 : vector<16x16xf32>
    %641 = arith.addf %637, %640 : vector<16x16xf32>
    %642 = vector.extract_strided_slice %626 {offsets = [4, 0], sizes = [16, 16], strides = [1, 1]} : vector<22x16xf32> to vector<16x16xf32>
    %cst_165 = arith.constant 0.216745317 : f32
    %643 = vector.broadcast %cst_165 : f32 to vector<16x16xf32>
    %644 = arith.mulf %642, %643 : vector<16x16xf32>
    %645 = arith.addf %641, %644 : vector<16x16xf32>
    %646 = vector.extract_strided_slice %626 {offsets = [5, 0], sizes = [16, 16], strides = [1, 1]} : vector<22x16xf32> to vector<16x16xf32>
    %cst_166 = arith.constant 0.111280762 : f32
    %647 = vector.broadcast %cst_166 : f32 to vector<16x16xf32>
    %648 = arith.mulf %646, %647 : vector<16x16xf32>
    %649 = arith.addf %645, %648 : vector<16x16xf32>
    %650 = vector.extract_strided_slice %626 {offsets = [6, 0], sizes = [16, 16], strides = [1, 1]} : vector<22x16xf32> to vector<16x16xf32>
    %cst_167 = arith.constant 0.036632847 : f32
    %651 = vector.broadcast %cst_167 : f32 to vector<16x16xf32>
    %652 = arith.mulf %650, %651 : vector<16x16xf32>
    %653 = arith.addf %649, %652 : vector<16x16xf32>
    %654 = vector.extract_strided_slice %653 {offsets = [0, 3], sizes = [16, 1], strides = [1, 1]} : vector<16x16xf32> to vector<16x1xf32>
    %655 = vector.extract_strided_slice %653 {offsets = [0, 2], sizes = [16, 1], strides = [1, 1]} : vector<16x16xf32> to vector<16x1xf32>
    %656 = vector.extract_strided_slice %653 {offsets = [0, 1], sizes = [16, 1], strides = [1, 1]} : vector<16x16xf32> to vector<16x1xf32>
    %657 = vector.extract_strided_slice %653 {offsets = [0, 14], sizes = [16, 1], strides = [1, 1]} : vector<16x16xf32> to vector<16x1xf32>
    %658 = vector.extract_strided_slice %653 {offsets = [0, 13], sizes = [16, 1], strides = [1, 1]} : vector<16x16xf32> to vector<16x1xf32>
    %659 = vector.extract_strided_slice %653 {offsets = [0, 12], sizes = [16, 1], strides = [1, 1]} : vector<16x16xf32> to vector<16x1xf32>
    %660 = tpu.concatenate %654, %655, %656, %653, %657, %658, %659 in 1 : vector<16x1xf32>, vector<16x1xf32>, vector<16x1xf32>, vector<16x16xf32>, vector<16x1xf32>, vector<16x1xf32>, vector<16x1xf32> -> vector<16x22xf32>
    %661 = vector.extract_strided_slice %660 {offsets = [0, 0], sizes = [16, 16], strides = [1, 1]} : vector<16x22xf32> to vector<16x16xf32>
    %cst_168 = arith.constant 0.036632847 : f32
    %662 = vector.broadcast %cst_168 : f32 to vector<16x16xf32>
    %663 = arith.mulf %661, %662 : vector<16x16xf32>
    %664 = vector.extract_strided_slice %660 {offsets = [0, 1], sizes = [16, 16], strides = [1, 1]} : vector<16x22xf32> to vector<16x16xf32>
    %cst_169 = arith.constant 0.111280762 : f32
    %665 = vector.broadcast %cst_169 : f32 to vector<16x16xf32>
    %666 = arith.mulf %664, %665 : vector<16x16xf32>
    %667 = arith.addf %663, %666 : vector<16x16xf32>
    %668 = vector.extract_strided_slice %660 {offsets = [0, 2], sizes = [16, 16], strides = [1, 1]} : vector<16x22xf32> to vector<16x16xf32>
    %cst_170 = arith.constant 0.216745317 : f32
    %669 = vector.broadcast %cst_170 : f32 to vector<16x16xf32>
    %670 = arith.mulf %668, %669 : vector<16x16xf32>
    %671 = arith.addf %667, %670 : vector<16x16xf32>
    %672 = vector.extract_strided_slice %660 {offsets = [0, 3], sizes = [16, 16], strides = [1, 1]} : vector<16x22xf32> to vector<16x16xf32>
    %cst_171 = arith.constant 0.270682156 : f32
    %673 = vector.broadcast %cst_171 : f32 to vector<16x16xf32>
    %674 = arith.mulf %672, %673 : vector<16x16xf32>
    %675 = arith.addf %671, %674 : vector<16x16xf32>
    %676 = vector.extract_strided_slice %660 {offsets = [0, 4], sizes = [16, 16], strides = [1, 1]} : vector<16x22xf32> to vector<16x16xf32>
    %cst_172 = arith.constant 0.216745317 : f32
    %677 = vector.broadcast %cst_172 : f32 to vector<16x16xf32>
    %678 = arith.mulf %676, %677 : vector<16x16xf32>
    %679 = arith.addf %675, %678 : vector<16x16xf32>
    %680 = vector.extract_strided_slice %660 {offsets = [0, 5], sizes = [16, 16], strides = [1, 1]} : vector<16x22xf32> to vector<16x16xf32>
    %cst_173 = arith.constant 0.111280762 : f32
    %681 = vector.broadcast %cst_173 : f32 to vector<16x16xf32>
    %682 = arith.mulf %680, %681 : vector<16x16xf32>
    %683 = arith.addf %679, %682 : vector<16x16xf32>
    %684 = vector.extract_strided_slice %660 {offsets = [0, 6], sizes = [16, 16], strides = [1, 1]} : vector<16x22xf32> to vector<16x16xf32>
    %cst_174 = arith.constant 0.036632847 : f32
    %685 = vector.broadcast %cst_174 : f32 to vector<16x16xf32>
    %686 = arith.mulf %684, %685 : vector<16x16xf32>
    %687 = arith.addf %683, %686 : vector<16x16xf32>
    %688 = arith.subf %687, %478 : vector<16x16xf32>
    %cst_175 = arith.constant 2.000000e+00 : f32
    %689 = vector.broadcast %cst_175 : f32 to vector<16x16xf32>
    %690 = arith.mulf %689, %478 : vector<16x16xf32>
    %cst_176 = arith.constant 9.99999974E-5 : f32
    %691 = vector.broadcast %cst_176 : f32 to vector<16x16xf32>
    %692 = arith.addf %690, %691 : vector<16x16xf32>
    %cst_177 = arith.constant 2.000000e+00 : f32
    %693 = vector.broadcast %cst_177 : f32 to vector<16x16xf32>
    %694 = arith.mulf %693, %688 : vector<16x16xf32>
    %cst_178 = arith.constant 8.99999984E-4 : f32
    %695 = vector.broadcast %cst_178 : f32 to vector<16x16xf32>
    %696 = arith.addf %694, %695 : vector<16x16xf32>
    %697 = arith.mulf %692, %696 : vector<16x16xf32>
    %698 = arith.addf %476, %477 : vector<16x16xf32>
    %cst_179 = arith.constant 9.99999974E-5 : f32
    %699 = vector.broadcast %cst_179 : f32 to vector<16x16xf32>
    %700 = arith.addf %698, %699 : vector<16x16xf32>
    %701 = arith.addf %548, %618 : vector<16x16xf32>
    %cst_180 = arith.constant 8.99999984E-4 : f32
    %702 = vector.broadcast %cst_180 : f32 to vector<16x16xf32>
    %703 = arith.addf %701, %702 : vector<16x16xf32>
    %704 = arith.mulf %700, %703 : vector<16x16xf32>
    %705 = arith.divf %697, %704 : vector<16x16xf32>
    %cst_181 = arith.constant 1.000000e+00 : f32
    %706 = vector.broadcast %cst_181 : f32 to vector<16x16xf32>
    %707 = arith.subf %706, %705 : vector<16x16xf32>
    %cst_182 = arith.constant 5.000000e-01 : f32
    %708 = vector.broadcast %cst_182 : f32 to vector<16x16xf32>
    %709 = arith.mulf %707, %708 : vector<16x16xf32>
    %cst_183 = arith.constant 0.000000e+00 : f32
    %cst_184 = arith.constant 1.000000e+00 : f32
    %710 = vector.broadcast %cst_183 : f32 to vector<16x16xf32>
    %711 = arith.maximumf %710, %709 : vector<16x16xf32>
    %712 = vector.broadcast %cst_184 : f32 to vector<16x16xf32>
    %713 = arith.minimumf %712, %711 : vector<16x16xf32>
    %714 = vector.shape_cast %713 : vector<16x16xf32> to vector<1x16x16xf32>
    %cst_185 = arith.constant dense<0.000000e+00> : vector<1xf32>
    %715 = vector.multi_reduction <add>, %714, %cst_185 [1, 2] : vector<1x16x16xf32> to vector<1xf32>
    %716 = vector.shape_cast %715 : vector<1xf32> to vector<1x1x1xf32>
    %717 = vector.extract %716[0, 0, 0] : f32 from vector<1x1x1xf32>
    %718 = vector.broadcast %717 : f32 to vector<1x1xf32>
    %719 = vector.shape_cast %718 : vector<1x1xf32> to vector<1x1x1xf32>
    %c0_186 = arith.constant 0 : index
    %c0_187 = arith.constant 0 : index
    %c0_188 = arith.constant 0 : index
    %720 = vector.load %arg3[%c0_186, %c0_187, %c0_188] : memref<1x1x1xf32, #tpu.memory_space<vmem>>, vector<1x1x1xf32>
    tpu.vector_store %arg3[%c0_186, %c0_187, %c0_188], %719 {strides = array<i32>} : memref<1x1x1xf32, #tpu.memory_space<vmem>>, vector<1x1x1xf32>,
    return
  }
  func.func @transform_0(%arg0: i32) -> (i32, i32, i32, i32) {
    %c0_i32 = arith.constant 0 : i32
    %c0_i32_0 = arith.constant 0 : i32
    %c0_i32_1 = arith.constant 0 : i32
    %c0_i32_2 = arith.constant 0 : i32
    return %arg0, %c0_i32, %c0_i32_0, %c0_i32_1 : i32, i32, i32, i32
  }
  func.func @transform_1(%arg0: i32) -> (i32, i32, i32, i32) {
    %c0_i32 = arith.constant 0 : i32
    %c0_i32_0 = arith.constant 0 : i32
    %c0_i32_1 = arith.constant 0 : i32
    %c0_i32_2 = arith.constant 0 : i32
    return %arg0, %c0_i32, %c0_i32_0, %c0_i32_1 : i32, i32, i32, i32
  }
  func.func @transform_2(%arg0: i32) -> (i32, i32, i32) {
    %c0_i32 = arith.constant 0 : i32
    %c0_i32_0 = arith.constant 0 : i32
    %c0_i32_1 = arith.constant 0 : i32
    return %arg0, %c0_i32, %c0_i32_0 : i32, i32, i32
  }
}

</mosaic_0001>

<bundles_post_ra>
// kernel: seam_loss.1
= control target key start
LH: loop header
LB: loop body
LE: loop exit
PB: predicated region body
PF: predicated region fallthrough
CT: control target
= control target key end

     0   :  { %7 = vsyncpa [#allocation4], 0  ;;  %s5057_s0 = inlined_call_operand.hbm [shape: f32[2,3,16,16], index: 0, kind: input, shape index: {}]   ;;  %s5058_s1 = inlined_call_operand.hbm [shape: f32[2,3,16,16], index: 1, kind: input, shape index: {}]   ;;  %s5059_s2 = inlined_call_operand.vmem [shape: f32[2,1,1], index: 2, kind: output, shape index: {}]  }
   0x1   :  { %9 = vsyncpa [#allocation4 + $0x1], 0 }
   0x2   :  { %10 = vsyncpa [#allocation6], 0 }
   0x3   :  { %12 = vsyncpa [#allocation6 + $0x1], 0  ;;  %s3492_s9 = smov 0   ;;  %s3494_s10 = smov 0  }
   0x4   :  { %s3496_s11 = smov 0   ;;  %s3498_s12 = smov 0  }
   0x5 LB: > { %s3511_s13 = sadd.s32 4294967295, %s3441_s12   ;;  %s3514_s14 = sadd.s32 1, %s3441_s12   ;;  %s3441_s12 = sphi %s3498_s12, %s5330_s12   ;;  %s3437_s11 = sphi %s3496_s11, %s5329_s11   ;;  %s3433_s10 = sphi %s3494_s10, %s5328_s10   ;;  %s3429_s9 = sphi %s3492_s9, %s5327_s9  }
   0x6   : > { %s22_s15 = ssub.s32 %s3441_s12, %s3514_s14  ;;  %s25_s16 = sadd.s32 1, %s3437_s11 }
   0x7   : > { %p23_p0 = scmp.eq.s32.totalorder %s22_s15, 0  ;;  %p32_p1 = scmp.ne.s32.totalorder %s3437_s11, %s3433_s10 }
   0x8   : > { %p33_p2 = scmp.eq.s32.totalorder %s3441_s12, 0  ;;  %p38_p3 = scmp.ne.s32.totalorder %s3433_s10, %s3429_s9 }
   0x9   : > { %s3524_s17 = scalar_select %p23_p0, %s3437_s11, %s25_s16  }
   0xa   : > { %p34_p4 = por %p33_p2, %p32_p1  ;;  %p39_p5 = scmp.eq.s32.totalorder %s3511_s13, 0 }
   0xb   : > { %p3224_p6 = scmp.lt.s32.totalorder %s3441_s12, 2  ;;  %s3533_s19 = sand.u32 1, %s3437_s11  }
   0xc   : > { %p3528_p7 = por %p39_p5, %p38_p3  ;;  %s3202_s20 = smul.u32 48, %s3533_s19 }
   0xd   : > { %s3203_s21 = smul.u32 768, %s3441_s12  ;;  %p3537_p8 = pnand %p3224_p6, %p34_p4 }
   0xe   : > { %s5084_s18 = scalar_select %p3528_p7, 1, 0 }
   0xf   : > { %s3546_s25 = scalar_lea.hbm %s5057_s0, %s3203_s21  ;;  %s118_s26 = scalar_lea.vmem [#allocation3], %s3202_s20 }
  0x10   : > { %s125_s27 = sshll.u32 %s118_s26, 4  ;;  %s115_s28 = scalar_lea.sflag [#allocation4], %s3533_s19  ;;  %s3550_s27 = int_to_ptr.vmem [resolvable:$true] %s125_s27 }
  0x11   : > { %s3339_s29 = scalar_lea.hbm %s3546_s25, 768  ;;  %p3341_p11 = pneg %p3537_p8 }
  0x12   : > { %p3340_p10 = scmp.ne.s32.totalorder %s3546_s25, %s3339_s29  ;;  %s3344_s4 = scalar_lea.hbm %s5057_s0, 1536 }
  0x13   : > { %p3345_p0 = scmp.lt.s32.totalorder %s3546_s25, %s5057_s0  ;;  %p3346_p1 = scmp.lt.s32.totalorder %s3344_s4, %s3339_s29 }
  0x14   : > { %p3342_p12 = pnand %p3341_p11, %p3340_p10 }
  0x15   : > { %p3347_p2 = por %p3346_p1, %p3345_p0 }
  0x16   : > { %p3343_p13 = pneg %p3342_p12 }
  0x18   : > { %p3348_p3 = pnand %p3347_p2, %p3343_p13 }
  0x1a   : > { %3351 = shalt.err (!%p3348_p3)
}
  0x1b   : > { %s3352_s7 = scalar_lea.vmem %s3550_s27, 768  ;;  %s3451_s8 = smov [#allocation3]  }
  0x1c   : > { %p3353_p4 = scmp.ne.s32.totalorder %s3550_s27, %s3352_s7  ;;  %s3357_s9 = sshll.u32 %s3451_s8, 4  ;;  %s3358_s9 = int_to_ptr.vmem [resolvable:$false] %s3357_s9 }
  0x1d   : > { %s3359_s15 = scalar_lea.vmem %s3358_s9, 1536  ;;  %p3360_p10 = scmp.lt.s32.totalorder %s3550_s27, %s3358_s9 }
  0x1e   : > { %p3355_p5 = pnand %p3353_p4, %p3341_p11  ;;  %p3361_p12 = scmp.lt.s32.totalorder %s3359_s15, %s3352_s7 }
  0x20   : > { %p3356_p6 = pneg %p3355_p5  ;;  %p3362_p9 = por %p3361_p12, %p3360_p10 }
  0x22   : > { %p3363_p0 = pnand %p3362_p9, %p3356_p6 }
  0x24   : > { %3366 = shalt.err (!%p3363_p0)
}
  0x25   : > { %s3452_s16 = smov 128   ;;  %s3453_s23 = smov 8  }
  0x26   : > { %3220 = dma.hbm_to_vmem [thread:$0]  (!%p3537_p8), %s3546_s25, 768, %s3550_s27, %s115_s28, %s3452_s16, %s3452_s16, %s3453_s23  }
  0x27   : > { %p154_p9 = scmp.lt.s32.totalorder %s3441_s12, 3  ;;  %s3589_s29 = scalar_lea.hbm %s5058_s1, %s3203_s21 }
  0x28   : > { %p5086_p13 = scmp.ge.s32.totalorder %s3441_s12, 1  ;;  %s139_s3 = scalar_lea.vmem [#allocation5], %s3202_s20 }
  0x29   : > { %s146_s4 = sshll.u32 %s139_s3, 4  ;;  %s136_s25 = scalar_lea.sflag [#allocation6], %s3533_s19  ;;  %s3599_s4 = int_to_ptr.vmem [resolvable:$true] %s146_s4 }
  0x2a   : > { %p3593_p1 = pnand %p5086_p13, %p154_p9  ;;  %s3367_s27 = scalar_lea.hbm %s3589_s29, 768 }
  0x2b   : > { %p3368_p2 = scmp.ne.s32.totalorder %s3589_s29, %s3367_s27  ;;  %s3372_s28 = scalar_lea.hbm %s5058_s1, 1536 }
  0x2c   : > { %p3373_p5 = scmp.lt.s32.totalorder %s3589_s29, %s5058_s1  ;;  %p3374_p6 = scmp.lt.s32.totalorder %s3372_s28, %s3367_s27 }
  0x2d   : > { %p3370_p3 = pnand %p3368_p2, %p3341_p11 }
  0x2e   : > { %p3375_p10 = por %p3374_p6, %p3373_p5 }
  0x2f   : > { %p3371_p4 = pneg %p3370_p3 }
  0x31   : > { %p3376_p12 = pnand %p3375_p10, %p3371_p4 }
  0x33   : > { %3379 = shalt.err (!%p3376_p12)
}
  0x34   : > { %s3380_s19 = scalar_lea.vmem %s3599_s4, 768  ;;  %s3454_s20 = smov [#allocation5]  }
  0x35   : > { %p3381_p0 = scmp.ne.s32.totalorder %s3599_s4, %s3380_s19  ;;  %s3385_s7 = sshll.u32 %s3454_s20, 4  ;;  %s3386_s7 = int_to_ptr.vmem [resolvable:$false] %s3385_s7 }
  0x36   : > { %s3387_s8 = scalar_lea.vmem %s3386_s7, 1536  ;;  %p3388_p2 = scmp.lt.s32.totalorder %s3599_s4, %s3386_s7 }
  0x37   : > { %p3383_p9 = pnand %p3381_p0, %p3341_p11  ;;  %p3389_p3 = scmp.lt.s32.totalorder %s3387_s8, %s3380_s19 }
  0x39   : > { %p3384_p13 = pneg %p3383_p9  ;;  %p3390_p7 = por %p3389_p3, %p3388_p2 }
  0x3b   : > { %p3391_p5 = pnand %p3390_p7, %p3384_p13 }
  0x3d   : > { %3394 = shalt.err (!%p3391_p5)
}
  0x3e   : > { %3223 = dma.hbm_to_vmem [thread:$0]  (!%p3537_p8), %s3589_s29, 768, %s3599_s4, %s136_s25, %s3452_s16, %s3452_s16, %s3453_s23  }
  0x3f   : > { %158 = sbr.rel (%p3593_p1) target bundleno = 5295 (0x14af), region = 28  ;;  %s160_s9 = sand.u32 (!%p3593_p1), 1, %s3433_s10  }
  0x40   : > { %s3206_s15 = smul.u32 (!%p3593_p1), 48, %s160_s9  ;;  %s161_s24 = scalar_lea.sflag (!%p3593_p1), [#allocation4], %s160_s9 }
  0x41   : > { %p5088_p11 = scmp.ne.s32.totalorder (!%p3593_p1), %s5084_s18, 0 }
  0x42   : > { %s164_s26 = scalar_lea.vmem (!%p3593_p1), [#allocation3], %s3206_s15 }
  0x44   : > { %3420 = dma.done.wait (%p5088_p11), %s161_s24, 768  }
  0x45   : > { %3422 = vsyncadd (%p5088_p11), %s161_s24, 4294966528  ;;  %s170_s22 = scalar_lea.sflag [#allocation6], %s160_s9  ;;  %s3634_s3 = scalar_lea.vmem [#allocation5], %s3206_s15 }
  0x46   : > { %3424 = dma.done.wait (%p5088_p11), %s170_s22, 768  }
  0x47   : > { %3426 = vsyncadd (%p5088_p11), %s170_s22, 4294966528  ;;  %v200_v0 = vld [vmem:[%s164_s26] sm:$0xff]  ;;  %v201_v1 = vld [vmem:[%s164_s26 + $0x8] sm:$0xff]  ;;  %vm5073_vm0 = vcmask 1040384   ;;  %vm5072_vm1 = vcmask 1041408   ;;  %vm5071_vm2 = vcmask 1042432  }
  0x48   : > { %v3188_v2 = vld [vmem:[%s164_s26 + $0x10] sm:$0xff]  ;;  %v3189_v3 = vld [vmem:[%s164_s26 + $0x18] sm:$0xff]  ;;  %v3190_v5 = vld [vmem:[%s164_s26 + $0x20] sm:$0xff]  ;;  %vm5070_vm3 = vcmask 1046528   ;;  %vm5065_vm4 = vcmask 1045504   ;;  %vm5064_vm5 = vcmask 1044480  }
  0x49   : > { %v205_v4 = vmax.f32 %v200_v0, %v3188_v2  ;;  %v3191_v6 = vld [vmem:[%s164_s26 + $0x28] sm:$0xff]  ;;  %v206_v7 = vmax.f32 %v201_v1, %v3189_v3  ;;  %vm5063_vm6 = vcmask 1043456   ;;  %s3455_s18 = smov 2   ;;  %s3456_s16 = smov 126   ;;  %vm5069_vm7 = vcmask 7168  }
  0x4a   : > { %s3457_s23 = smov 4   ;;  %s3458_s29 = smov 6   ;;  %vm5062_vm8 = vcmask 15360   ;;  %vm5068_vm9 = vcmask 146432   ;;  %vm5061_vm10 = vcmask 154624   ;;  %vm5067_vm11 = vcmask 138240  }
  0x4b   : > { %v210_v8 = vmax.f32 %v205_v4, %v3190_v5  ;;  %v211_v9 = vmax.f32 %v206_v7, %v3191_v6  ;;  %s3459_s30 = smov 127   ;;  %s3460_s4 = smov 125  }
  0x4c   : > { %s3461_s25 = smov 124   ;;  %s3462_s27 = smov 1  }
  0x4d   : > { %v213_v10 = vrot.slane %v210_v8, 2  ;;  %v217_v11 = vrot.slane %v210_v8, 6  ;;  %v218_v12 = vrot.slane %v211_v9, 6  ;;  %v223_v13 = vrot.slane %v211_v9, 4  ;;  %p197_p7 = scmp.lt.s32.totalorder %s3511_s13, 1  ;;  %s3964_s5 = smov 0  }
  0x4e   : > { %v225_v14 = vrot.slane %v211_v9, 2 }
  0x4f   : > { %v228_v15 = vsel %vm5073_vm0, %v213_v10, %v210_v8  ;;  %v219_v16 = vsel %vm5072_vm1, %v217_v11, %v218_v12  ;;  %v230_v18 = vsel %vm5072_vm1, %v218_v12, %v223_v13  ;;  %s5332_s13 = smov (!%p197_p7, %s3511_s13), 1 }
  0x50   : > { %v229_v17 = vsel %vm5072_vm1, %v228_v15, %v217_v11  ;;  %v234_v19 = vmul.f32 0.054488685, %v219_v16  ;;  %v236_v21 = vmul.f32 0.24420135, %v219_v16  ;;  %v252_v23 = vmul.f32 0.40261996, %v219_v16  ;;  %s199_s28 = scalar_lea.vmem %s5059_s2, %s5332_s13 }
  0x51   : > { %v235_v20 = vmul.f32 0.24420135, %v229_v17  ;;  %v251_v22 = vmul.f32 0.40261996, %v229_v17  ;;  %v232_v24 = vsel %vm5071_vm2, %v230_v18, %v225_v14  ;;  %v233_v25 = vmul.f32 0.054488685, %v229_v17 }
  0x52   : > { %v243_v28 = vrot.slane %v236_v21, 1  ;;  %v259_v30 = vrot.slane %v252_v23, 2  ;;  %v269_v31 = vrot.slane %v236_v21, 3  ;;  %v237_v32 = vmul.f32 0.24420135, %v232_v24 }
  0x53   : > { %v242_v26 = vrot.slane %v235_v20, 1  ;;  %v268_v27 = vrot.slane %v235_v20, 3  ;;  %v258_v29 = vrot.slane %v251_v22, 2  ;;  %v253_v33 = vmul.f32 0.40261996, %v232_v24 }
  0x54   : > { %v277_v34 = vmul.f32 0.054488685, %v232_v24  ;;  %v282_v37 = vrot.slane %v233_v25, 4  ;;  %v283_v38 = vrot.slane %v234_v19, 4  ;;  %v245_v40 = vrot.slane %v237_v32, 1 }
  0x55   : > { %v244_v35 = vsel %vm5070_vm3, %v242_v26, %v243_v28  ;;  %v260_v36 = vsel %vm5065_vm4, %v258_v29, %v259_v30  ;;  %v261_v41 = vrot.slane %v253_v33, 2  ;;  %v271_v42 = vrot.slane %v237_v32, 3 }
  0x56   : > { %v249_v39 = vadd.f32 %v244_v35, %v233_v25  ;;  %v270_v43 = vsel %vm5064_vm5, %v268_v27, %v269_v31  ;;  %v246_v45 = vsel %vm5070_vm3, %v243_v28, %v245_v40  ;;  %v285_v47 = vrot.slane %v277_v34, 4 }
  0x57   : > { %v262_v46 = vsel %vm5065_vm4, %v259_v30, %v261_v41  ;;  %v284_v48 = vsel %vm5063_vm6, %v282_v37, %v283_v38  ;;  %v250_v49 = vadd.f32 %v246_v45, %v234_v19  ;;  %v272_v51 = vsel %vm5064_vm5, %v269_v31, %v271_v42 }
  0x58   : > { %v265_v44 = vadd.f32 %v260_v36, %v249_v39  ;;  %v286_v54 = vsel %vm5063_vm6, %v283_v38, %v285_v47 }
  0x59   : > { %v266_v52 = vadd.f32 %v262_v46, %v250_v49 }
  0x5a   : > { %v275_v50 = vadd.f32 %v270_v43, %v265_v44 }
  0x5b   : > { %v276_v55 = vadd.f32 %v272_v51, %v266_v52 }
  0x5c   : > { %v289_v53 = vadd.f32 %v284_v48, %v275_v50 }
  0x5d   : > { %v290_v56 = vadd.f32 %v286_v54, %v276_v55 }
  0x5e   : > { %299 = vrot.lane.b32.xlu1 %v289_v53, %s3455_s18  ;;  %293 = vrot.lane.b32.xlu0 %v289_v53, %s3456_s16 }
  0x62   : > { %301 = vrot.lane.b32.xlu1 %v290_v56, %s3455_s18  ;;  %295 = vrot.lane.b32.xlu0 %v290_v56, %s3456_s16 }
  0x66   : > { %307 = vrot.lane.b32.xlu1 %v290_v56, %s3457_s23  ;;  %305 = vrot.lane.b32.xlu0 %v289_v53, %s3457_s23 }
  0x6a   : > { %313 = vrot.lane.b32.xlu1 %v290_v56, %s3458_s29  ;;  %311 = vrot.lane.b32.xlu0 %v289_v53, %s3458_s29 }
  0xd0   : > { %v300_v57 = vpop.permute.xlu1 %299  ;;  %v294_v58 = vpop.permute.xlu0 %293 }
  0xd1   : > { %v318_v61 = vsel %vm5069_vm7, %v294_v58, %v289_v53 }
  0xd2   : > { %v321_v2 = vsel %vm5062_vm8, %v318_v61, %v300_v57 }
  0xd4   : > { %v302_v59 = vpop.permute.xlu1 %301  ;;  %v296_v60 = vpop.permute.xlu0 %295 }
  0xd5   : > { %v319_v62 = vsel %vm5069_vm7, %v296_v60, %v290_v56 }
  0xd6   : > { %v322_v1 = vsel %vm5062_vm8, %v319_v62, %v302_v59 }
  0xd8   : > { %v308_v63 = vpop.permute.xlu1 %307  ;;  %v306_v0 = vpop.permute.xlu0 %305 }
  0xd9   : > { %v325_v3 = vsel %vm5068_vm9, %v322_v1, %v308_v63  ;;  %v324_v4 = vsel %vm5068_vm9, %v321_v2, %v306_v0 }
  0xdc   : > { %v314_v5 = vpop.permute.xlu1 %313  ;;  %v312_v6 = vpop.permute.xlu0 %311 }
  0xdd   : > { %v328_v7 = vsel %vm5061_vm10, %v325_v3, %v314_v5  ;;  %v327_v8 = vsel %vm5061_vm10, %v324_v4, %v312_v6 }
  0xde   : > { %v332_v9 = vmul.f32 0.24420135, %v328_v7  ;;  %v331_v10 = vmul.f32 0.24420135, %v327_v8  ;;  %v344_v11 = vmul.f32 0.40261996, %v328_v7 }
  0xdf   : > { %v343_v12 = vmul.f32 0.40261996, %v327_v8  ;;  %v330_v13 = vmul.f32 0.054488685, %v328_v7  ;;  %v329_v14 = vmul.f32 0.054488685, %v327_v8 }
  0xe0   : > { %337 = vrot.lane.b32.xlu1 %v332_v9, %s3459_s30  ;;  %335 = vrot.lane.b32.xlu0 %v331_v10, %s3459_s30 }
  0xe4   : > { %349 = vrot.lane.b32.xlu1 %v344_v11, %s3456_s16  ;;  %347 = vrot.lane.b32.xlu0 %v343_v12, %s3456_s16 }
  0xe8   : > { %357 = vrot.lane.b32.xlu1 %v332_v9, %s3460_s4  ;;  %355 = vrot.lane.b32.xlu0 %v331_v10, %s3460_s4 }
  0xec   : > { %367 = vrot.lane.b32.xlu1 %v330_v13, %s3461_s25  ;;  %365 = vrot.lane.b32.xlu0 %v329_v14, %s3461_s25 }
 0x152   : > { %v338_v15 = vpop.permute.xlu1 %337  ;;  %v336_v16 = vpop.permute.xlu0 %335 }
 0x153   : > { %v342_v19 = vadd.f32 %v338_v15, %v330_v13  ;;  %v341_v20 = vadd.f32 %v336_v16, %v329_v14 }
 0x156   : > { %v350_v17 = vpop.permute.xlu1 %349  ;;  %v348_v18 = vpop.permute.xlu0 %347 }
 0x157   : > { %v354_v23 = vadd.f32 %v350_v17, %v342_v19  ;;  %v353_v24 = vadd.f32 %v348_v18, %v341_v20 }
 0x15a   : > { %v358_v21 = vpop.permute.xlu1 %357  ;;  %v356_v22 = vpop.permute.xlu0 %355 }
 0x15b   : > { %v362_v25 = vadd.f32 %v358_v21, %v354_v23  ;;  %v361_v26 = vadd.f32 %v356_v22, %v353_v24 }
 0x15e   : > { %v368_v27 = vpop.permute.xlu1 %367  ;;  %v366_v28 = vpop.permute.xlu0 %365 }
 0x15f   : > { %v372_v29 = vadd.f32 %v368_v27, %v362_v25  ;;  %v371_v30 = vadd.f32 %v366_v28, %v361_v26 }
 0x161   : > { %v376_v31 = vrot.slane %v372_v29, 7  ;;  %v381_v32 = vrot.slane %v372_v29, 6  ;;  %v375_v33 = vrot.slane %v371_v30, 7 }
 0x163   : > { %v377_v34 = vsel %vm5073_vm0, %v375_v33, %v376_v31  ;;  %v383_v35 = vsel %vm5073_vm0, %v371_v30, %v375_v33  ;;  %v384_v36 = vsel %vm5073_vm0, %v376_v31, %v381_v32 }
 0x164   : > { %v385_v37 = vmul.f32 2.0, %v383_v35  ;;  %v411_v38 = vrot.slane %v383_v35, 6  ;;  %v387_v39 = vmul.f32 2.0, %v384_v36  ;;  %v412_v40 = vrot.slane %v377_v34, 6 }
 0x165   : > { %v386_v41 = vmul.f32 2.0, %v377_v34  ;;  %v405_v51 = vrot.slane %v384_v36, 2  ;;  %v403_v52 = vrot.slane %v377_v34, 2  ;;  %v402_v53 = vrot.slane %v383_v35, 2 }
 0x166   : > { %v417_v42 = vsub.f32 %v383_v35, %v411_v38  ;;  %v394_v43 = vrot.slane %v387_v39, 1  ;;  %v413_v44 = vsel %vm5072_vm1, %v411_v38, %v412_v40  ;;  %v391_v46 = vrot.slane %v385_v37, 1 }
 0x167   : > { %v392_v45 = vrot.slane %v386_v41, 1  ;;  %v419_v47 = vsub.f32 %v384_v36, %v412_v40  ;;  %v418_v48 = vsub.f32 %v377_v34, %v413_v44  ;;  %v406_v56 = vsel %vm5065_vm4, %v403_v52, %v405_v51 }
 0x168   : > { %451 = vrot.lane.b32.xlu1 %v417_v42, %s3455_s18  ;;  %442 = vrot.lane.b32.xlu0 %v417_v42, %s3462_s27  ;;  %v404_v57 = vsel %vm5065_vm4, %v402_v53, %v403_v52 }
 0x169   : > { %v395_v49 = vsel %vm5070_vm3, %v392_v45, %v394_v43  ;;  %v393_v50 = vsel %vm5070_vm3, %v391_v46, %v392_v45 }
 0x16a   : > { %v399_v54 = vadd.f32 %v395_v49, %v377_v34  ;;  %v398_v55 = vadd.f32 %v393_v50, %v383_v35 }
 0x16c   : > { %446 = vrot.lane.b32.xlu0 %v419_v47, %s3462_s27  ;;  %444 = vrot.lane.b32.xlu1 %v418_v48, %s3462_s27  ;;  %v410_v58 = vadd.f32 %v406_v56, %v399_v54  ;;  %v409_v59 = vadd.f32 %v404_v57, %v398_v55 }
 0x170   : > { %453 = vrot.lane.b32.xlu0 %v418_v48, %s3455_s18  ;;  %455 = vrot.lane.b32.xlu1 %v419_v47, %s3455_s18 }
 0x174   : > { %424 = vrot.lane.b32.xlu1 %v410_v58, %s3462_s27  ;;  %422 = vrot.lane.b32.xlu0 %v409_v59, %s3462_s27 }
 0x1da   : > { %v452_v60 = vpop.permute.xlu1 %451  ;;  %v443_v61 = vpop.permute.xlu0 %442 }
 0x1db   : > { %v460_v62 = vsel %vm5069_vm7, %v417_v42, %v443_v61 }
 0x1dc   : > { %v463_v63 = vsel %vm5067_vm11, %v460_v62, %v452_v60 }
 0x1dd   : > { %497 = vrot.lane.b32.xlu1 %v463_v63, %s3456_s16  ;;  %v476_v9 = vmul.f32 2.0, %v463_v63 }
 0x1de   : > { %v447_v0 = vpop.permute.xlu0 %446  ;;  %v445_v1 = vpop.permute.xlu1 %444 }
 0x1df   : > { %v462_v2 = vsel %vm5069_vm7, %v419_v47, %v447_v0  ;;  %v461_v3 = vsel %vm5069_vm7, %v418_v48, %v445_v1 }
 0x1e2   : > { %v454_v4 = vpop.permute.xlu0 %453  ;;  %v456_v5 = vpop.permute.xlu1 %455 }
 0x1e3   : > { %v465_v6 = vsel %vm5067_vm11, %v462_v2, %v456_v5  ;;  %v464_v7 = vsel %vm5067_vm11, %v461_v3, %v454_v4 }
 0x1e4   : > { %501 = vrot.lane.b32.xlu1 %v465_v6, %s3456_s16  ;;  %499 = vrot.lane.b32.xlu0 %v464_v7, %s3456_s16  ;;  %v477_v8 = vmul.f32 2.0, %v464_v7  ;;  %v478_v10 = vmul.f32 2.0, %v465_v6 }
 0x1e6   : > { %v425_v11 = vpop.permute.xlu1 %424  ;;  %v423_v12 = vpop.permute.xlu0 %422 }
 0x1e7   : > { %v435_v22 = vsel %vm5069_vm7, %v410_v58, %v425_v11  ;;  %v434_v30 = vsel %vm5069_vm7, %v409_v59, %v423_v12 }
 0x1e8   : > { %484 = vrot.lane.b32.xlu1 %v477_v8, %s3459_s30  ;;  %482 = vrot.lane.b32.xlu0 %v476_v9, %s3459_s30 }
 0x1ec   : > { %430 = vrot.lane.b32.xlu1 %v410_v58, %s3455_s18  ;;  %486 = vrot.lane.b32.xlu0 %v478_v10, %s3459_s30 }
 0x1f0   : > { %428 = vrot.lane.b32.xlu0 %v409_v59, %s3455_s18 }
 0x24f   : > { %v498_v13 = vpop.permute.xlu1 %497 }
 0x256   : > { %v502_v14 = vpop.permute.xlu1 %501  ;;  %v500_v15 = vpop.permute.xlu0 %499 }
 0x25a   : > { %v485_v16 = vpop.permute.xlu1 %484  ;;  %v483_v17 = vpop.permute.xlu0 %482 }
 0x25b   : > { %v492_v18 = vadd.f32 %v485_v16, %v464_v7  ;;  %v491_v19 = vadd.f32 %v483_v17, %v463_v63 }
 0x25d   : > { %v3707_v20 = vadd.f32 %v500_v15, %v492_v18  ;;  %v3709_v21 = vadd.f32 %v498_v13, %v491_v19 }
 0x25e   : > { %v431_v23 = vpop.permute.xlu1 %430  ;;  %v487_v24 = vpop.permute.xlu0 %486 }
 0x25f   : > { %v493_v25 = vadd.f32 %v487_v24, %v465_v6  ;;  %v438_v26 = vsel %vm5067_vm11, %v435_v22, %v431_v23  ;;  %v512_v27 = vmul.f32 %v3707_v20, %v3707_v20  ;;  %v511_v28 = vmul.f32 %v3709_v21, %v3709_v21 }
 0x260   : > { %470 = vrot.lane.b32.xlu1 %v438_v26, %s3455_s18  ;;  %v581_v16 = vand.u32 2147483647, %v3707_v20  ;;  %v580_v18 = vand.u32 2147483647, %v3709_v21  ;;  %vm707_vm10 = vcmp.ge.f32.partialorder %v3707_v20, 0.0 }
 0x261   : > { %v3718_v29 = vadd.f32 %v502_v14, %v493_v25  ;;  %v518_v34 = vrot.slane %v512_v27, 2  ;;  %v517_v35 = vrot.slane %v511_v28, 2 }
 0x262   : > { %v429_v31 = vpop.permute.xlu0 %428  ;;  %v603_v22 = vmul.f32 0.41421357, %v581_v16  ;;  %v602_v24 = vmul.f32 0.41421357, %v580_v18 }
 0x263   : > { %v437_v32 = vsel %vm5067_vm11, %v434_v30, %v429_v31  ;;  %v513_v33 = vmul.f32 %v3718_v29, %v3718_v29  ;;  %v519_v38 = vsel %vm5065_vm4, %v517_v35, %v518_v34  ;;  %v582_v17 = vand.u32 2147483647, %v3718_v29 }
 0x264   : > { %468 = vrot.lane.b32.xlu0 %v437_v32, %s3455_s18  ;;  %v609_v25 = vrot.slane %v603_v22, 2  ;;  %v608_v27 = vrot.slane %v602_v24, 2 }
 0x265   : > { %v520_v36 = vrot.slane %v513_v33, 2  ;;  %v604_v23 = vmul.f32 0.41421357, %v582_v17 }
 0x267   : > { %v521_v37 = vsel %vm5065_vm4, %v518_v34, %v520_v36 }
 0x268   : > { %524 = vrot.lane.b32.xlu1 %v521_v37, %s3455_s18  ;;  %522 = vrot.lane.b32.xlu0 %v519_v38, %s3455_s18 }
 0x2d2   : > { %v471_v39 = vpop.permute.xlu1 %470 }
 0x2d3   : > { %v3729_v40 = vsub.f32 %v438_v26, %v471_v39  ;;  %v611_v26 = vrot.slane %v604_v23, 2 }
 0x2d5   : > { %v510_v43 = vmul.f32 %v3729_v40, %v3729_v40  ;;  %v612_v31 = vsel %vm5065_vm4, %v609_v25, %v611_v26 }
 0x2d6   : > { %v469_v41 = vpop.permute.xlu0 %468 }
 0x2d7   : > { %v3731_v42 = vsub.f32 %v437_v32, %v469_v41  ;;  %v610_v32 = vsel %vm5065_vm4, %v608_v27, %v609_v25 }
 0x2d9   : > { %v509_v44 = vmul.f32 %v3731_v42, %v3731_v42 }
 0x2da   : > { %v525_v45 = vpop.permute.xlu1 %524  ;;  %v523_v46 = vpop.permute.xlu0 %522 }
 0x2db   : > { %v529_v47 = vadd.f32 %v525_v45, %v510_v43  ;;  %v528_v48 = vadd.f32 %v523_v46, %v509_v44 }
 0x2dd   : > { %v531_v49 = vadd.f32 1e-06, %v529_v47  ;;  %v530_v50 = vadd.f32 1e-06, %v528_v48 }
 0x2df   : > { %3307 = vrsqrt.f32 %v531_v49  ;;  %vm541_vm12 = vcmp.eq.f32.partialorder %v531_v49, inf  ;;  %v544_v55 = vand.u32 2147483648, %v531_v49  ;;  %vm534_vm13 = vcmp.eq.f32.partialorder %v530_v50, inf }
 0x2e0   : > { %3309 = vrsqrt.f32 %v530_v50  ;;  %v537_v56 = vand.u32 2147483648, %v530_v50  ;;  %vm543_vm14 = vcmp.eq.f32.partialorder %v531_v49, 0.0  ;;  %vm536_vm15 = vcmp.eq.f32.partialorder %v530_v50, 0.0 }
 0x2ec   : > { %v3308_v51 = vpop.eup %3307 }
 0x2ed   : > { %v3310_v52 = vpop.eup %3309  ;;  %v540_v53 = vmul.f32 %v3308_v51, %v531_v49 }
 0x2ee   : > { %v533_v54 = vmul.f32 %v3310_v52, %v530_v50 }
 0x2ef   : > { %v542_v57 = vsel %vm541_vm12, %v531_v49, %v540_v53  ;;  %vm623_vm12 = vcmp.gt.f32.partialorder %v3709_v21, 0.0 }
 0x2f0   : > { %v535_v58 = vsel %vm534_vm13, %v530_v50, %v533_v54  ;;  %v3737_v59 = vsel %vm543_vm14, %v544_v55, %v542_v57  ;;  %vm624_vm13 = vcmp.gt.f32.partialorder %v3707_v20, 0.0  ;;  %vm625_vm14 = vcmp.gt.f32.partialorder %v3718_v29, 0.0 }
 0x2f1   : > { %v3739_v60 = vsel %vm536_vm15, %v537_v56, %v535_v58  ;;  %v549_v61 = vrot.slane %v3737_v59, 7  ;;  %vm706_vm15 = vcmp.ge.f32.partialorder %v3709_v21, 0.0 }
 0x2f2   : > { %v548_v62 = vrot.slane %v3739_v60, 7 }
 0x2f4   : > { %551 = vrot.lane.b32.xlu0 %v548_v62, %s3456_s16  ;;  %v550_v63 = vsel %vm5073_vm0, %v548_v62, %v549_v61 }
 0x2f5   : > { %553 = vrot.lane.b32.xlu1 %v550_v63, %s3456_s16 }
 0x2f8   : > { %555 = vrot.lane.b32.xlu0 %v549_v61, %s3456_s16 }
 0x366   : > { %v552_v0 = vpop.permute.xlu0 %551 }
 0x367   : > { %v559_v1 = vsel %vm5073_vm0, 0.0, %v552_v0  ;;  %v554_v2 = vpop.permute.xlu1 %553 }
 0x368   : > { %563 = vrot.lane.b32.xlu1 %v559_v1, %s3462_s27  ;;  %565 = vrot.lane.b32.xlu0 %v554_v2, %s3462_s27 }
 0x36a   : > { %v556_v3 = vpop.permute.xlu0 %555 }
 0x36b   : > { %v560_v4 = vsel %vm5073_vm0, %v556_v3, 0.0 }
 0x36c   : > { %567 = vrot.lane.b32.xlu1 %v560_v4, %s3462_s27 }
 0x3da   : > { %v566_v5 = vpop.permute.xlu0 %565  ;;  %v564_v6 = vpop.permute.xlu1 %563 }
 0x3db   : > { %v573_v7 = vsel %vm5069_vm7, 0.0, %v566_v5  ;;  %v572_v8 = vsel %vm5069_vm7, 0.0, %v564_v6 }
 0x3dc   : > { %v576_v9 = vsel %vm5067_vm11, %v573_v7, 0.0  ;;  %v575_v10 = vsel %vm5067_vm11, %v572_v8, 0.0 }
 0x3dd   : > { %631 = vrot.lane.b32.xlu1 %v576_v9, %s3456_s16  ;;  %629 = vrot.lane.b32.xlu0 %v575_v10, %s3456_s16  ;;  %v638_v14 = vrot.slane %v575_v10, 6  ;;  %v639_v15 = vrot.slane %v576_v9, 6  ;;  %v691_v28 = vrot.slane %v575_v10, 1  ;;  %v692_v30 = vrot.slane %v576_v9, 1 }
 0x3de   : > { %v568_v11 = vpop.permute.xlu1 %567 }
 0x3df   : > { %v574_v12 = vsel %vm5069_vm7, 0.0, %v568_v11  ;;  %v640_v19 = vsel %vm5072_vm1, %v638_v14, %v639_v15  ;;  %v656_v34 = vsel %vm623_vm12, %v575_v10, %v638_v14  ;;  %v3794_v37 = vsel %vm5070_vm3, %v691_v28, %v692_v30 }
 0x3e0   : > { %v577_v13 = vsel %vm5067_vm11, %v574_v12, 0.0  ;;  %v657_v35 = vsel %vm624_vm13, %v576_v9, %v640_v19  ;;  %v676_v38 = vrot.slane %v656_v34, 2  ;;  %v777_v44 = vsel %vm623_vm12, %v638_v14, %v575_v10 }
 0x3e1   : > { %711 = vrot.lane.b32.xlu1 %v576_v9, %s3459_s30  ;;  %633 = vrot.lane.b32.xlu0 %v577_v13, %s3456_s16  ;;  %v694_v33 = vrot.slane %v577_v13, 1  ;;  %v658_v36 = vsel %vm625_vm14, %v577_v13, %v639_v15  ;;  %v677_v41 = vrot.slane %v657_v35, 2  ;;  %v778_v45 = vsel %vm624_vm13, %v640_v19, %v576_v9 }
 0x3e2   : > { %v679_v43 = vrot.slane %v658_v36, 2  ;;  %v779_v46 = vsel %vm625_vm14, %v639_v15, %v577_v13  ;;  %v786_v47 = vrot.slane %v777_v44, 2  ;;  %v787_v50 = vrot.slane %v778_v45, 2 }
 0x3e3   : > { %v3797_v39 = vsel %vm5070_vm3, %v692_v30, %v694_v33  ;;  %v678_v48 = vsel %vm5065_vm4, %v676_v38, %v677_v41  ;;  %v789_v51 = vrot.slane %v779_v46, 2  ;;  %v578_v36 = vand.u32 2147483647, %v3731_v42 }
 0x3e4   : > { %v680_v49 = vsel %vm5065_vm4, %v677_v41, %v679_v43  ;;  %v788_v52 = vsel %vm5065_vm4, %v786_v47, %v787_v50 }
 0x3e5   : > { %641 = vrot.lane.b32.xlu1 %v638_v14, %s3456_s16  ;;  %709 = vrot.lane.b32.xlu0 %v575_v10, %s3459_s30  ;;  %v790_v53 = vsel %vm5065_vm4, %v787_v50, %v789_v51 }
 0x3e9   : > { %645 = vrot.lane.b32.xlu1 %v639_v15, %s3456_s16  ;;  %713 = vrot.lane.b32.xlu0 %v577_v13, %s3459_s30 }
 0x3ed   : > { %718 = vrot.lane.b32.xlu1 %v638_v14, %s3459_s30  ;;  %643 = vrot.lane.b32.xlu0 %v640_v19, %s3456_s16 }
 0x3f1   : > { %722 = vrot.lane.b32.xlu1 %v639_v15, %s3459_s30  ;;  %720 = vrot.lane.b32.xlu0 %v640_v19, %s3459_s30 }
 0x3f5   : > { %615 = vrot.lane.b32.xlu1 %v612_v31, %s3455_s18  ;;  %613 = vrot.lane.b32.xlu0 %v610_v32, %s3455_s18 }
 0x3f9   : > { %698 = vrot.lane.b32.xlu0 %v3794_v37, %s3455_s18  ;;  %700 = vrot.lane.b32.xlu1 %v3797_v39, %s3455_s18 }
 0x3fd   : > { %681 = vrot.lane.b32.xlu0 %v678_v48, %s3455_s18  ;;  %683 = vrot.lane.b32.xlu1 %v680_v49, %s3455_s18  ;;  %v579_v49 = vand.u32 2147483647, %v3729_v40 }
 0x401   : > { %791 = vrot.lane.b32.xlu0 %v788_v52, %s3455_s18  ;;  %793 = vrot.lane.b32.xlu1 %v790_v53, %s3455_s18  ;;  %v583_v52 = vmul.f32 0.41421357, %v578_v36 }
 0x44f   : > { %v630_v54 = vpop.permute.xlu0 %629  ;;  %v632_v55 = vpop.permute.xlu1 %631 }
 0x453   : > { %v634_v56 = vpop.permute.xlu0 %633  ;;  %v712_v57 = vpop.permute.xlu1 %711 }
 0x457   : > { %v710_v58 = vpop.permute.xlu0 %709  ;;  %v642_v61 = vpop.permute.xlu1 %641 }
 0x458   : > { %v650_v0 = vsel %vm623_vm12, %v630_v54, %v642_v61  ;;  %v780_v2 = vsel %vm623_vm12, %v642_v61, %v630_v54  ;;  %vm708_vm12 = vcmp.ge.f32.partialorder %v3718_v29, 0.0 }
 0x459   : > { %v662_v9 = vrot.slane %v650_v0, 2  ;;  %v800_v12 = vrot.slane %v780_v2, 2 }
 0x45b   : > { %v714_v62 = vpop.permute.xlu0 %713  ;;  %v646_v63 = vpop.permute.xlu1 %645 }
 0x45c   : > { %v652_v1 = vsel %vm625_vm14, %v634_v56, %v646_v63  ;;  %v782_v13 = vsel %vm625_vm14, %v646_v63, %v634_v56  ;;  %v584_v63 = vmul.f32 0.41421357, %v579_v49  ;;  %vm621_vm14 = vcmp.gt.f32.partialorder %v3731_v42, 0.0 }
 0x45d   : > { %v665_v10 = vrot.slane %v652_v1, 2  ;;  %v803_v35 = vrot.slane %v782_v13, 2 }
 0x45e   : > { %v588_v2 = vrot.slane %v584_v63, 6 }
 0x45f   : > { %v644_v3 = vpop.permute.xlu0 %643  ;;  %v719_v4 = vpop.permute.xlu1 %718 }
 0x460   : > { %v651_v5 = vsel %vm624_vm13, %v632_v55, %v644_v3  ;;  %v781_v6 = vsel %vm624_vm13, %v644_v3, %v632_v55  ;;  %v727_v7 = vsel %vm706_vm15, %v710_v58, %v719_v4  ;;  %v815_v8 = vsel %vm706_vm15, %v719_v4, %v710_v58 }
 0x461   : > { %v663_v11 = vrot.slane %v651_v5, 2  ;;  %v801_v14 = vrot.slane %v781_v6, 2  ;;  %v733_v15 = vrot.slane %v727_v7, 2  ;;  %v821_v19 = vrot.slane %v815_v8, 2 }
 0x462   : > { %vm690_vm13 = vcmp.ge.f32.partialorder %v3729_v40, 0.0 }
 0x463   : > { %v721_v22 = vpop.permute.xlu0 %720  ;;  %v723_v23 = vpop.permute.xlu1 %722  ;;  %v664_v24 = vsel %vm5065_vm4, %v662_v9, %v663_v11  ;;  %v666_v25 = vsel %vm5065_vm4, %v663_v11, %v665_v10  ;;  %v802_v38 = vsel %vm5065_vm4, %v800_v12, %v801_v14  ;;  %v804_v48 = vsel %vm5065_vm4, %v801_v14, %v803_v35 }
 0x464   : > { %v728_v26 = vsel %vm707_vm10, %v712_v57, %v721_v22  ;;  %v816_v27 = vsel %vm707_vm10, %v721_v22, %v712_v57  ;;  %v729_v28 = vsel %vm708_vm12, %v714_v62, %v723_v23  ;;  %v817_v30 = vsel %vm708_vm12, %v723_v23, %v714_v62  ;;  %667 = vrot.lane.b32.xlu0 %v664_v24, %s3455_s18 }
 0x465   : > { %v734_v31 = vrot.slane %v728_v26, 2  ;;  %v822_v32 = vrot.slane %v816_v27, 2  ;;  %v736_v33 = vrot.slane %v729_v28, 2  ;;  %v824_v34 = vrot.slane %v817_v30, 2  ;;  %669 = vrot.lane.b32.xlu1 %v666_v25, %s3455_s18 }
 0x466   : > { %vm689_vm10 = vcmp.ge.f32.partialorder %v3731_v42, 0.0  ;;  %vm622_vm12 = vcmp.gt.f32.partialorder %v3729_v40, 0.0 }
 0x467   : > { %v614_v41 = vpop.permute.xlu0 %613  ;;  %v616_v43 = vpop.permute.xlu1 %615  ;;  %v735_v44 = vsel %vm5065_vm4, %v733_v15, %v734_v31  ;;  %v737_v45 = vsel %vm5065_vm4, %v734_v31, %v736_v33  ;;  %v823_v46 = vsel %vm5065_vm4, %v821_v19, %v822_v32  ;;  %v825_v47 = vsel %vm5065_vm4, %v822_v32, %v824_v34 }
 0x468   : > { %805 = vrot.lane.b32.xlu0 %v802_v38, %s3455_s18  ;;  %vm3869_vm15 = vcmp.le.f32.partialorder %v578_v36, %v614_v41 }
 0x469   : > { %807 = vrot.lane.b32.xlu1 %v804_v48, %s3455_s18 }
 0x46b   : > { %v699_v50 = vpop.permute.xlu0 %698  ;;  %v701_v51 = vpop.permute.xlu1 %700 }
 0x46c   : > { %v704_v53 = vsel %vm689_vm10, %v3794_v37, %v699_v50  ;;  %v813_v54 = vsel %vm689_vm10, %v699_v50, %v3794_v37  ;;  %v705_v55 = vsel %vm690_vm13, %v3797_v39, %v701_v51  ;;  %v814_v56 = vsel %vm690_vm13, %v701_v51, %v3797_v39  ;;  %738 = vrot.lane.b32.xlu0 %v735_v44, %s3455_s18 }
 0x46d   : > { %v748_v57 = vrot.slane %v704_v53, 6  ;;  %v836_v58 = vrot.slane %v813_v54, 6  ;;  %v749_v61 = vrot.slane %v705_v55, 6  ;;  %v837_v62 = vrot.slane %v814_v56, 6  ;;  %740 = vrot.lane.b32.xlu1 %v737_v45, %s3455_s18 }
 0x46e   : > { %v587_v37 = vrot.slane %v583_v52, 6  ;;  %vm3874_vm10 = vcmp.le.f32.partialorder %v579_v49, %v616_v43 }
 0x46f   : > { %v750_v0 = vsel %vm5072_vm1, %v748_v57, %v749_v61  ;;  %v838_v1 = vsel %vm5072_vm1, %v836_v58, %v837_v62  ;;  %v682_v3 = vpop.permute.xlu0 %681  ;;  %v684_v4 = vpop.permute.xlu1 %683 }
 0x470   : > { %826 = vrot.lane.b32.xlu0 %v823_v46, %s3455_s18  ;;  %v589_v39 = vsel %vm5072_vm1, %v587_v37, %v588_v2 }
 0x471   : > { %828 = vrot.lane.b32.xlu1 %v825_v47, %s3455_s18 }
 0x473   : > { %v792_v5 = vpop.permute.xlu0 %791  ;;  %v794_v6 = vpop.permute.xlu1 %793 }
 0x474   : > { %590 = vrot.lane.b32.xlu0 %v587_v37, %s3456_s16 }
 0x475   : > { %592 = vrot.lane.b32.xlu1 %v589_v39, %s3456_s16 }
 0x478   : > { %594 = vrot.lane.b32.xlu0 %v588_v2, %s3456_s16 }
 0x479   : > { %751 = vrot.lane.b32.xlu1 %v748_v57, %s3456_s16 }
 0x47c   : > { %753 = vrot.lane.b32.xlu0 %v750_v0, %s3456_s16 }
 0x47d   : > { %755 = vrot.lane.b32.xlu1 %v749_v61, %s3456_s16 }
 0x480   : > { %841 = vrot.lane.b32.xlu0 %v838_v1, %s3456_s16 }
 0x481   : > { %839 = vrot.lane.b32.xlu1 %v836_v58, %s3456_s16 }
 0x485   : > { %843 = vrot.lane.b32.xlu1 %v837_v62, %s3456_s16 }
 0x4d6   : > { %v668_v7 = vpop.permute.xlu0 %667 }
 0x4d7   : > { %v670_v8 = vpop.permute.xlu1 %669  ;;  %v687_v12 = vsel %vm621_vm14, %v668_v7, %v682_v3 }
 0x4d8   : > { %v688_v15 = vsel %vm622_vm12, %v670_v8, %v684_v4 }
 0x4da   : > { %v806_v9 = vpop.permute.xlu0 %805 }
 0x4db   : > { %v808_v10 = vpop.permute.xlu1 %807  ;;  %v811_v25 = vsel %vm621_vm14, %v792_v5, %v806_v9 }
 0x4dc   : > { %v812_v40 = vsel %vm622_vm12, %v794_v6, %v808_v10 }
 0x4de   : > { %v739_v13 = vpop.permute.xlu0 %738 }
 0x4df   : > { %v744_v19 = vsel %vm3869_vm15, %v739_v13, %v687_v12  ;;  %v741_v22 = vpop.permute.xlu1 %740  ;;  %v3463_v12 = vmov 0.0  }
 0x4e0   : > { %v762_v23 = vrot.slane %v744_v19, 6  ;;  %v745_v42 = vsel %vm3874_vm10, %v741_v22, %v688_v15 }
 0x4e1   : > { %v763_v24 = vrot.slane %v745_v42, 6 }
 0x4e2   : > { %v827_v26 = vpop.permute.xlu0 %826  ;;  %765 = vrot.lane.b32.xlu0 %v762_v23, %s3456_s16 }
 0x4e3   : > { %v832_v27 = vsel %vm3869_vm15, %v827_v26, %v811_v25  ;;  %v829_v28 = vpop.permute.xlu1 %828  ;;  %v764_v30 = vsel %vm5072_vm1, %v762_v23, %v763_v24 }
 0x4e4   : > { %v850_v31 = vrot.slane %v832_v27, 6  ;;  %v833_v32 = vsel %vm3874_vm10, %v829_v28, %v812_v40  ;;  %767 = vrot.lane.b32.xlu1 %v764_v30, %s3456_s16 }
 0x4e5   : > { %v851_v33 = vrot.slane %v833_v32, 6 }
 0x4e6   : > { %769 = vrot.lane.b32.xlu0 %v763_v24, %s3456_s16  ;;  %v591_v36 = vpop.permute.xlu0 %590 }
 0x4e7   : > { %v852_v34 = vsel %vm5072_vm1, %v850_v31, %v851_v33  ;;  %v593_v35 = vpop.permute.xlu1 %592  ;;  %vm3896_vm13 = vcmp.le.f32.partialorder %v580_v18, %v591_v36 }
 0x4e8   : > { %855 = vrot.lane.b32.xlu1 %v852_v34, %s3456_s16  ;;  %vm3904_vm14 = vcmp.le.f32.partialorder %v581_v16, %v593_v35 }
 0x4ea   : > { %853 = vrot.lane.b32.xlu0 %v850_v31, %s3456_s16  ;;  %v595_v41 = vpop.permute.xlu0 %594 }
 0x4eb   : > { %v752_v38 = vpop.permute.xlu1 %751  ;;  %vm3912_vm15 = vcmp.le.f32.partialorder %v582_v17, %v595_v41 }
 0x4ee   : > { %857 = vrot.lane.b32.xlu0 %v851_v33, %s3456_s16  ;;  %v754_v44 = vpop.permute.xlu0 %753 }
 0x4ef   : > { %v756_v43 = vpop.permute.xlu1 %755 }
 0x4f2   : > { %v842_v46 = vpop.permute.xlu0 %841 }
 0x4f3   : > { %v840_v45 = vpop.permute.xlu1 %839 }
 0x4f7   : > { %v844_v47 = vpop.permute.xlu1 %843 }
 0x554   : > { %v766_v49 = vpop.permute.xlu0 %765 }
 0x555   : > { %v774_v50 = vsel %vm3896_vm13, %v752_v38, %v766_v49 }
 0x556   : > { %v868_v52 = vrot.slane %v774_v50, 2  ;;  %v768_v53 = vpop.permute.xlu1 %767 }
 0x557   : > { %v775_v54 = vsel %vm3904_vm14, %v754_v44, %v768_v53 }
 0x558   : > { %v869_v18 = vrot.slane %v775_v54, 2  ;;  %v770_v55 = vpop.permute.xlu0 %769 }
 0x559   : > { %v776_v20 = vsel %vm3912_vm15, %v756_v43, %v770_v55 }
 0x55a   : > { %v871_v16 = vrot.slane %v776_v20, 2  ;;  %v856_v56 = vpop.permute.xlu1 %855  ;;  %v870_v57 = vsel %vm5065_vm4, %v868_v52, %v869_v18 }
 0x55b   : > { %v863_v58 = vsel %vm3904_vm14, %v842_v46, %v856_v56  ;;  %873 = vrot.lane.b32.xlu1 %v870_v57, %s3455_s18 }
 0x55c   : > { %v854_v61 = vpop.permute.xlu0 %853  ;;  %v872_v29 = vsel %vm5065_vm4, %v869_v18, %v871_v16  ;;  %v887_v62 = vrot.slane %v863_v58, 2 }
 0x55d   : > { %v862_v17 = vsel %vm3896_vm13, %v840_v45, %v854_v61  ;;  %875 = vrot.lane.b32.xlu0 %v872_v29, %s3455_s18 }
 0x55e   : > { %v886_v63 = vrot.slane %v862_v17, 2 }
 0x560   : > { %v858_v0 = vpop.permute.xlu0 %857  ;;  %v888_v1 = vsel %vm5065_vm4, %v886_v63, %v887_v62 }
 0x561   : > { %v864_v37 = vsel %vm3912_vm15, %v844_v47, %v858_v0  ;;  %891 = vrot.lane.b32.xlu1 %v888_v1, %s3455_s18 }
 0x562   : > { %v889_v2 = vrot.slane %v864_v37, 2 }
 0x564   : > { %v890_v39 = vsel %vm5065_vm4, %v887_v62, %v889_v2 }
 0x565   : > { %893 = vrot.lane.b32.xlu0 %v890_v39, %s3455_s18 }
 0x5cd   : > { %v874_v3 = vpop.permute.xlu1 %873 }
 0x5ce   : > { %v879_v4 = vsub.f32 %v3739_v60, %v874_v3 }
 0x5cf   : > { %v876_v5 = vpop.permute.xlu0 %875 }
 0x5d0   : > { %vm881_vm12 = vcmp.gt.f32.partialorder %v879_v4, 0.0  ;;  %v880_v8 = vsub.f32 %v3737_v59, %v876_v5 }
 0x5d2   : > { %vm882_vm15 = vcmp.gt.f32.partialorder %v880_v8, 0.0 }
 0x5d3   : > { %v892_v6 = vpop.permute.xlu1 %891 }
 0x5d4   : > { %v897_v7 = vsub.f32 %v3739_v60, %v892_v6 }
 0x5d6   : > { %vm899_vm10 = vcmp.gt.f32.partialorder %v897_v7, 0.0 }
 0x5d7   : > { %vm901_vm13 = vmand %vm881_vm12, %vm899_vm10  ;;  %v894_v9 = vpop.permute.xlu0 %893 }
 0x5d8   : > { %v903_v10 = vsel %vm901_vm13, %v3739_v60, 0.0  ;;  %v898_v11 = vsub.f32 %v3737_v59, %v894_v9 }
 0x5d9   : > { %vm905_vm14 = vcmp.gt.f32.partialorder %v903_v10, 0.1  ;;  %vm907_vm8 = vcmp.gt.f32.partialorder %v903_v10, 0.2 }
 0x5da   : > { %v909_v13 = vsel %vm905_vm14, 0.5, %v3463_v12  ;;  %vm900_vm6 = vcmp.gt.f32.partialorder %v898_v11, 0.0 }
 0x5db   : > { %vm902_vm5 = vmand %vm882_vm15, %vm900_vm6  ;;  %v911_v15 = vsel %vm907_vm8, 1.0, %v909_v13 }
 0x5dc   : > { %v904_v14 = vsel %vm902_vm5, %v3737_v59, 0.0  ;;  %v915_v22 = vrot.slane %v911_v15, 7 }
 0x5dd   : > { %vm906_vm4 = vcmp.gt.f32.partialorder %v904_v14, 0.1  ;;  %vm908_vm12 = vcmp.gt.f32.partialorder %v904_v14, 0.2 }
 0x5de   : > { %v910_v19 = vsel %vm906_vm4, 0.5, %v3463_v12  ;;  %vm5066_vm4 = vcmask 140288  }
 0x5df   : > { %v912_v60 = vsel %vm908_vm12, 1.0, %v910_v19 }
 0x5e0   : > { %v916_v23 = vrot.slane %v912_v60, 7 }
 0x5e2   : > { %v917_v42 = vsel %vm5073_vm0, %v915_v22, %v916_v23  ;;  %v3297_v24 = vpack.i.bf16 %v916_v23, %v915_v22 }
 0x5e3   : > { %920 = vrot.lane.b32.xlu0 %v917_v42, %s3456_s16 }
 0x5e4   : > { %3298 = vrot.lane.b32.xlu1 %v3297_v24, %s3456_s16 }
 0x655   : > { %v921_v40 = vpop.permute.xlu0 %920 }
 0x656   : > { %v3299_v59 = vpop.permute.xlu1 %3298 }
 0x657   : > { %v3301_v25 = vunpack.i.h.bf16 %v3299_v59  ;;  %v3300_v26 = vunpack.i.l.bf16 %v3299_v59 }
 0x659   : > { %v926_v27 = vsel %vm5073_vm0, 0.0, %v3300_v26  ;;  %v927_v28 = vsel %vm5073_vm0, %v3301_v25, 0.0 }
 0x65a   : > { %934 = vrot.lane.b32.xlu0 %v927_v28, %s3462_s27  ;;  %v3302_v30 = vpack.i.bf16 %v921_v40, %v926_v27 }
 0x65c   : > { %3303 = vrot.lane.b32.xlu1 %v3302_v30, %s3462_s27 }
 0x6cc   : > { %v935_v31 = vpop.permute.xlu0 %934 }
 0x6cd   : > { %v941_v32 = vsel %vm5069_vm7, 0.0, %v935_v31 }
 0x6ce   : > { %v944_v33 = vsel %vm5067_vm11, %v941_v32, 0.0  ;;  %v3304_v34 = vpop.permute.xlu1 %3303 }
 0x6cf   : > { %948 = vst.msk [vmem:[#allocation2 + $0x10] sm:$0x3] %vm5066_vm4, %v944_v33  ;;  %v3306_v35 = vunpack.i.h.bf16 %v3304_v34  ;;  %v3305_v36 = vunpack.i.l.bf16 %v3304_v34 }
 0x6d1   : > { %v940_v38 = vsel %vm5069_vm7, 0.0, %v3306_v35  ;;  %v939_v41 = vsel %vm5069_vm7, 0.0, %v3305_v36 }
 0x6d2   : > { %v943_v43 = vsel %vm5067_vm11, %v940_v38, 0.0  ;;  %v942_v44 = vsel %vm5067_vm11, %v939_v41, 0.0 }
 0x6d3   : > { %946 = vst.msk [vmem:[#allocation2 + $0x8] sm:$0xff] %vm5068_vm9, %v943_v43  ;;  %945 = vst.msk [vmem:[#allocation2] sm:$0xff] %vm5068_vm9, %v942_v44 }
 0x6d4 LB: >> { %v3464_v47 = vmov 0   ;;  %s3465_s6 = smov 2   ;;  %s3466_s19 = smov 1   ;;  %v3468_v2 = vmov 0.0   ;;  %s3445_s5 = sphi %s3964_s5, %s1041_s5  }
 0x6d5   : >> { %s3467_s20 = smov 127   ;;  %s1041_s5 = sadd.s32 1, %s3445_s5  }
 0x6d6   : >> { %p953_p1 = scmp.lt.s32.totalorder %s1041_s5, 256 }
 0x6da   : >> { %v964_v45 = vld [vmem:[#allocation2 + $0x2] sm:$0xff]  ;;  %v965_v46 = vld [vmem:[#allocation2 + $0xa] sm:$0xff] }
 0x6db   : >> { %vm966_vm5 = vcmp.eq.f32.partialorder %v964_v45, 1.0  ;;  %vm967_vm6 = vcmp.eq.f32.partialorder %v965_v46, 1.0  ;;  %v3971_v49 = vld [vmem:[#allocation2 + $0x9] sm:$0xff]  ;;  %v3973_v50 = vld [vmem:[#allocation2 + $0x1] sm:$0xff] }
 0x6dc   : >> { %v970_v48 = vsel %vm966_vm5, 1, %v3464_v47  ;;  %v971_v51 = vsel %vm967_vm6, 1, %v3464_v47  ;;  %vm5077_vm8 = vcmp.eq.f32.partialorder %v3971_v49, 1.0  ;;  %vm5076_vm10 = vcmp.eq.f32.partialorder %v3973_v50, 1.0  ;;  %v999_v52 = vld [vmem:[#allocation2 + $0x8] sm:$0xff]  ;;  %v998_v53 = vld [vmem:[#allocation2] sm:$0xff] }
 0x6dd   : >> { %980 = vrot.lane.b32.xlu1 %v970_v48, %s3465_s6  ;;  %972 = vrot.lane.b32.xlu0 %v970_v48, %s3466_s19  ;;  %v989_v54 = vsel %vm5077_vm8, 1, %v3464_v47  ;;  %v988_v21 = vsel %vm5076_vm10, 1, %v3464_v47  ;;  %vm5075_vm13 = vcmp.eq.f32.partialorder %v999_v52, 1.0  ;;  %vm5074_vm14 = vcmp.eq.f32.partialorder %v998_v53, 1.0  ;;  %vm968_vm15 = vmor %vm5076_vm10, %vm966_vm5 }
 0x6de   : >> { %v1003_v18 = vsel %vm5075_vm13, 1, %v3464_v47  ;;  %v1002_v55 = vsel %vm5074_vm14, 1, %v3464_v47  ;;  %vm969_vm4 = vmor %vm5077_vm8, %vm967_vm6 }
 0x6e1   : >> { %982 = vrot.lane.b32.xlu1 %v971_v51, %s3465_s6  ;;  %974 = vrot.lane.b32.xlu0 %v971_v51, %s3466_s19 }
 0x6e5   : >> { %992 = vrot.lane.b32.xlu1 %v989_v54, %s3465_s6  ;;  %990 = vrot.lane.b32.xlu0 %v988_v21, %s3465_s6 }
 0x6e9   : >> { %1006 = vrot.lane.b32.xlu1 %v1003_v18, %s3465_s6  ;;  %1004 = vrot.lane.b32.xlu0 %v1002_v55, %s3465_s6 }
 0x6ed   : >> { %1014 = vrot.lane.b32.xlu1 %v1003_v18, %s3466_s19  ;;  %1012 = vrot.lane.b32.xlu0 %v1002_v55, %s3466_s19 }
 0x74f   : >> { %v981_v20 = vpop.permute.xlu1 %980  ;;  %v973_v16 = vpop.permute.xlu0 %972 }
 0x750   : >> { %vm976_vm12 = vcmp.ne.s32.totalorder %v973_v16, 0  ;;  %vm984_vm9 = vcmp.ne.s32.totalorder %v981_v20, 0 }
 0x751   : >> { %vm978_vm7 = vmor %vm968_vm15, %vm976_vm12 }
 0x752   : >> { %vm986_vm0 = vmor %vm978_vm7, %vm984_vm9  ;;  %vm5099_vm9 = vcmp.eq.f32.partialorder %v999_v52, 1.0 }
 0x753   : >> { %v983_v56 = vpop.permute.xlu1 %982  ;;  %v975_v57 = vpop.permute.xlu0 %974 }
 0x754   : >> { %vm977_vm11 = vcmp.ne.s32.totalorder %v975_v57, 0  ;;  %vm985_vm3 = vcmp.ne.s32.totalorder %v983_v56, 0 }
 0x755   : >> { %vm979_vm2 = vmor %vm969_vm4, %vm977_vm11 }
 0x756   : >> { %vm987_vm13 = vmor %vm979_vm2, %vm985_vm3 }
 0x757   : >> { %v993_v58 = vpop.permute.xlu1 %992  ;;  %v991_v61 = vpop.permute.xlu0 %990 }
 0x758   : >> { %vm995_vm1 = vcmp.ne.s32.totalorder %v993_v58, 0  ;;  %vm994_vm14 = vcmp.ne.s32.totalorder %v991_v61, 0 }
 0x759   : >> { %vm997_vm10 = vmor %vm987_vm13, %vm995_vm1  ;;  %vm5100_vm1 = vcmp.eq.f32.partialorder %v998_v53, 1.0 }
 0x75a   : >> { %vm996_vm8 = vmor %vm986_vm0, %vm994_vm14  ;;  %vm961_vm0 = vcmp.eq.f32.partialorder %v3971_v49, 0.5  ;;  %vm5079_vm14 = vcmask 138248  }
 0x75b   : >> { %v1007_v29 = vpop.permute.xlu1 %1006  ;;  %v1005_v17 = vpop.permute.xlu0 %1004  ;;  %v1035_v39 = vsel %vm961_vm0, 0.5, %v3468_v2 }
 0x75c   : >> { %vm1009_vm5 = vcmp.ne.s32.totalorder %v1007_v29, 0  ;;  %vm1008_vm6 = vcmp.ne.s32.totalorder %v1005_v17, 0 }
 0x75d   : >> { %vm1011_vm12 = vmor %vm997_vm10, %vm1009_vm5 }
 0x75e   : >> { %vm1010_vm15 = vmor %vm996_vm8, %vm1008_vm6  ;;  %vm960_vm8 = vcmp.eq.f32.partialorder %v3973_v50, 0.5  ;;  %vm5101_vm6 = vcmp.eq.f32.partialorder %v3971_v49, 1.0 }
 0x75f   : >> { %v1015_v62 = vpop.permute.xlu1 %1014  ;;  %v1013_v63 = vpop.permute.xlu0 %1012  ;;  %v1034_v5 = vsel %vm960_vm8, 0.5, %v3468_v2 }
 0x760   : >> { %vm1017_vm4 = vcmp.ne.s32.totalorder %v1015_v62, 0  ;;  %vm1016_vm11 = vcmp.ne.s32.totalorder %v1013_v63, 0 }
 0x761   : >> { %vm1019_vm7 = vmor %vm1011_vm12, %vm1017_vm4 }
 0x762   : >> { %vm1021_vm2 = vmor %vm1019_vm7, %vm5099_vm9  ;;  %vm5078_vm9 = vcmask 130048  }
 0x763   : >> { %vm1018_vm3 = vmor %vm1010_vm15, %vm1016_vm11  ;;  %v1023_v0 = vsel %vm1021_vm2, 1, %v3464_v47  ;;  %vm5102_vm11 = vcmp.eq.f32.partialorder %v3973_v50, 1.0 }
 0x764   : >> { %vm1020_vm13 = vmor %vm1018_vm3, %vm5100_vm1  ;;  %1026 = vrot.lane.b32.xlu1 %v1023_v0, %s3467_s20 }
 0x765   : >> { %v1022_v1 = vsel %vm1020_vm13, 1, %v3464_v47 }
 0x766   : >> { %1024 = vrot.lane.b32.xlu0 %v1022_v1, %s3467_s20 }
 0x7d6   : >> { %v1027_v37 = vpop.permute.xlu1 %1026 }
 0x7d7   : >> { %vm1029_vm10 = vcmp.ne.s32.totalorder %v1027_v37, 0 }
 0x7d8   : >> { %vm1031_vm5 = vmand %vm961_vm0, %vm1029_vm10  ;;  %v1025_v3 = vpop.permute.xlu0 %1024 }
 0x7d9   : >> { %vm1033_vm12 = vmor %vm5101_vm6, %vm1031_vm5  ;;  %v3193_v4 = vsel %vm1031_vm5, 1.0, %v3468_v2  ;;  %vm1028_vm15 = vcmp.ne.s32.totalorder %v1025_v3, 0 }
 0x7da   : >> { %v1037_v6 = vsel %vm1033_vm12, 1.0, %v1035_v39  ;;  %vm1030_vm4 = vmand %vm960_vm8, %vm1028_vm15 }
 0x7db   : >> { %1040 = vst.msk [vmem:[#allocation2 + $0x9] sm:$0xff] %vm5079_vm14, %v1037_v6  ;;  %v3192_v7 = vsel %vm1030_vm4, 1.0, %v3468_v2  ;;  %vm1032_vm7 = vmor %vm5102_vm11, %vm1030_vm4 }
 0x7dc   : >> { %v3311_v8 = vpack.i.bf16 %v3193_v4, %v3192_v7  ;;  %v1036_v9 = vsel %vm1032_vm7, 1.0, %v1034_v5 }
 0x7dd   : >> { %1039 = vst.msk [vmem:[#allocation2 + $0x1] sm:$0xff] %vm5079_vm14, %v1036_v9 }
 0x7de   : >> { %3312 = vrot.lane.b32.xlu0 %v3311_v8, %s3467_s20 }
 0x850   : >> { %v3313_v10 = vpop.permute.xlu0 %3312 }
 0x851   : >> { %v3315_v11 = vunpack.i.h.bf16 %v3313_v10  ;;  %v3314_v13 = vunpack.i.l.bf16 %v3313_v10 }
 0x853   : >> { %v1055_v14 = vsel %vm5078_vm9, %v3314_v13, 0.0  ;;  %v1056_v15 = vsel %vm5078_vm9, %v3315_v11, 0.0 }
 0x854   : >> { %v1057_v19 = vadd.f32 %v1056_v15, %v1055_v14 }
 0x856   : >> { %1058 = vadd.xlane.f32.xlu1 %v1057_v19 }
 0x8df   : >> { %v1059_v60 = vpop.xlane.xlu1 %1058 }
 0x8e0   : >> { %v1060_v22 = vrot.slane %v1059_v60, 4 }
 0x8e2   : >> { %v1061_v23 = vadd.f32 %v1060_v22, %v1059_v60 }
 0x8e4   : >> { %v1062_v42 = vrot.slane %v1061_v23, 2 }
 0x8e6   : >> { %v1063_v24 = vadd.f32 %v1062_v42, %v1061_v23 }
 0x8e8   : >> { %v1064_v59 = vrot.slane %v1063_v24, 1 }
 0x8ea   : >> { %v1065_v25 = vadd.f32 %v1064_v59, %v1063_v24 }
 0x8ec   : >> { %3207 = vpush %v1065_v25 }
 0x91d   : >> { %s3208_s7 = spop %3207 }
 0x91e   : >> { %p952_p8 = scmp.gt.f32.partialorder %s3208_s7, 0.0 }
 0x920   : >> { %p954_p4 = pnand %p953_p1, %p952_p8 }
 0x921   : > { %v1069_v26 = vld [vmem:[%s3634_s3] sm:$0xff] (%p954_p4)  ;;  %v1070_v40 = vld [vmem:[%s3634_s3 + $0x8] sm:$0xff] (%p954_p4)  ;;  %v3194_v27 = vld [vmem:[%s3634_s3 + $0x10] sm:$0xff] (%p954_p4)  ;;  %vm5103_vm2 = vcmask (%p954_p4), 1040384   ;;  %vm5104_vm3 = vcmask (%p954_p4), 1041408   ;;  %vm5107_vm0 = vcmask (%p954_p4), 1042432  }
 0x922   : > { %957 = sbr.rel (!%p954_p4) target bundleno = 1748 (0x6d4), region = 99  ;;  %v3195_v28 = vld [vmem:[%s3634_s3 + $0x18] sm:$0xff] (%p954_p4)  ;;  %v1074_v30 = vmax.f32 (%p954_p4), %v1069_v26, %v3194_v27  ;;  %v3196_v31 = vld [vmem:[%s3634_s3 + $0x20] sm:$0xff] (%p954_p4)  ;;  %v3197_v32 = vld [vmem:[%s3634_s3 + $0x28] sm:$0xff] (%p954_p4)  ;;  %vm5108_vm8 = vcmask (%p954_p4), 1046528   ;;  %vm5109_vm10 = vcmask (%p954_p4), 1045504  }
 0x923   : > { %v1075_v33 = vmax.f32 (%p954_p4), %v1070_v40, %v3195_v28  ;;  %vm5105_vm1 = vmmov (%p954_p4), %vm5104_vm3  ;;  %vm5110_vm5 = vcmask (%p954_p4), 1044480   ;;  %vm5113_vm15 = vcmask (%p954_p4), 1043456   ;;  %vm5116_vm7 = vcmask (%p954_p4), 7168   ;;  %s4338_s8 = smov (%p954_p4), 0  }
 0x924   : > { %v1079_v34 = vmax.f32 (%p954_p4), %v1074_v30, %v3196_v31  ;;  %vm5106_vm13 = vmmov (%p954_p4), %vm5105_vm1 }
 0x925   : > { %v1080_v35 = vmax.f32 (%p954_p4), %v1075_v33, %v3197_v32  ;;  %vm5111_vm6 = vmmov (%p954_p4), %vm5108_vm8 }
 0x926   : > { %v1082_v36 = vrot.slane (%p954_p4), %v1079_v34, 2  ;;  %v1085_v38 = vrot.slane (%p954_p4), %v1079_v34, 6  ;;  %vm5112_vm12 = vmmov (%p954_p4), %vm5109_vm10 }
 0x927   : > { %v1086_v41 = vrot.slane %v1080_v35, 6  ;;  %v1091_v43 = vrot.slane %v1080_v35, 4  ;;  %v1093_v44 = vrot.slane %v1080_v35, 2  ;;  %vm5114_vm4 = vmmov %vm5110_vm5 }
 0x928   : > { %v1095_v45 = vsel %vm5103_vm2, %v1082_v36, %v1079_v34  ;;  %vm5115_vm11 = vmmov %vm5113_vm15 }
 0x929   : > { %v1087_v46 = vsel %vm5104_vm3, %v1085_v38, %v1086_v41  ;;  %v1096_v47 = vsel %vm5105_vm1, %v1095_v45, %v1085_v38  ;;  %v1097_v48 = vsel %vm5106_vm13, %v1086_v41, %v1091_v43  ;;  %vm5117_vm2 = vmmov %vm5116_vm7  ;;  %vm5118_vm3 = vcmask 15360  }
 0x92a   : > { %v1100_v49 = vmul.f32 0.054488685, %v1087_v46  ;;  %v1101_v50 = vmul.f32 0.24420135, %v1096_v47  ;;  %v1102_v51 = vmul.f32 0.24420135, %v1087_v46  ;;  %v1098_v54 = vsel %vm5107_vm0, %v1097_v48, %v1093_v44  ;;  %vm5119_vm1 = vmmov %vm5118_vm3 }
 0x92b   : > { %v1116_v52 = vmul.f32 0.40261996, %v1096_v47  ;;  %v1117_v53 = vmul.f32 0.40261996, %v1087_v46  ;;  %v1099_v21 = vmul.f32 0.054488685, %v1096_v47 }
 0x92c   : > { %v1107_v18 = vrot.slane %v1101_v50, 1  ;;  %v1131_v55 = vrot.slane %v1101_v50, 3  ;;  %v1108_v20 = vrot.slane %v1102_v51, 1  ;;  %v1132_v57 = vrot.slane %v1102_v51, 3 }
 0x92d   : > { %v1122_v16 = vrot.slane %v1116_v52, 2  ;;  %v1123_v56 = vrot.slane %v1117_v53, 2  ;;  %v1103_v58 = vmul.f32 0.24420135, %v1098_v54  ;;  %v1118_v61 = vmul.f32 0.40261996, %v1098_v54 }
 0x92e   : > { %v1140_v29 = vmul.f32 0.054488685, %v1098_v54  ;;  %v1109_v17 = vsel %vm5108_vm8, %v1107_v18, %v1108_v20  ;;  %v1144_v63 = vrot.slane %v1099_v21, 4  ;;  %v1145_v0 = vrot.slane %v1100_v49, 4 }
 0x92f   : > { %v1124_v62 = vsel %vm5109_vm10, %v1122_v16, %v1123_v56  ;;  %v1114_v1 = vadd.f32 %v1109_v17, %v1099_v21  ;;  %v1110_v37 = vrot.slane %v1103_v58, 1  ;;  %v1125_v2 = vrot.slane %v1118_v61, 2 }
 0x930   : > { %v1134_v39 = vrot.slane %v1103_v58, 3  ;;  %v1133_v3 = vsel %vm5110_vm5, %v1131_v55, %v1132_v57  ;;  %v1147_v7 = vrot.slane %v1140_v29, 4  ;;  %v1146_v8 = vsel %vm5113_vm15, %v1144_v63, %v1145_v0 }
 0x931   : > { %v1129_v4 = vadd.f32 %v1124_v62, %v1114_v1  ;;  %v1111_v5 = vsel %vm5111_vm6, %v1108_v20, %v1110_v37  ;;  %v1126_v6 = vsel %vm5112_vm12, %v1123_v56, %v1125_v2  ;;  %vm5120_vm13 = vcmask 146432  }
 0x932   : > { %v1115_v9 = vadd.f32 %v1111_v5, %v1100_v49  ;;  %v1135_v11 = vsel %vm5114_vm4, %v1132_v57, %v1134_v39  ;;  %v1148_v15 = vsel %vm5115_vm11, %v1145_v0, %v1147_v7  ;;  %vm5121_vm0 = vmmov %vm5120_vm13  ;;  %vm5122_vm8 = vcmask 154624  }
 0x933   : > { %v1138_v10 = vadd.f32 %v1133_v3, %v1129_v4  ;;  %vm5123_vm10 = vmmov %vm5122_vm8  ;;  %vm5124_vm5 = vcmask 1040384   ;;  %vm5127_vm15 = vcmask 1041408   ;;  %vm5128_vm4 = vcmask 1046528  }
 0x934   : > { %v1130_v13 = vadd.f32 %v1126_v6, %v1115_v9  ;;  %vm5125_vm6 = vmmov %vm5124_vm5 }
 0x935   : > { %v1151_v14 = vadd.f32 %v1146_v8, %v1138_v10  ;;  %vm5126_vm12 = vmmov %vm5124_vm5 }
 0x936   : > { %v1139_v19 = vadd.f32 %v1135_v11, %v1130_v13  ;;  %vm5129_vm11 = vmmov %vm5128_vm4 }
 0x937   : > { %1161 = vrot.lane.b32.xlu1 %v1151_v14, %s3455_s18  ;;  %1155 = vrot.lane.b32.xlu0 %v1151_v14, %s3456_s16 }
 0x938   : > { %v1152_v60 = vadd.f32 %v1148_v15, %v1139_v19 }
 0x93b   : > { %1163 = vrot.lane.b32.xlu1 %v1152_v60, %s3455_s18  ;;  %1157 = vrot.lane.b32.xlu0 %v1152_v60, %s3456_s16 }
 0x93f   : > { %1169 = vrot.lane.b32.xlu1 %v1152_v60, %s3457_s23  ;;  %1167 = vrot.lane.b32.xlu0 %v1151_v14, %s3457_s23 }
 0x943   : > { %1175 = vrot.lane.b32.xlu1 %v1152_v60, %s3458_s29  ;;  %1173 = vrot.lane.b32.xlu0 %v1151_v14, %s3458_s29 }
 0x9a9   : > { %v1162_v22 = vpop.permute.xlu1 %1161  ;;  %v1156_v23 = vpop.permute.xlu0 %1155 }
 0x9aa   : > { %v1179_v59 = vsel %vm5116_vm7, %v1156_v23, %v1151_v14  ;;  %vm5130_vm7 = vcmask 1045504  }
 0x9ab   : > { %v1181_v28 = vsel %vm5119_vm1, %v1179_v59, %v1162_v22  ;;  %vm5133_vm1 = vcmask 138240  }
 0x9ad   : > { %v1164_v42 = vpop.permute.xlu1 %1163  ;;  %v1158_v24 = vpop.permute.xlu0 %1157 }
 0x9ae   : > { %v1180_v25 = vsel %vm5117_vm2, %v1158_v24, %v1152_v60  ;;  %vm5131_vm2 = vmmov %vm5130_vm7 }
 0x9af   : > { %v1182_v27 = vsel %vm5118_vm3, %v1180_v25, %v1164_v42  ;;  %vm5132_vm3 = vcmask 7168  }
 0x9b1   : > { %v1170_v26 = vpop.permute.xlu1 %1169  ;;  %v1168_v40 = vpop.permute.xlu0 %1167 }
 0x9b2   : > { %v1184_v30 = vsel %vm5120_vm13, %v1182_v27, %v1170_v26  ;;  %v1183_v31 = vsel %vm5121_vm0, %v1181_v28, %v1168_v40  ;;  %vm5134_vm13 = vmmov %vm5132_vm3 }
 0x9b3   : > { %vm5135_vm0 = vmmov %vm5132_vm3 }
 0x9b5   : > { %v1176_v32 = vpop.permute.xlu1 %1175  ;;  %v1174_v33 = vpop.permute.xlu0 %1173 }
 0x9b6   : > { %v1186_v34 = vsel %vm5122_vm8, %v1184_v30, %v1176_v32  ;;  %v1185_v35 = vsel %vm5123_vm10, %v1183_v31, %v1174_v33  ;;  %vm5136_vm8 = vmmov %vm5133_vm1 }
 0x9b7   : > { %v1190_v36 = vmul.f32 0.24420135, %v1186_v34  ;;  %v1189_v38 = vmul.f32 0.24420135, %v1185_v35  ;;  %v1202_v41 = vmul.f32 0.40261996, %v1186_v34  ;;  %vm5137_vm10 = vmmov %vm5133_vm1 }
 0x9b8   : > { %v1201_v43 = vmul.f32 0.40261996, %v1185_v35  ;;  %v1188_v44 = vmul.f32 0.054488685, %v1186_v34  ;;  %v1187_v45 = vmul.f32 0.054488685, %v1185_v35 }
 0x9b9   : > { %1195 = vrot.lane.b32.xlu1 %v1190_v36, %s3459_s30  ;;  %1193 = vrot.lane.b32.xlu0 %v1189_v38, %s3459_s30 }
 0x9bd   : > { %1207 = vrot.lane.b32.xlu1 %v1202_v41, %s3456_s16  ;;  %1205 = vrot.lane.b32.xlu0 %v1201_v43, %s3456_s16 }
 0x9c1   : > { %1215 = vrot.lane.b32.xlu1 %v1190_v36, %s3460_s4  ;;  %1213 = vrot.lane.b32.xlu0 %v1189_v38, %s3460_s4 }
 0x9c5   : > { %1225 = vrot.lane.b32.xlu1 %v1188_v44, %s3461_s25  ;;  %1223 = vrot.lane.b32.xlu0 %v1187_v45, %s3461_s25 }
 0xa2b   : > { %v1196_v46 = vpop.permute.xlu1 %1195  ;;  %v1194_v47 = vpop.permute.xlu0 %1193 }
 0xa2c   : > { %v1200_v50 = vadd.f32 %v1196_v46, %v1188_v44  ;;  %v1199_v51 = vadd.f32 %v1194_v47, %v1187_v45 }
 0xa2f   : > { %v1208_v48 = vpop.permute.xlu1 %1207  ;;  %v1206_v49 = vpop.permute.xlu0 %1205 }
 0xa30   : > { %v1212_v54 = vadd.f32 %v1208_v48, %v1200_v50  ;;  %v1211_v21 = vadd.f32 %v1206_v49, %v1199_v51 }
 0xa33   : > { %v1216_v52 = vpop.permute.xlu1 %1215  ;;  %v1214_v53 = vpop.permute.xlu0 %1213 }
 0xa34   : > { %v1220_v18 = vadd.f32 %v1216_v52, %v1212_v54  ;;  %v1219_v55 = vadd.f32 %v1214_v53, %v1211_v21 }
 0xa37   : > { %v1226_v20 = vpop.permute.xlu1 %1225  ;;  %v1224_v16 = vpop.permute.xlu0 %1223 }
 0xa38   : > { %v1230_v56 = vadd.f32 %v1226_v20, %v1220_v18  ;;  %v1229_v57 = vadd.f32 %v1224_v16, %v1219_v55 }
 0xa3a   : > { %v1234_v58 = vrot.slane %v1230_v56, 7  ;;  %v1239_v61 = vrot.slane %v1230_v56, 6  ;;  %v1233_v29 = vrot.slane %v1229_v57, 7 }
 0xa3c   : > { %v1242_v17 = vsel %vm5124_vm5, %v1234_v58, %v1239_v61  ;;  %v1235_v62 = vsel %vm5125_vm6, %v1233_v29, %v1234_v58  ;;  %v1241_v63 = vsel %vm5126_vm12, %v1229_v57, %v1233_v29  ;;  %vm5138_vm5 = vmmov %vm5135_vm0 }
 0xa3d   : > { %v1245_v0 = vmul.f32 2.0, %v1242_v17  ;;  %v1243_v1 = vmul.f32 2.0, %v1241_v63  ;;  %v1269_v37 = vrot.slane %v1241_v63, 6  ;;  %v1270_v2 = vrot.slane %v1235_v62, 6  ;;  %vm5139_vm6 = vmmov %vm5133_vm1 }
 0xa3e   : > { %v1244_v39 = vmul.f32 2.0, %v1235_v62  ;;  %v1263_v13 = vrot.slane %v1242_v17, 2  ;;  %v1261_v14 = vrot.slane %v1235_v62, 2  ;;  %v1260_v15 = vrot.slane %v1241_v63, 2  ;;  %vm5140_vm12 = vmmov %vm5135_vm0 }
 0xa3f   : > { %v1275_v3 = vsub.f32 %v1241_v63, %v1269_v37  ;;  %v1252_v4 = vrot.slane %v1245_v0, 1  ;;  %v1271_v5 = vsel %vm5127_vm15, %v1269_v37, %v1270_v2  ;;  %v1249_v7 = vrot.slane %v1243_v1, 1  ;;  %vm5141_vm15 = vmmov %vm5133_vm1 }
 0xa40   : > { %v1250_v6 = vrot.slane %v1244_v39, 1  ;;  %v1277_v8 = vsub.f32 %v1242_v17, %v1270_v2  ;;  %v1276_v9 = vsub.f32 %v1235_v62, %v1271_v5  ;;  %v1264_v22 = vsel %vm5130_vm7, %v1261_v14, %v1263_v13 }
 0xa41   : > { %1308 = vrot.lane.b32.xlu1 %v1275_v3, %s3455_s18  ;;  %1299 = vrot.lane.b32.xlu0 %v1275_v3, %s3462_s27  ;;  %v1262_v23 = vsel %vm5131_vm2, %v1260_v15, %v1261_v14 }
 0xa42   : > { %v1253_v10 = vsel %vm5128_vm4, %v1250_v6, %v1252_v4  ;;  %v1251_v11 = vsel %vm5129_vm11, %v1249_v7, %v1250_v6  ;;  %vm5142_vm4 = vmmov %vm5131_vm2 }
 0xa43   : > { %v1257_v19 = vadd.f32 %v1253_v10, %v1235_v62  ;;  %v1256_v60 = vadd.f32 %v1251_v11, %v1241_v63  ;;  %vm5143_vm11 = vmmov %vm5131_vm2 }
 0xa45   : > { %1303 = vrot.lane.b32.xlu0 %v1277_v8, %s3462_s27  ;;  %1301 = vrot.lane.b32.xlu1 %v1276_v9, %s3462_s27  ;;  %v1268_v42 = vadd.f32 %v1264_v22, %v1257_v19  ;;  %v1267_v24 = vadd.f32 %v1262_v23, %v1256_v60 }
 0xa49   : > { %1310 = vrot.lane.b32.xlu0 %v1276_v9, %s3455_s18  ;;  %1312 = vrot.lane.b32.xlu1 %v1277_v8, %s3455_s18 }
 0xa4d   : > { %1282 = vrot.lane.b32.xlu1 %v1268_v42, %s3462_s27  ;;  %1280 = vrot.lane.b32.xlu0 %v1267_v24, %s3462_s27 }
 0xab3   : > { %v1309_v59 = vpop.permute.xlu1 %1308  ;;  %v1300_v25 = vpop.permute.xlu0 %1299 }
 0xab4   : > { %v1317_v26 = vsel %vm5132_vm3, %v1275_v3, %v1300_v25 }
 0xab5   : > { %v1320_v40 = vsel %vm5133_vm1, %v1317_v26, %v1309_v59 }
 0xab6   : > { %1354 = vrot.lane.b32.xlu1 %v1320_v40, %s3456_s16  ;;  %v1333_v38 = vmul.f32 2.0, %v1320_v40 }
 0xab7   : > { %v1304_v27 = vpop.permute.xlu0 %1303  ;;  %v1302_v28 = vpop.permute.xlu1 %1301 }
 0xab8   : > { %v1319_v30 = vsel %vm5134_vm13, %v1277_v8, %v1304_v27  ;;  %v1318_v31 = vsel %vm5135_vm0, %v1276_v9, %v1302_v28  ;;  %vm5144_vm13 = vcmask 1040384  }
 0xab9   : > { %vm5145_vm0 = vmmov %vm5144_vm13 }
 0xabb   : > { %v1311_v32 = vpop.permute.xlu0 %1310  ;;  %v1313_v33 = vpop.permute.xlu1 %1312 }
 0xabc   : > { %v1321_v34 = vsel %vm5136_vm8, %v1318_v31, %v1311_v32  ;;  %v1322_v35 = vsel %vm5137_vm10, %v1319_v30, %v1313_v33  ;;  %vm5146_vm8 = vmmov %vm5145_vm0 }
 0xabd   : > { %1358 = vrot.lane.b32.xlu1 %v1322_v35, %s3456_s16  ;;  %1356 = vrot.lane.b32.xlu0 %v1321_v34, %s3456_s16  ;;  %v1334_v36 = vmul.f32 2.0, %v1321_v34  ;;  %v1335_v41 = vmul.f32 2.0, %v1322_v35  ;;  %vm5147_vm10 = vmmov %vm5138_vm5 }
 0xabf   : > { %v1283_v43 = vpop.permute.xlu1 %1282  ;;  %v1281_v44 = vpop.permute.xlu0 %1280 }
 0xac0   : > { %v1293_v54 = vsel %vm5138_vm5, %v1268_v42, %v1283_v43  ;;  %v1292_v58 = vsel %vm5140_vm12, %v1267_v24, %v1281_v44  ;;  %vm5148_vm12 = vmmov %vm5139_vm6 }
 0xac1   : > { %1341 = vrot.lane.b32.xlu1 %v1334_v36, %s3459_s30  ;;  %1339 = vrot.lane.b32.xlu0 %v1333_v38, %s3459_s30 }
 0xac5   : > { %1288 = vrot.lane.b32.xlu1 %v1268_v42, %s3455_s18  ;;  %1343 = vrot.lane.b32.xlu0 %v1335_v41, %s3459_s30 }
 0xac9   : > { %1286 = vrot.lane.b32.xlu0 %v1267_v24, %s3455_s18 }
 0xb28   : > { %v1355_v45 = vpop.permute.xlu1 %1354 }
 0xb2f   : > { %v1359_v46 = vpop.permute.xlu1 %1358  ;;  %v1357_v47 = vpop.permute.xlu0 %1356 }
 0xb33   : > { %v1342_v48 = vpop.permute.xlu1 %1341  ;;  %v1340_v49 = vpop.permute.xlu0 %1339 }
 0xb34   : > { %v1349_v50 = vadd.f32 %v1342_v48, %v1321_v34  ;;  %v1348_v51 = vadd.f32 %v1340_v49, %v1320_v40 }
 0xb36   : > { %v4085_v52 = vadd.f32 %v1357_v47, %v1349_v50  ;;  %v4087_v53 = vadd.f32 %v1355_v45, %v1348_v51 }
 0xb37   : > { %v1289_v21 = vpop.permute.xlu1 %1288  ;;  %v1344_v18 = vpop.permute.xlu0 %1343 }
 0xb38   : > { %v1350_v55 = vadd.f32 %v1344_v18, %v1322_v35  ;;  %v1295_v20 = vsel %vm5139_vm6, %v1293_v54, %v1289_v21  ;;  %v1369_v16 = vmul.f32 %v4085_v52, %v4085_v52  ;;  %v1368_v56 = vmul.f32 %v4087_v53, %v4087_v53 }
 0xb39   : > { %1327 = vrot.lane.b32.xlu1 %v1295_v20, %s3455_s18  ;;  %v1438_v49 = vand.u32 2147483647, %v4085_v52  ;;  %v1437_v51 = vand.u32 2147483647, %v4087_v53 }
 0xb3a   : > { %v4096_v57 = vadd.f32 %v1359_v46, %v1350_v55  ;;  %v1375_v62 = vrot.slane %v1369_v16, 2  ;;  %v1374_v63 = vrot.slane %v1368_v56, 2 }
 0xb3b   : > { %v1287_v61 = vpop.permute.xlu0 %1286  ;;  %v1460_v21 = vmul.f32 0.41421357, %v1438_v49  ;;  %v1459_v55 = vmul.f32 0.41421357, %v1437_v51 }
 0xb3c   : > { %v1294_v29 = vsel %vm5141_vm15, %v1292_v58, %v1287_v61  ;;  %v1370_v17 = vmul.f32 %v4096_v57, %v4096_v57  ;;  %v1376_v37 = vsel %vm5143_vm11, %v1374_v63, %v1375_v62  ;;  %vm5149_vm15 = vmmov %vm5138_vm5  ;;  %v1439_v50 = vand.u32 2147483647, %v4096_v57 }
 0xb3d   : > { %1325 = vrot.lane.b32.xlu0 %v1294_v29, %s3455_s18  ;;  %vm5151_vm11 = vcmask 1041408   ;;  %v1465_v56 = vrot.slane %v1459_v55, 2 }
 0xb3e   : > { %v1377_v0 = vrot.slane %v1370_v17, 2  ;;  %v1461_v18 = vmul.f32 0.41421357, %v1439_v50 }
 0xb40   : > { %v1378_v1 = vsel %vm5142_vm4, %v1375_v62, %v1377_v0  ;;  %vm5150_vm4 = vmmov %vm5139_vm6  ;;  %v1468_v16 = vrot.slane %v1461_v18, 2 }
 0xb41   : > { %1381 = vrot.lane.b32.xlu1 %v1378_v1, %s3455_s18  ;;  %1379 = vrot.lane.b32.xlu0 %v1376_v37, %s3455_s18 }
 0xbab   : > { %v1328_v2 = vpop.permute.xlu1 %1327 }
 0xbac   : > { %v4107_v39 = vsub.f32 %v1295_v20, %v1328_v2  ;;  %v1466_v20 = vrot.slane %v1460_v21, 2 }
 0xbae   : > { %v1367_v5 = vmul.f32 %v4107_v39, %v4107_v39 }
 0xbaf   : > { %v1326_v3 = vpop.permute.xlu0 %1325 }
 0xbb0   : > { %v4109_v4 = vsub.f32 %v1294_v29, %v1326_v3 }
 0xbb2   : > { %v1366_v6 = vmul.f32 %v4109_v4, %v4109_v4 }
 0xbb3   : > { %v1382_v7 = vpop.permute.xlu1 %1381  ;;  %v1380_v8 = vpop.permute.xlu0 %1379 }
 0xbb4   : > { %v1386_v9 = vadd.f32 %v1382_v7, %v1367_v5  ;;  %v1385_v10 = vadd.f32 %v1380_v8, %v1366_v6 }
 0xbb6   : > { %v1388_v11 = vadd.f32 1e-06, %v1386_v9  ;;  %v1387_v13 = vadd.f32 1e-06, %v1385_v10 }
 0xbb8   : > { %3326 = vrsqrt.f32 %v1388_v11  ;;  %vm1398_vm7 = vcmp.eq.f32.partialorder %v1388_v11, inf  ;;  %v1401_v22 = vand.u32 2147483648, %v1388_v11  ;;  %vm1391_vm2 = vcmp.eq.f32.partialorder %v1387_v13, inf }
 0xbb9   : > { %3328 = vrsqrt.f32 %v1387_v13  ;;  %v1394_v23 = vand.u32 2147483648, %v1387_v13  ;;  %vm1400_vm3 = vcmp.eq.f32.partialorder %v1388_v11, 0.0  ;;  %vm1393_vm1 = vcmp.eq.f32.partialorder %v1387_v13, 0.0 }
 0xbc5   : > { %v3327_v14 = vpop.eup %3326 }
 0xbc6   : > { %v3329_v15 = vpop.eup %3328  ;;  %v1397_v19 = vmul.f32 %v3327_v14, %v1388_v11 }
 0xbc7   : > { %v1390_v60 = vmul.f32 %v3329_v15, %v1387_v13 }
 0xbc8   : > { %v1399_v42 = vsel %vm1398_vm7, %v1388_v11, %v1397_v19  ;;  %vm1480_vm7 = vcmp.gt.f32.partialorder %v4087_v53, 0.0 }
 0xbc9   : > { %v1392_v24 = vsel %vm1391_vm2, %v1387_v13, %v1390_v60  ;;  %v4115_v59 = vsel %vm1400_vm3, %v1401_v22, %v1399_v42  ;;  %vm1481_vm2 = vcmp.gt.f32.partialorder %v4085_v52, 0.0  ;;  %vm1482_vm3 = vcmp.gt.f32.partialorder %v4096_v57, 0.0 }
 0xbca   : > { %v4117_v25 = vsel %vm1393_vm1, %v1394_v23, %v1392_v24  ;;  %v1406_v26 = vrot.slane %v4115_v59, 7  ;;  %vm5152_vm1 = vcmask 1045504  }
 0xbcb   : > { %v1405_v40 = vrot.slane %v4117_v25, 7  ;;  %v1469_v29 = vsel %vm5152_vm1, %v1466_v20, %v1468_v16 }
 0xbcd   : > { %1408 = vrot.lane.b32.xlu0 %v1405_v40, %s3456_s16  ;;  %v1407_v27 = vsel %vm5144_vm13, %v1405_v40, %v1406_v26  ;;  %vm5153_vm13 = vmmov %vm5152_vm1 }
 0xbce   : > { %1410 = vrot.lane.b32.xlu1 %v1407_v27, %s3456_s16  ;;  %v1467_v17 = vsel %vm5153_vm13, %v1465_v56, %v1466_v20  ;;  %vm5163_vm13 = vmmov %vm5152_vm1 }
 0xbd1   : > { %1412 = vrot.lane.b32.xlu0 %v1406_v26, %s3456_s16 }
 0xc3f   : > { %v1409_v28 = vpop.permute.xlu0 %1408 }
 0xc40   : > { %v1411_v30 = vpop.permute.xlu1 %1410  ;;  %v1416_v31 = vsel %vm5145_vm0, 0.0, %v1409_v28  ;;  %vm5154_vm0 = vcmask 1046528  }
 0xc41   : > { %1420 = vrot.lane.b32.xlu1 %v1416_v31, %s3462_s27  ;;  %1422 = vrot.lane.b32.xlu0 %v1411_v30, %s3462_s27 }
 0xc43   : > { %v1413_v32 = vpop.permute.xlu0 %1412 }
 0xc44   : > { %v1417_v33 = vsel %vm5146_vm8, %v1413_v32, 0.0  ;;  %vm5155_vm8 = vmmov %vm5154_vm0 }
 0xc45   : > { %1424 = vrot.lane.b32.xlu1 %v1417_v33, %s3462_s27 }
 0xcb3   : > { %v1423_v34 = vpop.permute.xlu0 %1422  ;;  %v1421_v35 = vpop.permute.xlu1 %1420 }
 0xcb4   : > { %v1430_v36 = vsel %vm5147_vm10, 0.0, %v1423_v34  ;;  %v1429_v38 = vsel %vm5138_vm5, 0.0, %v1421_v35  ;;  %vm5156_vm10 = vmmov %vm5152_vm1 }
 0xcb5   : > { %v1433_v41 = vsel %vm5139_vm6, %v1430_v36, 0.0  ;;  %v1432_v43 = vsel %vm5148_vm12, %v1429_v38, 0.0  ;;  %vm5157_vm5 = vmmov %vm5152_vm1 }
 0xcb6   : > { %1488 = vrot.lane.b32.xlu1 %v1433_v41, %s3456_s16  ;;  %1486 = vrot.lane.b32.xlu0 %v1432_v43, %s3456_s16  ;;  %v1495_v47 = vrot.slane %v1432_v43, 6  ;;  %v1496_v48 = vrot.slane %v1433_v41, 6  ;;  %v1548_v58 = vrot.slane %v1432_v43, 1  ;;  %v1549_v61 = vrot.slane %v1433_v41, 1  ;;  %vm5158_vm6 = vmmov %vm5152_vm1 }
 0xcb7   : > { %v1425_v44 = vpop.permute.xlu1 %1424  ;;  %vm5159_vm12 = vmmov %vm5152_vm1 }
 0xcb8   : > { %v1431_v45 = vsel %vm5149_vm15, 0.0, %v1425_v44  ;;  %v1497_v54 = vsel %vm5151_vm11, %v1495_v47, %v1496_v48  ;;  %v1513_v63 = vsel %vm1480_vm7, %v1432_v43, %v1495_v47  ;;  %v4172_v37 = vsel %vm5154_vm0, %v1548_v58, %v1549_v61  ;;  %vm5164_vm0 = vmmov %vm5152_vm1 }
 0xcb9   : > { %v1434_v46 = vsel %vm5150_vm4, %v1431_v45, 0.0  ;;  %v1514_v0 = vsel %vm1481_vm2, %v1433_v41, %v1497_v54  ;;  %v1533_v2 = vrot.slane %v1513_v63, 2  ;;  %v1634_v7 = vsel %vm1480_vm7, %v1495_v47, %v1432_v43 }
 0xcba   : > { %1568 = vrot.lane.b32.xlu1 %v1433_v41, %s3459_s30  ;;  %1490 = vrot.lane.b32.xlu0 %v1434_v46, %s3456_s16  ;;  %v1551_v62 = vrot.slane %v1434_v46, 1  ;;  %v1515_v1 = vsel %vm1482_vm3, %v1434_v46, %v1496_v48  ;;  %v1534_v5 = vrot.slane %v1514_v0, 2  ;;  %v1635_v8 = vsel %vm1481_vm2, %v1497_v54, %v1433_v41 }
 0xcbb   : > { %v1536_v6 = vrot.slane %v1515_v1, 2  ;;  %v1636_v9 = vsel %vm1482_vm3, %v1496_v48, %v1434_v46  ;;  %v1643_v10 = vrot.slane %v1634_v7, 2  ;;  %v1644_v14 = vrot.slane %v1635_v8, 2 }
 0xcbc   : > { %v4175_v3 = vsel %vm5155_vm8, %v1549_v61, %v1551_v62  ;;  %v1535_v11 = vsel %vm5156_vm10, %v1533_v2, %v1534_v5  ;;  %v1646_v15 = vrot.slane %v1636_v9, 2  ;;  %vm1563_vm15 = vcmp.ge.f32.partialorder %v4087_v53, 0.0  ;;  %vm5165_vm8 = vmmov %vm5164_vm0 }
 0xcbd   : > { %v1537_v13 = vsel %vm5157_vm5, %v1534_v5, %v1536_v6  ;;  %v1645_v19 = vsel %vm5158_vm6, %v1643_v10, %v1644_v14  ;;  %vm1564_vm4 = vcmp.ge.f32.partialorder %v4085_v52, 0.0  ;;  %vm1565_vm11 = vcmp.ge.f32.partialorder %v4096_v57, 0.0  ;;  %vm5166_vm10 = vmmov %vm5164_vm0 }
 0xcbe   : > { %1498 = vrot.lane.b32.xlu1 %v1495_v47, %s3456_s16  ;;  %1566 = vrot.lane.b32.xlu0 %v1432_v43, %s3459_s30  ;;  %v1647_v60 = vsel %vm5159_vm12, %v1644_v14, %v1646_v15  ;;  %v1435_v2 = vand.u32 2147483647, %v4109_v4  ;;  %v1436_v14 = vand.u32 2147483647, %v4107_v39  ;;  %vm1547_vm5 = vcmp.ge.f32.partialorder %v4107_v39, 0.0 }
 0xcbf   : > { %vm1546_vm6 = vcmp.ge.f32.partialorder %v4109_v4, 0.0  ;;  %vm5167_vm12 = vcmask 1041408  }
 0xcc2   : > { %1502 = vrot.lane.b32.xlu1 %v1496_v48, %s3456_s16  ;;  %1570 = vrot.lane.b32.xlu0 %v1434_v46, %s3459_s30 }
 0xcc6   : > { %1575 = vrot.lane.b32.xlu1 %v1495_v47, %s3459_s30  ;;  %1500 = vrot.lane.b32.xlu0 %v1497_v54, %s3456_s16 }
 0xcca   : > { %1579 = vrot.lane.b32.xlu1 %v1496_v48, %s3459_s30  ;;  %1577 = vrot.lane.b32.xlu0 %v1497_v54, %s3459_s30 }
 0xcce   : > { %1472 = vrot.lane.b32.xlu1 %v1469_v29, %s3455_s18  ;;  %1470 = vrot.lane.b32.xlu0 %v1467_v17, %s3455_s18 }
 0xcd2   : > { %1555 = vrot.lane.b32.xlu0 %v4172_v37, %s3455_s18  ;;  %1557 = vrot.lane.b32.xlu1 %v4175_v3, %s3455_s18 }
 0xcd6   : > { %1538 = vrot.lane.b32.xlu0 %v1535_v11, %s3455_s18  ;;  %1540 = vrot.lane.b32.xlu1 %v1537_v13, %s3455_s18 }
 0xcda   : > { %1648 = vrot.lane.b32.xlu0 %v1645_v19, %s3455_s18  ;;  %1650 = vrot.lane.b32.xlu1 %v1647_v60, %s3455_s18  ;;  %v1440_v60 = vmul.f32 0.41421357, %v1435_v2 }
 0xd28   : > { %v1487_v22 = vpop.permute.xlu0 %1486  ;;  %v1489_v23 = vpop.permute.xlu1 %1488 }
 0xd2c   : > { %v1491_v42 = vpop.permute.xlu0 %1490  ;;  %v1569_v24 = vpop.permute.xlu1 %1568 }
 0xd30   : > { %v1567_v26 = vpop.permute.xlu0 %1566  ;;  %v1499_v40 = vpop.permute.xlu1 %1498 }
 0xd31   : > { %v1507_v30 = vsel %vm1480_vm7, %v1487_v22, %v1499_v40  ;;  %v1637_v32 = vsel %vm1480_vm7, %v1499_v40, %v1487_v22  ;;  %vm5160_vm7 = vmmov %vm5152_vm1 }
 0xd32   : > { %v1519_v43 = vrot.slane %v1507_v30, 2  ;;  %v1657_v46 = vrot.slane %v1637_v32, 2  ;;  %v1441_v30 = vmul.f32 0.41421357, %v1436_v14 }
 0xd34   : > { %v1571_v27 = vpop.permute.xlu0 %1570  ;;  %v1503_v28 = vpop.permute.xlu1 %1502 }
 0xd35   : > { %v1509_v31 = vsel %vm1482_vm3, %v1491_v42, %v1503_v28  ;;  %v1639_v47 = vsel %vm1482_vm3, %v1503_v28, %v1491_v42  ;;  %vm5162_vm3 = vmmov %vm5152_vm1 }
 0xd36   : > { %v1522_v44 = vrot.slane %v1509_v31, 2  ;;  %v1660_v1 = vrot.slane %v1639_v47, 2 }
 0xd38   : > { %v1501_v33 = vpop.permute.xlu0 %1500  ;;  %v1576_v34 = vpop.permute.xlu1 %1575 }
 0xd39   : > { %v1508_v35 = vsel %vm1481_vm2, %v1489_v23, %v1501_v33  ;;  %v1638_v36 = vsel %vm1481_vm2, %v1501_v33, %v1489_v23  ;;  %v1584_v38 = vsel %vm1563_vm15, %v1567_v26, %v1576_v34  ;;  %v1672_v41 = vsel %vm1563_vm15, %v1576_v34, %v1567_v26  ;;  %vm5161_vm2 = vmmov %vm5152_vm1 }
 0xd3a   : > { %v1520_v45 = vrot.slane %v1508_v35, 2  ;;  %v1658_v48 = vrot.slane %v1638_v36, 2  ;;  %v1590_v54 = vrot.slane %v1584_v38, 2  ;;  %v1678_v21 = vrot.slane %v1672_v41, 2  ;;  %vm5168_vm15 = vmmov %vm5167_vm12 }
 0xd3b   : > { %v1444_v33 = vrot.slane %v1440_v60, 6  ;;  %v1445_v34 = vrot.slane %v1441_v30, 6 }
 0xd3c   : > { %v1578_v18 = vpop.permute.xlu0 %1577  ;;  %v1580_v55 = vpop.permute.xlu1 %1579  ;;  %v1521_v20 = vsel %vm5160_vm7, %v1519_v43, %v1520_v45  ;;  %v1523_v16 = vsel %vm5161_vm2, %v1520_v45, %v1522_v44  ;;  %v1659_v5 = vsel %vm5162_vm3, %v1657_v46, %v1658_v48  ;;  %v1661_v13 = vsel %vm5166_vm10, %v1658_v48, %v1660_v1 }
 0xd3d   : > { %v1585_v56 = vsel %vm1564_vm4, %v1569_v24, %v1578_v18  ;;  %v1673_v58 = vsel %vm1564_vm4, %v1578_v18, %v1569_v24  ;;  %v1586_v61 = vsel %vm1565_vm11, %v1571_v27, %v1580_v55  ;;  %v1674_v29 = vsel %vm1565_vm11, %v1580_v55, %v1571_v27  ;;  %1524 = vrot.lane.b32.xlu0 %v1521_v20, %s3455_s18  ;;  %vm5169_vm4 = vmmov %vm5167_vm12 }
 0xd3e   : > { %v1591_v17 = vrot.slane %v1585_v56, 2  ;;  %v1679_v62 = vrot.slane %v1673_v58, 2  ;;  %v1593_v63 = vrot.slane %v1586_v61, 2  ;;  %v1681_v0 = vrot.slane %v1674_v29, 2  ;;  %1526 = vrot.lane.b32.xlu1 %v1523_v16, %s3455_s18 }
 0xd3f   : > { %vm1478_vm11 = vcmp.gt.f32.partialorder %v4109_v4, 0.0  ;;  %vm1479_vm2 = vcmp.gt.f32.partialorder %v4107_v39, 0.0 }
 0xd40   : > { %v1471_v6 = vpop.permute.xlu0 %1470  ;;  %v1473_v7 = vpop.permute.xlu1 %1472  ;;  %v1592_v8 = vsel %vm5152_vm1, %v1590_v54, %v1591_v17  ;;  %v1594_v9 = vsel %vm5163_vm13, %v1591_v17, %v1593_v63  ;;  %v1680_v10 = vsel %vm5164_vm0, %v1678_v21, %v1679_v62  ;;  %v1682_v11 = vsel %vm5165_vm8, %v1679_v62, %v1681_v0  ;;  %vm5174_vm1 = vmmov %vm5169_vm4 }
 0xd41   : > { %1662 = vrot.lane.b32.xlu0 %v1659_v5, %s3455_s18  ;;  %vm4247_vm7 = vcmp.le.f32.partialorder %v1435_v2, %v1471_v6  ;;  %vm4252_vm3 = vcmp.le.f32.partialorder %v1436_v14, %v1473_v7  ;;  %vm5175_vm13 = vmmov %vm5174_vm1 }
 0xd42   : > { %1664 = vrot.lane.b32.xlu1 %v1661_v13, %s3455_s18 }
 0xd44   : > { %v1556_v15 = vpop.permute.xlu0 %1555  ;;  %v1558_v19 = vpop.permute.xlu1 %1557 }
 0xd45   : > { %v1671_v22 = vsel %vm1547_vm5, %v1558_v19, %v4175_v3  ;;  %1595 = vrot.lane.b32.xlu0 %v1592_v8, %s3455_s18  ;;  %v1561_v23 = vsel %vm1546_vm6, %v4172_v37, %v1556_v15  ;;  %v1562_v42 = vsel %vm1547_vm5, %v4175_v3, %v1558_v19  ;;  %v1670_v24 = vsel %vm1546_vm6, %v1556_v15, %v4172_v37 }
 0xd46   : > { %v1694_v26 = vrot.slane %v1671_v22, 6  ;;  %1597 = vrot.lane.b32.xlu1 %v1594_v9, %s3455_s18  ;;  %v1605_v40 = vrot.slane %v1561_v23, 6  ;;  %v1606_v27 = vrot.slane %v1562_v42, 6  ;;  %v1693_v28 = vrot.slane %v1670_v24, 6 }
 0xd47   : > { %v1446_v37 = vsel %vm5169_vm4, %v1444_v33, %v1445_v34  ;;  %vm5182_vm5 = vcmask 1045504  }
 0xd48   : > { %v1607_v31 = vsel %vm5167_vm12, %v1605_v40, %v1606_v27  ;;  %v1695_v32 = vsel %vm5168_vm15, %v1693_v28, %v1694_v26  ;;  %v1539_v3 = vpop.permute.xlu0 %1538  ;;  %v1541_v35 = vpop.permute.xlu1 %1540  ;;  %vm5183_vm6 = vmmov %vm5182_vm5 }
 0xd49   : > { %1683 = vrot.lane.b32.xlu0 %v1680_v10, %s3455_s18  ;;  %vm5184_vm12 = vmmov %vm5182_vm5 }
 0xd4a   : > { %1685 = vrot.lane.b32.xlu1 %v1682_v11, %s3455_s18  ;;  %vm5185_vm15 = vmmov %vm5182_vm5 }
 0xd4c   : > { %v1649_v36 = vpop.permute.xlu0 %1648  ;;  %v1651_v38 = vpop.permute.xlu1 %1650 }
 0xd4d   : > { %1447 = vrot.lane.b32.xlu0 %v1444_v33, %s3456_s16 }
 0xd4e   : > { %1449 = vrot.lane.b32.xlu1 %v1446_v37, %s3456_s16 }
 0xd51   : > { %1451 = vrot.lane.b32.xlu0 %v1445_v34, %s3456_s16 }
 0xd52   : > { %1608 = vrot.lane.b32.xlu1 %v1605_v40, %s3456_s16 }
 0xd55   : > { %1610 = vrot.lane.b32.xlu0 %v1607_v31, %s3456_s16 }
 0xd56   : > { %1612 = vrot.lane.b32.xlu1 %v1606_v27, %s3456_s16 }
 0xd59   : > { %1698 = vrot.lane.b32.xlu0 %v1695_v32, %s3456_s16 }
 0xd5a   : > { %1696 = vrot.lane.b32.xlu1 %v1693_v28, %s3456_s16 }
 0xd5e   : > { %1700 = vrot.lane.b32.xlu1 %v1694_v26, %s3456_s16 }
 0xdaf   : > { %v1525_v41 = vpop.permute.xlu0 %1524 }
 0xdb0   : > { %v1527_v43 = vpop.permute.xlu1 %1526  ;;  %v1544_v47 = vsel %vm1478_vm11, %v1525_v41, %v1539_v3 }
 0xdb1   : > { %v1545_v21 = vsel %vm1479_vm2, %v1527_v43, %v1541_v35 }
 0xdb3   : > { %v1663_v44 = vpop.permute.xlu0 %1662 }
 0xdb4   : > { %v1665_v45 = vpop.permute.xlu1 %1664  ;;  %v1668_v56 = vsel %vm1478_vm11, %v1649_v36, %v1663_v44 }
 0xdb5   : > { %v1669_v39 = vsel %vm1479_vm2, %v1651_v38, %v1665_v45 }
 0xdb7   : > { %v1596_v48 = vpop.permute.xlu0 %1595 }
 0xdb8   : > { %v1598_v18 = vpop.permute.xlu1 %1597  ;;  %v1601_v55 = vsel %vm4247_vm7, %v1596_v48, %v1544_v47 }
 0xdb9   : > { %v1602_v4 = vsel %vm4252_vm3, %v1598_v18, %v1545_v21  ;;  %v1619_v20 = vrot.slane %v1601_v55, 6 }
 0xdba   : > { %v1620_v16 = vrot.slane %v1602_v4, 6 }
 0xdbb   : > { %v1684_v58 = vpop.permute.xlu0 %1683  ;;  %1622 = vrot.lane.b32.xlu0 %v1619_v20, %s3456_s16 }
 0xdbc   : > { %v1689_v61 = vsel %vm4247_vm7, %v1684_v58, %v1668_v56  ;;  %v1686_v29 = vpop.permute.xlu1 %1685  ;;  %v1621_v17 = vsel %vm5174_vm1, %v1619_v20, %v1620_v16  ;;  %v4321_v56 = vld [vmem:[#allocation2 + $0x9] sm:$0xff]  ;;  %v4323_v58 = vld [vmem:[#allocation2 + $0x1] sm:$0xff] }
 0xdbd   : > { %v1707_v62 = vrot.slane %v1689_v61, 6  ;;  %v1690_v63 = vsel %vm4252_vm3, %v1686_v29, %v1669_v39  ;;  %1624 = vrot.lane.b32.xlu1 %v1621_v17, %s3456_s16 }
 0xdbe   : > { %v1708_v0 = vrot.slane %v1690_v63, 6 }
 0xdbf   : > { %1626 = vrot.lane.b32.xlu0 %v1620_v16, %s3456_s16  ;;  %v1448_v5 = vpop.permute.xlu0 %1447 }
 0xdc0   : > { %v1709_v1 = vsel %vm5175_vm13, %v1707_v62, %v1708_v0  ;;  %v1450_v2 = vpop.permute.xlu1 %1449  ;;  %vm4274_vm0 = vcmp.le.f32.partialorder %v1437_v51, %v1448_v5 }
 0xdc1   : > { %1712 = vrot.lane.b32.xlu1 %v1709_v1, %s3456_s16  ;;  %vm4282_vm8 = vcmp.le.f32.partialorder %v1438_v49, %v1450_v2 }
 0xdc3   : > { %1710 = vrot.lane.b32.xlu0 %v1707_v62, %s3456_s16  ;;  %v1452_v7 = vpop.permute.xlu0 %1451 }
 0xdc4   : > { %v1609_v6 = vpop.permute.xlu1 %1608  ;;  %vm4290_vm10 = vcmp.le.f32.partialorder %v1439_v50, %v1452_v7 }
 0xdc7   : > { %1714 = vrot.lane.b32.xlu0 %v1708_v0, %s3456_s16  ;;  %v1611_v9 = vpop.permute.xlu0 %1610 }
 0xdc8   : > { %v1613_v8 = vpop.permute.xlu1 %1612 }
 0xdcb   : > { %v1699_v11 = vpop.permute.xlu0 %1698 }
 0xdcc   : > { %v1697_v10 = vpop.permute.xlu1 %1696 }
 0xdd0   : > { %v1701_v13 = vpop.permute.xlu1 %1700 }
 0xe2d   : > { %v1623_v15 = vpop.permute.xlu0 %1622 }
 0xe2e   : > { %v1631_v19 = vsel %vm4274_vm0, %v1609_v6, %v1623_v15 }
 0xe2f   : > { %v1725_v22 = vrot.slane %v1631_v19, 2  ;;  %v1625_v23 = vpop.permute.xlu1 %1624 }
 0xe30   : > { %v1632_v42 = vsel %vm4282_vm8, %v1611_v9, %v1625_v23 }
 0xe31   : > { %v1726_v51 = vrot.slane %v1632_v42, 2  ;;  %v1627_v24 = vpop.permute.xlu0 %1626 }
 0xe32   : > { %v1633_v52 = vsel %vm4290_vm10, %v1613_v8, %v1627_v24 }
 0xe33   : > { %v1728_v49 = vrot.slane %v1633_v52, 2  ;;  %v1713_v26 = vpop.permute.xlu1 %1712  ;;  %v1727_v40 = vsel %vm5182_vm5, %v1725_v22, %v1726_v51  ;;  %vm5186_vm5 = vcmask 1040384  }
 0xe34   : > { %v1720_v27 = vsel %vm4282_vm8, %v1699_v11, %v1713_v26  ;;  %1730 = vrot.lane.b32.xlu1 %v1727_v40, %s3455_s18 }
 0xe35   : > { %v1711_v28 = vpop.permute.xlu0 %1710  ;;  %v1729_v57 = vsel %vm5183_vm6, %v1726_v51, %v1728_v49  ;;  %v1744_v30 = vrot.slane %v1720_v27, 2  ;;  %vm5187_vm6 = vmmov %vm5186_vm5 }
 0xe36   : > { %v1719_v50 = vsel %vm4274_vm0, %v1697_v10, %v1711_v28  ;;  %1732 = vrot.lane.b32.xlu0 %v1729_v57, %s3455_s18 }
 0xe37   : > { %v1743_v31 = vrot.slane %v1719_v50, 2 }
 0xe39   : > { %v1715_v32 = vpop.permute.xlu0 %1714  ;;  %v1745_v33 = vsel %vm5184_vm12, %v1743_v31, %v1744_v30  ;;  %vm5188_vm12 = vmmov %vm5186_vm5 }
 0xe3a   : > { %v1721_v34 = vsel %vm4290_vm10, %v1701_v13, %v1715_v32  ;;  %1748 = vrot.lane.b32.xlu1 %v1745_v33, %s3455_s18 }
 0xe3b   : > { %v1746_v37 = vrot.slane %v1721_v34, 2 }
 0xe3d   : > { %v1747_v3 = vsel %vm5185_vm15, %v1744_v30, %v1746_v37  ;;  %vm5189_vm15 = vcmask 7168  }
 0xe3e   : > { %1750 = vrot.lane.b32.xlu0 %v1747_v3, %s3455_s18 }
 0xea6   : > { %v1731_v35 = vpop.permute.xlu1 %1730 }
 0xea7   : > { %v1736_v36 = vsub.f32 %v4117_v25, %v1731_v35 }
 0xea8   : > { %v1733_v38 = vpop.permute.xlu0 %1732 }
 0xea9   : > { %vm1738_vm4 = vcmp.gt.f32.partialorder %v1736_v36, 0.0  ;;  %v1737_v44 = vsub.f32 %v4115_v59, %v1733_v38 }
 0xeab   : > { %vm1739_vm3 = vcmp.gt.f32.partialorder %v1737_v44, 0.0 }
 0xeac   : > { %v1749_v41 = vpop.permute.xlu1 %1748 }
 0xead   : > { %v1754_v43 = vsub.f32 %v4117_v25, %v1749_v41 }
 0xeaf   : > { %vm1756_vm11 = vcmp.gt.f32.partialorder %v1754_v43, 0.0 }
 0xeb0   : > { %vm1758_vm7 = vmand %vm1738_vm4, %vm1756_vm11  ;;  %v1751_v45 = vpop.permute.xlu0 %1750  ;;  %vm5190_vm4 = vcmask 138240   ;;  %vm5191_vm11 = vcmask 140288  }
 0xeb1   : > { %v1760_v46 = vsel %vm1758_vm7, %v4117_v25, 0.0  ;;  %v1755_v47 = vsub.f32 %v4115_v59, %v1751_v45  ;;  %vm5192_vm7 = vmmov %vm5189_vm15 }
 0xeb2   : > { %vm1762_vm2 = vcmp.gt.f32.partialorder %v1760_v46, 0.1  ;;  %vm1764_vm13 = vcmp.gt.f32.partialorder %v1760_v46, 0.2 }
 0xeb3   : > { %vm1757_vm1 = vcmp.gt.f32.partialorder %v1755_v47, 0.0  ;;  %v1766_v48 = vsel %vm1762_vm2, 0.5, %v3463_v12  ;;  %vm5193_vm2 = vmmov %vm5192_vm7 }
 0xeb4   : > { %vm1759_vm0 = vmand %vm1739_vm3, %vm1757_vm1  ;;  %v1768_v21 = vsel %vm1764_vm13, 1.0, %v1766_v48  ;;  %vm5196_vm13 = vcmask 146432  }
 0xeb5   : > { %v1761_v54 = vsel %vm1759_vm0, %v4115_v59, 0.0  ;;  %v1772_v4 = vrot.slane %v1768_v21, 7  ;;  %vm5194_vm3 = vmmov %vm5190_vm4 }
 0xeb6   : > { %vm1763_vm8 = vcmp.gt.f32.partialorder %v1761_v54, 0.1  ;;  %vm1765_vm10 = vcmp.gt.f32.partialorder %v1761_v54, 0.2  ;;  %vm5195_vm1 = vmmov %vm5194_vm3 }
 0xeb7   : > { %v1767_v18 = vsel %vm1763_vm8, 0.5, %v3463_v12  ;;  %vm5197_vm0 = vmmov %vm5196_vm13 }
 0xeb8   : > { %v1769_v55 = vsel %vm1765_vm10, 1.0, %v1767_v18 }
 0xeb9   : > { %v1773_v20 = vrot.slane %v1769_v55, 7 }
 0xebb   : > { %v1774_v25 = vsel %vm5186_vm5, %v1772_v4, %v1773_v20  ;;  %v3316_v16 = vpack.i.bf16 %v1773_v20, %v1772_v4 }
 0xebc   : > { %1777 = vrot.lane.b32.xlu0 %v1774_v25, %s3456_s16 }
 0xebd   : > { %3317 = vrot.lane.b32.xlu1 %v3316_v16, %s3456_s16 }
 0xf2e   : > { %v1778_v29 = vpop.permute.xlu0 %1777 }
 0xf2f   : > { %v3318_v59 = vpop.permute.xlu1 %3317 }
 0xf30   : > { %v3319_v39 = vunpack.i.l.bf16 %v3318_v59  ;;  %v3320_v61 = vunpack.i.h.bf16 %v3318_v59 }
 0xf32   : > { %v1783_v12 = vsel %vm5187_vm6, 0.0, %v3319_v39  ;;  %v1784_v17 = vsel %vm5188_vm12, %v3320_v61, 0.0 }
 0xf33   : > { %1791 = vrot.lane.b32.xlu0 %v1784_v17, %s3462_s27  ;;  %v3321_v62 = vpack.i.bf16 %v1778_v29, %v1783_v12 }
 0xf35   : > { %3322 = vrot.lane.b32.xlu1 %v3321_v62, %s3462_s27 }
 0xfa5   : > { %v1792_v63 = vpop.permute.xlu0 %1791 }
 0xfa6   : > { %v1798_v0 = vsel %vm5189_vm15, 0.0, %v1792_v63 }
 0xfa7   : > { %v1801_v1 = vsel %vm5190_vm4, %v1798_v0, 0.0  ;;  %v3323_v2 = vpop.permute.xlu1 %3322 }
 0xfa8   : > { %1804 = vst.msk [vmem:[#allocation2 + $0x10] sm:$0x3] %vm5191_vm11, %v1801_v1  ;;  %v3325_v5 = vunpack.i.h.bf16 %v3323_v2  ;;  %v3324_v6 = vunpack.i.l.bf16 %v3323_v2 }
 0xfaa   : > { %v1797_v7 = vsel %vm5192_vm7, 0.0, %v3325_v5  ;;  %v1796_v8 = vsel %vm5193_vm2, 0.0, %v3324_v6 }
 0xfab   : > { %v1800_v9 = vsel %vm5194_vm3, %v1797_v7, 0.0  ;;  %v1799_v10 = vsel %vm5195_vm1, %v1796_v8, 0.0 }
 0xfac   : > { %1802 = vst.msk [vmem:[#allocation2] sm:$0xff] %vm5196_vm13, %v1799_v10 }
 0xfad   : > { %1803 = vst.msk [vmem:[#allocation2 + $0x8] sm:$0xff] %vm5197_vm0, %v1800_v9 }
 0xfae LB: >> { %v3469_v14 = vmov 0   ;;  %s3470_s9 = smov 2   ;;  %s3471_s15 = smov 1   ;;  %v3473_v3 = vmov 0.0   ;;  %s3449_s8 = sphi %s4338_s8, %s1897_s8  }
 0xfaf   : >> { %s3472_s24 = smov 127   ;;  %s1897_s8 = sadd.s32 1, %s3449_s8  }
 0xfb0   : >> { %p1809_p10 = scmp.lt.s32.totalorder %s1897_s8, 256 }
 0xfb3   : >> { %v1854_v42 = vld [vmem:[#allocation2] sm:$0xff] }
 0xfb4   : >> { %v1820_v11 = vld [vmem:[#allocation2 + $0x2] sm:$0xff]  ;;  %v1821_v13 = vld [vmem:[#allocation2 + $0xa] sm:$0xff]  ;;  %vm5080_vm15 = vcmp.eq.f32.partialorder %v1854_v42, 1.0 }
 0xfb5   : >> { %vm1822_vm8 = vcmp.eq.f32.partialorder %v1820_v11, 1.0  ;;  %vm1823_vm10 = vcmp.eq.f32.partialorder %v1821_v13, 1.0  ;;  %v4345_v19 = vld [vmem:[#allocation2 + $0x9] sm:$0xff]  ;;  %v4347_v60 = vld [vmem:[#allocation2 + $0x1] sm:$0xff]  ;;  %v1858_v52 = vsel %vm5080_vm15, 1, %v3469_v14 }
 0xfb6   : >> { %v1826_v15 = vsel %vm1822_vm8, 1, %v3469_v14  ;;  %v1827_v22 = vsel %vm1823_vm10, 1, %v3469_v14  ;;  %vm5083_vm5 = vcmp.eq.f32.partialorder %v4345_v19, 1.0  ;;  %vm5082_vm6 = vcmp.eq.f32.partialorder %v4347_v60, 1.0  ;;  %v1855_v23 = vld [vmem:[#allocation2 + $0x8] sm:$0xff] }
 0xfb7   : >> { %1836 = vrot.lane.b32.xlu1 %v1826_v15, %s3470_s9  ;;  %1828 = vrot.lane.b32.xlu0 %v1826_v15, %s3471_s15  ;;  %v1845_v53 = vsel %vm5083_vm5, 1, %v3469_v14  ;;  %v1844_v51 = vsel %vm5082_vm6, 1, %v3469_v14  ;;  %vm5081_vm12 = vcmp.eq.f32.partialorder %v1855_v23, 1.0  ;;  %vm1824_vm4 = vmor %vm5082_vm6, %vm1822_vm8 }
 0xfb8   : >> { %v1859_v24 = vsel %vm5081_vm12, 1, %v3469_v14  ;;  %vm1825_vm7 = vmor %vm5083_vm5, %vm1823_vm10 }
 0xfbb   : >> { %1838 = vrot.lane.b32.xlu1 %v1827_v22, %s3470_s9  ;;  %1830 = vrot.lane.b32.xlu0 %v1827_v22, %s3471_s15 }
 0xfbf   : >> { %1848 = vrot.lane.b32.xlu1 %v1845_v53, %s3470_s9  ;;  %1846 = vrot.lane.b32.xlu0 %v1844_v51, %s3470_s9 }
 0xfc3   : >> { %1862 = vrot.lane.b32.xlu1 %v1859_v24, %s3470_s9  ;;  %1860 = vrot.lane.b32.xlu0 %v1858_v52, %s3470_s9 }
 0xfc7   : >> { %1870 = vrot.lane.b32.xlu1 %v1859_v24, %s3471_s15  ;;  %1868 = vrot.lane.b32.xlu0 %v1858_v52, %s3471_s15 }
0x1029   : >> { %v1837_v49 = vpop.permute.xlu1 %1836  ;;  %v1829_v26 = vpop.permute.xlu0 %1828 }
0x102a   : >> { %vm1832_vm11 = vcmp.ne.s32.totalorder %v1829_v26, 0  ;;  %vm1840_vm3 = vcmp.ne.s32.totalorder %v1837_v49, 0 }
0x102b   : >> { %vm1834_vm1 = vmor %vm1824_vm4, %vm1832_vm11 }
0x102c   : >> { %vm1842_vm14 = vmor %vm1834_vm1, %vm1840_vm3  ;;  %vm5198_vm3 = vcmp.eq.f32.partialorder %v1855_v23, 1.0 }
0x102d   : >> { %v1839_v40 = vpop.permute.xlu1 %1838  ;;  %v1831_v27 = vpop.permute.xlu0 %1830 }
0x102e   : >> { %vm1833_vm2 = vcmp.ne.s32.totalorder %v1831_v27, 0  ;;  %vm1841_vm13 = vcmp.ne.s32.totalorder %v1839_v40, 0 }
0x102f   : >> { %vm1835_vm0 = vmor %vm1825_vm7, %vm1833_vm2 }
0x1030   : >> { %vm1843_vm12 = vmor %vm1835_vm0, %vm1841_vm13 }
0x1031   : >> { %v1849_v28 = vpop.permute.xlu1 %1848  ;;  %v1847_v57 = vpop.permute.xlu0 %1846 }
0x1032   : >> { %vm1851_vm9 = vcmp.ne.s32.totalorder %v1849_v28, 0  ;;  %vm1850_vm15 = vcmp.ne.s32.totalorder %v1847_v57, 0 }
0x1033   : >> { %vm1853_vm8 = vmor %vm1843_vm12, %vm1851_vm9  ;;  %vm5199_vm9 = vcmp.eq.f32.partialorder %v1854_v42, 1.0 }
0x1034   : >> { %vm1852_vm10 = vmor %vm1842_vm14, %vm1850_vm15  ;;  %vm1817_vm14 = vcmp.eq.f32.partialorder %v4345_v19, 0.5 }
0x1035   : >> { %v1863_v50 = vpop.permute.xlu1 %1862  ;;  %v1861_v30 = vpop.permute.xlu0 %1860  ;;  %v1891_v35 = vsel %vm1817_vm14, 0.5, %v3473_v3 }
0x1036   : >> { %vm1865_vm6 = vcmp.ne.s32.totalorder %v1863_v50, 0  ;;  %vm1864_vm5 = vcmp.ne.s32.totalorder %v1861_v30, 0 }
0x1037   : >> { %vm1867_vm4 = vmor %vm1853_vm8, %vm1865_vm6  ;;  %vm5200_vm8 = vcmp.eq.f32.partialorder %v4345_v19, 1.0 }
0x1038   : >> { %vm1866_vm11 = vmor %vm1852_vm10, %vm1864_vm5  ;;  %vm1816_vm5 = vcmp.eq.f32.partialorder %v4347_v60, 0.5 }
0x1039   : >> { %v1871_v31 = vpop.permute.xlu1 %1870  ;;  %v1869_v32 = vpop.permute.xlu0 %1868  ;;  %v1890_v41 = vsel %vm1816_vm5, 0.5, %v3473_v3 }
0x103a   : >> { %vm1873_vm2 = vcmp.ne.s32.totalorder %v1871_v31, 0  ;;  %vm1872_vm7 = vcmp.ne.s32.totalorder %v1869_v32, 0 }
0x103b   : >> { %vm1875_vm1 = vmor %vm1867_vm4, %vm1873_vm2  ;;  %vm5201_vm2 = vcmask 138248  }
0x103c   : >> { %vm1877_vm0 = vmor %vm1875_vm1, %vm5198_vm3 }
0x103d   : >> { %vm1874_vm13 = vmor %vm1866_vm11, %vm1872_vm7  ;;  %v1879_v33 = vsel %vm1877_vm0, 1, %v3469_v14  ;;  %vm5202_vm7 = vcmp.eq.f32.partialorder %v4347_v60, 1.0  ;;  %vm5204_vm0 = vcmask 130048  }
0x103e   : >> { %vm1876_vm12 = vmor %vm1874_vm13, %vm5199_vm9  ;;  %1882 = vrot.lane.b32.xlu1 %v1879_v33, %s3472_s24 }
0x103f   : >> { %v1878_v34 = vsel %vm1876_vm12, 1, %v3469_v14  ;;  %vm5203_vm3 = vmmov %vm5201_vm2 }
0x1040   : >> { %1880 = vrot.lane.b32.xlu0 %v1878_v34, %s3472_s24  ;;  %vm5205_vm13 = vmmov %vm5204_vm0 }
0x10b0   : >> { %v1883_v37 = vpop.permute.xlu1 %1882 }
0x10b1   : >> { %vm1885_vm6 = vcmp.ne.s32.totalorder %v1883_v37, 0 }
0x10b2   : >> { %vm1887_vm15 = vmand %vm1817_vm14, %vm1885_vm6  ;;  %v1881_v36 = vpop.permute.xlu0 %1880 }
0x10b3   : >> { %vm1889_vm10 = vmor %vm5200_vm8, %vm1887_vm15  ;;  %v3199_v38 = vsel %vm1887_vm15, 1.0, %v3473_v3  ;;  %vm1884_vm4 = vcmp.ne.s32.totalorder %v1881_v36, 0 }
0x10b4   : >> { %v1893_v43 = vsel %vm1889_vm10, 1.0, %v1891_v35  ;;  %vm1886_vm11 = vmand %vm1816_vm5, %vm1884_vm4 }
0x10b5   : >> { %1896 = vst.msk [vmem:[#allocation2 + $0x9] sm:$0xff] %vm5201_vm2, %v1893_v43  ;;  %v3198_v44 = vsel %vm1886_vm11, 1.0, %v3473_v3  ;;  %vm1888_vm1 = vmor %vm5202_vm7, %vm1886_vm11 }
0x10b6   : >> { %v3330_v45 = vpack.i.bf16 %v3199_v38, %v3198_v44  ;;  %v1892_v46 = vsel %vm1888_vm1, 1.0, %v1890_v41 }
0x10b7   : >> { %1895 = vst.msk [vmem:[#allocation2 + $0x1] sm:$0xff] %vm5203_vm3, %v1892_v46 }
0x10b8   : >> { %3331 = vrot.lane.b32.xlu0 %v3330_v45, %s3472_s24 }
0x112a   : >> { %v3332_v47 = vpop.permute.xlu0 %3331 }
0x112b   : >> { %v3334_v48 = vunpack.i.h.bf16 %v3332_v47  ;;  %v3333_v54 = vunpack.i.l.bf16 %v3332_v47 }
0x112d   : >> { %v1912_v21 = vsel %vm5204_vm0, %v3334_v48, 0.0  ;;  %v1911_v18 = vsel %vm5205_vm13, %v3333_v54, 0.0 }
0x112e   : >> { %v1913_v55 = vadd.f32 %v1912_v21, %v1911_v18 }
0x1130   : >> { %1914 = vadd.xlane.f32.xlu1 %v1913_v55 }
0x11b9   : >> { %v1915_v4 = vpop.xlane.xlu1 %1914 }
0x11ba   : >> { %v1916_v20 = vrot.slane %v1915_v4, 4 }
0x11bc   : >> { %v1917_v25 = vadd.f32 %v1916_v20, %v1915_v4 }
0x11be   : >> { %v1918_v16 = vrot.slane %v1917_v25, 2 }
0x11c0   : >> { %v1919_v59 = vadd.f32 %v1918_v16, %v1917_v25 }
0x11c2   : >> { %v1920_v39 = vrot.slane %v1919_v59, 1 }
0x11c4   : >> { %v1921_v61 = vadd.f32 %v1920_v39, %v1919_v59 }
0x11c6   : >> { %3209 = vpush %v1921_v61 }
0x11f7   : >> { %s3210_s26 = spop %3209 }
0x11f8   : >> { %p1808_p6 = scmp.gt.f32.partialorder %s3210_s26, 0.0 }
0x11fa   : >> { %p1810_p12 = pnand %p1809_p10, %p1808_p6 }
0x11fb   : > { %v1926_v29 = vrot.slane (%p1810_p12), %v4323_v58, 3  ;;  %v1928_v12 = vrot.slane (%p1810_p12), %v4323_v58, 1  ;;  %v1930_v17 = vrot.slane (%p1810_p12), %v4323_v58, 7  ;;  %v1933_v62 = vrot.slane (%p1810_p12), %v4323_v58, 5  ;;  %v4390_v63 = vld [vmem:[#allocation2 + $0x9] sm:$0xff] (%p1810_p12)  ;;  %v4396_v6 = vld [vmem:[#allocation2 + $0x1] sm:$0xff] (%p1810_p12) }
0x11fc   : > { %1813 = sbr.rel (!%p1810_p12) target bundleno = 4014 (0xfae), region = 110  ;;  %v1934_v0 = vrot.slane (%p1810_p12), %v4321_v56, 5  ;;  %v1939_v1 = vrot.slane (%p1810_p12), %v4321_v56, 3  ;;  %v1941_v2 = vrot.slane (%p1810_p12), %v4321_v56, 1  ;;  %v1943_v5 = vrot.slane (%p1810_p12), %v4321_v56, 7  ;;  %s3474_s22 = smov (%p1810_p12), 8  }
0x11fd   : > { %vm5206_vm9 = vcmask (%p1810_p12), 1040384   ;;  %v2154_v8 = vrot.slane (%p1810_p12), %v4396_v6, 5  ;;  %v2155_v9 = vrot.slane (%p1810_p12), %v4390_v63, 5  ;;  %v2160_v10 = vrot.slane (%p1810_p12), %v4390_v63, 3  ;;  %s3475_s3 = smov (%p1810_p12), 123  }
0x11fe   : > { %v1945_v7 = vsel (%p1810_p12), %vm5206_vm9, %v1926_v29, %v1928_v12  ;;  %vm5207_vm12 = vcmask (%p1810_p12), 1042432   ;;  %vm5208_vm14 = vcmask (%p1810_p12), 1041408   ;;  %v2162_v15 = vrot.slane (%p1810_p12), %v4390_v63, 1 }
0x11ff   : > { %v1935_v11 = vsel (%p1810_p12), %vm5207_vm12, %v1933_v62, %v1934_v0  ;;  %v1946_v13 = vsel (%p1810_p12), %vm5208_vm14, %v1945_v7, %v1930_v17  ;;  %vm5209_vm5 = vmmov (%p1810_p12), %vm5207_vm12  ;;  %vm5211_vm15 = vcmask (%p1810_p12), 1043456   ;;  %vm5212_vm8 = vcmask (%p1810_p12), 1044480  }
0x1200   : > { %v1948_v14 = vsel (%p1810_p12), %vm5209_vm5, %v1934_v0, %v1939_v1  ;;  %vm5210_vm6 = vmmov (%p1810_p12), %vm5209_vm5  ;;  %v1952_v22 = vmul.f32 (%p1810_p12), 0.036632847, %v1935_v11  ;;  %v1954_v23 = vmul.f32 (%p1810_p12), 0.11128076, %v1935_v11  ;;  %v1969_v26 = vmul.f32 (%p1810_p12), 0.21674532, %v1935_v11 }
0x1201   : > { %v1947_v19 = vsel %vm5210_vm6, %v1946_v13, %v1933_v62  ;;  %v1949_v60 = vsel %vm5211_vm15, %v1948_v14, %v1941_v2  ;;  %v1984_v50 = vmul.f32 0.27068216, %v1935_v11  ;;  %vm5213_vm10 = vcmask 1046528   ;;  %vm5216_vm2 = vmmov %vm5211_vm15 }
0x1202   : > { %v1950_v42 = vsel %vm5212_vm8, %v1949_v60, %v1943_v5  ;;  %v1951_v53 = vmul.f32 0.036632847, %v1947_v19  ;;  %v1953_v51 = vmul.f32 0.11128076, %v1947_v19  ;;  %v1968_v24 = vmul.f32 0.21674532, %v1947_v19  ;;  %vm5214_vm4 = vmmov %vm5213_vm10 }
0x1203   : > { %v1955_v52 = vmul.f32 0.11128076, %v1950_v42  ;;  %v1960_v49 = vrot.slane %v1954_v23, 1  ;;  %v2008_v40 = vrot.slane %v1954_v23, 5  ;;  %v1983_v57 = vmul.f32 0.27068216, %v1947_v19  ;;  %vm5217_vm7 = vmmov %vm5212_vm8 }
0x1204   : > { %v1959_v27 = vrot.slane %v1953_v51, 1  ;;  %v1974_v28 = vrot.slane %v1968_v24, 2  ;;  %v1975_v31 = vrot.slane %v1969_v26, 2  ;;  %v1998_v32 = vrot.slane %v1968_v24, 4  ;;  %vm5218_vm1 = vmmov %vm5209_vm5 }
0x1205   : > { %v1962_v30 = vrot.slane %v1955_v52, 1  ;;  %v1999_v33 = vrot.slane %v1969_v26, 4  ;;  %v1989_v37 = vrot.slane %v1983_v57, 3  ;;  %v1990_v3 = vrot.slane %v1984_v50, 3  ;;  %vm5219_vm3 = vmmov %vm5218_vm1 }
0x1206   : > { %v1961_v34 = vsel %vm5213_vm10, %v1959_v27, %v1960_v49  ;;  %v2007_v35 = vrot.slane %v1953_v51, 5  ;;  %vm5215_vm11 = vcmask 1045504   ;;  %v2020_v47 = vrot.slane %v1951_v53, 6  ;;  %vm5220_vm0 = vmmov %vm5208_vm14 }
0x1207   : > { %v1963_v36 = vsel %vm5214_vm4, %v1960_v49, %v1962_v30  ;;  %v1966_v38 = vadd.f32 %v1961_v34, %v1951_v53  ;;  %v1976_v41 = vsel %vm5215_vm11, %v1974_v28, %v1975_v31  ;;  %v2000_v43 = vsel %vm5216_vm2, %v1998_v32, %v1999_v33  ;;  %vm5221_vm13 = vmmov %vm5218_vm1 }
0x1208   : > { %v1967_v44 = vadd.f32 %v1963_v36, %v1952_v22  ;;  %v1991_v45 = vsel %vm5217_vm7, %v1989_v37, %v1990_v3  ;;  %v2009_v46 = vsel %vm5218_vm1, %v2007_v35, %v2008_v40  ;;  %v2021_v54 = vrot.slane %v1952_v22, 6  ;;  %vm5222_vm9 = vmmov %vm5218_vm1 }
0x1209   : > { %v1981_v48 = vadd.f32 %v1976_v41, %v1966_v38  ;;  %v1970_v21 = vmul.f32 0.21674532, %v1950_v42  ;;  %v1985_v18 = vmul.f32 0.27068216, %v1950_v42  ;;  %v2010_v55 = vrot.slane %v1955_v52, 5  ;;  %vm5223_vm12 = vmmov %vm5215_vm11 }
0x120a   : > { %v2016_v4 = vmul.f32 0.036632847, %v1950_v42  ;;  %v2156_v20 = vsel %vm5219_vm3, %v2154_v8, %v2155_v9  ;;  %v2164_v25 = vrot.slane %v4390_v63, 7  ;;  %v2022_v59 = vsel %vm5220_vm0, %v2020_v47, %v2021_v54  ;;  %vm5224_vm14 = vmmov %vm5217_vm7 }
0x120b   : > { %v1996_v16 = vadd.f32 %v1991_v45, %v1981_v48  ;;  %v1977_v39 = vrot.slane %v1970_v21, 2  ;;  %v1992_v61 = vrot.slane %v1985_v18, 3  ;;  %v2001_v29 = vrot.slane %v1970_v21, 4  ;;  %vm5225_vm5 = vmmov %vm5216_vm2 }
0x120c   : > { %v2011_v12 = vsel %vm5221_vm13, %v2008_v40, %v2010_v55  ;;  %v2023_v17 = vrot.slane %v2016_v4, 6  ;;  %v2169_v62 = vsel %vm5222_vm9, %v2155_v9, %v2160_v10  ;;  %vm5226_vm6 = vmmov %vm5216_vm2  ;;  %v4428_v60 = vmul.f32 0.036632847, %v2156_v20 }
0x120d   : > { %v2005_v0 = vadd.f32 %v2000_v43, %v1996_v16  ;;  %v1978_v1 = vsel %vm5223_vm12, %v1975_v31, %v1977_v39  ;;  %v1993_v2 = vsel %vm5224_vm14, %v1990_v3, %v1992_v61  ;;  %v2170_v5 = vsel %vm5225_vm5, %v2169_v62, %v2162_v15  ;;  %vm5227_vm15 = vmmov %vm5220_vm0 }
0x120e   : > { %v1982_v7 = vadd.f32 %v1978_v1, %v1967_v44  ;;  %v2002_v11 = vsel %vm5226_vm6, %v1999_v33, %v2001_v29  ;;  %v2024_v13 = vsel %vm5227_vm15, %v2021_v54, %v2023_v17  ;;  %vm5228_vm8 = vmmov %vm5217_vm7  ;;  %v4430_v22 = vmul.f32 0.11128076, %v2156_v20 }
0x120f   : > { %v2171_v14 = vsel %vm5228_vm8, %v2170_v5, %v2164_v25  ;;  %v2014_v19 = vadd.f32 %v2009_v46, %v2005_v0  ;;  %v4432_v23 = vmul.f32 0.21674532, %v2156_v20  ;;  %v4434_v53 = vmul.f32 0.27068216, %v2156_v20  ;;  %vm5229_vm10 = vmmov %vm5214_vm4 }
0x1210   : > { %v2176_v9 = vmul.f32 0.11128076, %v2171_v14  ;;  %v1997_v10 = vadd.f32 %v1993_v2, %v1982_v7  ;;  %v2191_v42 = vmul.f32 0.21674532, %v2171_v14  ;;  %v2181_v51 = vrot.slane %v4430_v22, 1  ;;  %vm5230_vm4 = vmmov %vm5215_vm11 }
0x1211   : > { %v4436_v15 = vadd.f32 %v2022_v59, %v2014_v19  ;;  %v2206_v52 = vmul.f32 0.27068216, %v2171_v14  ;;  %v2196_v26 = vrot.slane %v4432_v23, 2  ;;  %v2211_v27 = vrot.slane %v4434_v53, 3  ;;  %vm5231_vm11 = vmmov %vm5217_vm7 }
0x1212   : > { %v2183_v24 = vrot.slane %v2176_v9, 1  ;;  %v2006_v49 = vadd.f32 %v2002_v11, %v1997_v10  ;;  %v2198_v40 = vrot.slane %v2191_v42, 2  ;;  %v2220_v50 = vrot.slane %v4432_v23, 4  ;;  %vm5232_vm7 = vmmov %vm5218_vm1 }
0x1213   : > { %2037 = vrot.lane.b32.xlu1 %v4436_v15, %s3456_s16  ;;  %2031 = vrot.lane.b32.xlu0 %v4436_v15, %s3461_s25  ;;  %v2213_v57 = vrot.slane %v2206_v52, 3  ;;  %v2222_v30 = vrot.slane %v2191_v42, 4  ;;  %v2229_v37 = vrot.slane %v4430_v22, 5  ;;  %v2231_v3 = vrot.slane %v2176_v9, 5  ;;  %vm5233_vm1 = vmmov %vm5220_vm0 }
0x1214   : > { %v2184_v28 = vsel %vm5229_vm10, %v2181_v51, %v2183_v24  ;;  %v2015_v31 = vadd.f32 %v2011_v12, %v2006_v49  ;;  %v2199_v33 = vsel %vm5230_vm4, %v2196_v26, %v2198_v40  ;;  %v2237_v35 = vmul.f32 0.036632847, %v2171_v14  ;;  %vm5235_vm13 = vmmov %vm5232_vm7 }
0x1215   : > { %v2188_v32 = vadd.f32 %v2184_v28, %v4428_v60  ;;  %v2214_v34 = vsel %vm5231_vm11, %v2211_v27, %v2213_v57  ;;  %v2242_v41 = vrot.slane %v4428_v60, 6  ;;  %v2147_v43 = vrot.slane %v4396_v6, 3  ;;  %vm5236_vm9 = vmmov %vm5232_vm7 }
0x1216   : > { %v4455_v36 = vadd.f32 %v2024_v13, %v2015_v31  ;;  %v2223_v44 = vsel %vm5216_vm2, %v2220_v50, %v2222_v30  ;;  %v2244_v45 = vrot.slane %v2237_v35, 6  ;;  %v2149_v46 = vrot.slane %v4396_v6, 1  ;;  %vm5237_vm12 = vmmov %vm5232_vm7 }
0x1217   : > { %v2203_v38 = vadd.f32 %v2199_v33, %v2188_v32  ;;  %v2151_v47 = vrot.slane %v4396_v6, 7  ;;  %v4468_v54 = vmul.f32 %v4323_v58, %v4323_v58  ;;  %v2371_v21 = vmul.f32 %v4321_v56, %v4321_v56  ;;  %vm5238_vm14 = vmmov %vm5216_vm2 }
0x1218   : > { %2039 = vrot.lane.b32.xlu1 %v4455_v36, %s3456_s16  ;;  %2033 = vrot.lane.b32.xlu0 %v4455_v36, %s3461_s25  ;;  %v2232_v18 = vsel %vm5232_vm7, %v2229_v37, %v2231_v3  ;;  %v2245_v55 = vsel %vm5233_vm1, %v2242_v41, %v2244_v45  ;;  %vm5234_vm3 = vcmask 1040384   ;;  %v4477_v20 = vmul.f32 %v4396_v6, %v4396_v6  ;;  %vm5239_vm5 = vmmov %vm5229_vm10 }
0x1219   : > { %v2218_v48 = vadd.f32 %v2214_v34, %v2203_v38  ;;  %v2166_v4 = vsel %vm5234_vm3, %v2147_v43, %v2149_v46  ;;  %v2380_v59 = vrot.slane %v4468_v54, 5  ;;  %v2381_v39 = vrot.slane %v2371_v21, 5  ;;  %vm5240_vm6 = vmmov %vm5230_vm4 }
0x121a   : > { %v2167_v16 = vsel %vm5220_vm0, %v2166_v4, %v2151_v47  ;;  %v2386_v29 = vrot.slane %v2371_v21, 3  ;;  %v2388_v12 = vrot.slane %v2371_v21, 1  ;;  %v4486_v17 = vmul.f32 %v4390_v63, %v4390_v63  ;;  %vm5241_vm15 = vmmov %vm5228_vm8 }
0x121b   : > { %v2227_v25 = vadd.f32 %v2223_v44, %v2218_v48  ;;  %v2168_v61 = vsel %vm5235_vm13, %v2167_v16, %v2154_v8  ;;  %v2390_v2 = vrot.slane %v2371_v21, 7  ;;  %v2382_v8 = vsel %vm5236_vm9, %v2380_v59, %v2381_v39  ;;  %vm5242_vm10 = vmmov %vm5216_vm2 }
0x121c   : > { %2045 = vrot.lane.b32.xlu1 %v4455_v36, %s3455_s18  ;;  %2043 = vrot.lane.b32.xlu0 %v4436_v15, %s3455_s18  ;;  %v2174_v0 = vmul.f32 0.11128076, %v2168_v61  ;;  %v2189_v1 = vmul.f32 0.21674532, %v2168_v61  ;;  %v2172_v5 = vmul.f32 0.036632847, %v2168_v61  ;;  %v2395_v11 = vsel %vm5237_vm12, %v2381_v39, %v2386_v29  ;;  %vm5243_vm4 = vmmov %vm5232_vm7 }
0x121d   : > { %v2236_v62 = vadd.f32 %v2232_v18, %v2227_v25  ;;  %v2204_v7 = vmul.f32 0.27068216, %v2168_v61  ;;  %v2396_v42 = vsel %vm5238_vm14, %v2395_v11, %v2388_v12  ;;  %v2373_v40 = vrot.slane %v4468_v54, 3  ;;  %vm5244_vm11 = vmmov %vm5220_vm0 }
0x121e   : > { %v2180_v14 = vrot.slane %v2174_v0, 1  ;;  %v2195_v19 = vrot.slane %v2189_v1, 2  ;;  %v2219_v60 = vrot.slane %v2189_v1, 4  ;;  %v2228_v10 = vrot.slane %v2174_v0, 5  ;;  %vm5245_vm2 = vmmov %vm5239_vm5 }
0x121f   : > { %v4496_v13 = vadd.f32 %v2245_v55, %v2236_v62  ;;  %v2210_v9 = vrot.slane %v2204_v7, 3  ;;  %v2241_v23 = vrot.slane %v2172_v5, 6  ;;  %v2397_v49 = vsel %vm5241_vm15, %v2396_v42, %v2390_v2  ;;  %vm5246_vm7 = vmmov %vm5240_vm6 }
0x1220   : > { %v2182_v24 = vsel %vm5239_vm5, %v2180_v14, %v2181_v51  ;;  %v2197_v52 = vsel %vm5240_vm6, %v2195_v19, %v2196_v26  ;;  %v2221_v30 = vsel %vm5242_vm10, %v2219_v60, %v2220_v50  ;;  %v2230_v31 = vsel %vm5243_vm4, %v2228_v10, %v2229_v37  ;;  %vm5247_vm1 = vmmov %vm5228_vm8 }
0x1221   : > { %2254 = vrot.lane.b32.xlu1 %v4496_v13, %s3461_s25  ;;  %v2187_v28 = vadd.f32 %v2182_v24, %v2172_v5  ;;  %v2212_v57 = vsel %vm5228_vm8, %v2210_v9, %v2211_v27  ;;  %v2243_v32 = vsel %vm5244_vm11, %v2241_v23, %v2242_v41  ;;  %v4513_v22 = vmul.f32 0.036632847, %v2382_v8  ;;  %vm5248_vm3 = vmmov %vm5242_vm10 }
0x1222   : > { %v4515_v51 = vmul.f32 0.11128076, %v2382_v8  ;;  %v2402_v26 = vmul.f32 0.11128076, %v2397_v49  ;;  %v4517_v34 = vmul.f32 0.21674532, %v2382_v8  ;;  %v4526_v37 = vmul.f32 %v4396_v6, %v4323_v58  ;;  %vm5250_vm13 = vmmov %vm5243_vm4 }
0x1223   : > { %v2202_v33 = vadd.f32 %v2197_v52, %v2187_v28  ;;  %v2417_v3 = vmul.f32 0.21674532, %v2397_v49  ;;  %v4519_v35 = vmul.f32 0.27068216, %v2382_v8  ;;  %v2432_v50 = vmul.f32 0.27068216, %v2397_v49  ;;  %vm5251_vm9 = vmmov %vm5244_vm11 }
0x1224   : > { %v2407_v53 = vrot.slane %v4515_v51, 1  ;;  %v2409_v27 = vrot.slane %v2402_v26, 1  ;;  %v2422_v41 = vrot.slane %v4517_v34, 2  ;;  %v2446_v47 = vrot.slane %v4517_v34, 4  ;;  %vm5252_vm12 = vmmov %vm5251_vm9 }
0x1225   : > { %2260 = vrot.lane.b32.xlu1 %v4496_v13, %s3456_s16  ;;  %v2217_v38 = vadd.f32 %v2212_v57, %v2202_v33  ;;  %v2424_v43 = vrot.slane %v2417_v3, 2  ;;  %v2437_v44 = vrot.slane %v4519_v35, 3  ;;  %v2439_v46 = vrot.slane %v2432_v50, 3  ;;  %vm5253_vm14 = vmmov %vm5243_vm4 }
0x1226   : > { %v2410_v45 = vsel %vm5245_vm2, %v2407_v53, %v2409_v27  ;;  %v2448_v48 = vrot.slane %v2417_v3, 4  ;;  %v2455_v58 = vrot.slane %v4515_v51, 5  ;;  %v2457_v4 = vrot.slane %v2402_v26, 5  ;;  %vm5254_vm5 = vmmov %vm5243_vm4 }
0x1227   : > { %v2226_v21 = vadd.f32 %v2221_v30, %v2217_v38  ;;  %v2414_v18 = vadd.f32 %v2410_v45, %v4513_v22  ;;  %v2425_v55 = vsel %vm5246_vm7, %v2422_v41, %v2424_v43  ;;  %v2440_v6 = vsel %vm5247_vm1, %v2437_v44, %v2439_v46  ;;  %vm5255_vm6 = vmmov %vm5243_vm4 }
0x1228   : > { %v2463_v25 = vmul.f32 0.036632847, %v2397_v49  ;;  %v2468_v16 = vrot.slane %v4513_v22, 6  ;;  %v2449_v29 = vsel %vm5248_vm3, %v2446_v47, %v2448_v48  ;;  %v2375_v12 = vrot.slane %v4468_v54, 1  ;;  %vm5256_vm15 = vmmov %vm5248_vm3 }
0x1229   : > { %2266 = vrot.lane.b32.xlu1 %v4496_v13, %s3455_s18  ;;  %v2235_v39 = vadd.f32 %v2230_v31, %v2226_v21  ;;  %v2429_v61 = vadd.f32 %v2425_v55, %v2414_v18  ;;  %v2377_v0 = vrot.slane %v4468_v54, 7  ;;  %v2602_v1 = vrot.slane %v4477_v20, 5  ;;  %vm5257_vm8 = vmmov %vm5247_vm1 }
0x122a   : > { %v2470_v62 = vrot.slane %v2463_v25, 6  ;;  %v2603_v2 = vrot.slane %v4486_v17, 5  ;;  %vm5249_vm0 = vcmask 1040384   ;;  %v2608_v11 = vrot.slane %v4486_v17, 3  ;;  %vm5258_vm10 = vmmov %vm5245_vm2 }
0x122b   : > { %v4544_v5 = vadd.f32 %v2243_v32, %v2235_v39  ;;  %v2444_v7 = vadd.f32 %v2440_v6, %v2429_v61  ;;  %v2392_v8 = vsel %vm5249_vm0, %v2373_v40, %v2375_v12  ;;  %v2458_v14 = vsel %vm5250_vm13, %v2455_v58, %v2457_v4  ;;  %vm5259_vm4 = vmmov %vm5246_vm7 }
0x122c   : > { %v2471_v19 = vsel %vm5251_vm9, %v2468_v16, %v2470_v62  ;;  %v2393_v60 = vsel %vm5252_vm12, %v2392_v8, %v2377_v0  ;;  %v2610_v9 = vrot.slane %v4486_v17, 1  ;;  %v2612_v42 = vrot.slane %v4486_v17, 7  ;;  %vm5260_vm11 = vmmov %vm5248_vm3 }
0x122d   : > { %2252 = vrot.lane.b32.xlu0 %v4544_v5, %s3461_s25  ;;  %v2453_v10 = vadd.f32 %v2449_v29, %v2444_v7  ;;  %v2394_v23 = vsel %vm5253_vm14, %v2393_v60, %v2380_v59  ;;  %v2617_v24 = vsel %vm5254_vm5, %v2603_v2, %v2608_v11  ;;  %v2604_v40 = vsel %vm5255_vm6, %v2602_v1, %v2603_v2  ;;  %vm5261_vm2 = vmmov %vm5247_vm1 }
0x122e   : > { %v2400_v52 = vmul.f32 0.11128076, %v2394_v23  ;;  %v2415_v49 = vmul.f32 0.21674532, %v2394_v23  ;;  %v2618_v28 = vsel %vm5256_vm15, %v2617_v24, %v2610_v9  ;;  %v2398_v30 = vmul.f32 0.036632847, %v2394_v23  ;;  %vm5262_vm7 = vmmov %vm5254_vm5 }
0x122f   : > { %v2462_v57 = vadd.f32 %v2458_v14, %v2453_v10  ;;  %v2430_v31 = vmul.f32 0.27068216, %v2394_v23  ;;  %v2619_v32 = vsel %vm5257_vm8, %v2618_v28, %v2612_v42  ;;  %v4568_v34 = vmul.f32 0.11128076, %v2604_v40  ;;  %vm5263_vm1 = vmmov %vm5251_vm9 }
0x1230   : > { %v2406_v54 = vrot.slane %v2400_v52, 1  ;;  %v2421_v22 = vrot.slane %v2415_v49, 2  ;;  %v2445_v59 = vrot.slane %v2415_v49, 4  ;;  %v2454_v51 = vrot.slane %v2400_v52, 5  ;;  %vm5264_vm3 = vmmov %vm5258_vm10 }
0x1231   : > { %2258 = vrot.lane.b32.xlu0 %v4544_v5, %s3456_s16  ;;  %v4566_v17 = vadd.f32 %v2471_v19, %v2462_v57  ;;  %v2436_v26 = vrot.slane %v2430_v31, 3  ;;  %v2467_v33 = vrot.slane %v2398_v30, 6  ;;  %v4573_v50 = vmul.f32 0.036632847, %v2604_v40  ;;  %vm5265_vm0 = vmmov %vm5259_vm4 }
0x1232   : > { %v2408_v3 = vsel %vm5258_vm10, %v2406_v54, %v2407_v53  ;;  %v2423_v35 = vsel %vm5259_vm4, %v2421_v22, %v2422_v41  ;;  %v2447_v27 = vsel %vm5260_vm11, %v2445_v59, %v2446_v47  ;;  %v2456_v45 = vsel %vm5262_vm7, %v2454_v51, %v2455_v58  ;;  %vm5266_vm13 = vmmov %vm5261_vm2 }
0x1233   : > { %2480 = vrot.lane.b32.xlu1 %v4566_v17, %s3461_s25  ;;  %v2413_v38 = vadd.f32 %v2408_v3, %v2398_v30  ;;  %v2438_v43 = vsel %vm5261_vm2, %v2436_v26, %v2437_v44  ;;  %v2624_v46 = vmul.f32 0.11128076, %v2619_v32  ;;  %v2469_v48 = vsel %vm5263_vm1, %v2467_v33, %v2468_v16  ;;  %vm5267_vm9 = vmmov %vm5260_vm11 }
0x1234   : > { %v2629_v21 = vrot.slane %v4568_v34, 1  ;;  %v4581_v53 = vmul.f32 0.21674532, %v2604_v40  ;;  %v2639_v41 = vmul.f32 0.21674532, %v2619_v32  ;;  %v2677_v0 = vrot.slane %v4568_v34, 5  ;;  %vm5268_vm12 = vmmov %vm5254_vm5 }
0x1235   : > { %2264 = vrot.lane.b32.xlu0 %v4544_v5, %s3455_s18  ;;  %v2428_v47 = vadd.f32 %v2423_v35, %v2413_v38  ;;  %v2631_v18 = vrot.slane %v2624_v46, 1  ;;  %v4585_v55 = vmul.f32 0.27068216, %v2604_v40  ;;  %v2654_v6 = vmul.f32 0.27068216, %v2619_v32  ;;  %vm5270_vm5 = vmmov %vm5263_vm1 }
0x1236   : > { %v2644_v44 = vrot.slane %v4581_v53, 2  ;;  %v2646_v4 = vrot.slane %v2639_v41, 2  ;;  %v2668_v58 = vrot.slane %v4581_v53, 4  ;;  %v2670_v25 = vrot.slane %v2639_v41, 4  ;;  %vm5271_vm6 = vmmov %vm5263_vm1 }
0x1237   : > { %v2443_v16 = vadd.f32 %v2438_v43, %v2428_v47  ;;  %2486 = vrot.lane.b32.xlu1 %v4566_v17, %s3456_s16  ;;  %v2632_v39 = vsel %vm5264_vm3, %v2629_v21, %v2631_v18  ;;  %v2659_v61 = vrot.slane %v4585_v55, 3  ;;  %v2661_v29 = vrot.slane %v2654_v6, 3  ;;  %vm5272_vm15 = vmmov %vm5262_vm7 }
0x1238   : > { %v2636_v12 = vadd.f32 %v2632_v39, %v4573_v50  ;;  %v2647_v62 = vsel %vm5265_vm0, %v2644_v44, %v2646_v4  ;;  %v2679_v2 = vrot.slane %v2624_v46, 5  ;;  %v2685_v11 = vmul.f32 0.036632847, %v2619_v32  ;;  %vm5273_vm8 = vmmov %vm5262_vm7 }
0x1239   : > { %v2452_v7 = vadd.f32 %v2447_v27, %v2443_v16  ;;  %v2662_v8 = vsel %vm5266_vm13, %v2659_v61, %v2661_v29  ;;  %v2690_v14 = vrot.slane %v4573_v50, 6  ;;  %v2671_v60 = vsel %vm5267_vm9, %v2668_v58, %v2670_v25  ;;  %vm5274_vm10 = vmmov %vm5262_vm7 }
0x123a   : > { %v2651_v19 = vadd.f32 %v2647_v62, %v2636_v12  ;;  %v2595_v9 = vrot.slane %v4477_v20, 3  ;;  %v2597_v10 = vrot.slane %v4477_v20, 1  ;;  %v2692_v42 = vrot.slane %v2685_v11, 6  ;;  %vm5275_vm4 = vmmov %vm5267_vm9 }
0x123b   : > { %v2461_v23 = vadd.f32 %v2456_v45, %v2452_v7  ;;  %v2599_v24 = vrot.slane %v4477_v20, 7  ;;  %v2815_v52 = vmul.f32 %v4390_v63, %v4321_v56  ;;  %v2680_v40 = vsel %vm5268_vm12, %v2677_v0, %v2679_v2  ;;  %vm5276_vm11 = vmmov %vm5264_vm3 }
0x123c   : > { %v2666_v49 = vadd.f32 %v2662_v8, %v2651_v19  ;;  %vm5269_vm14 = vcmask 1040384   ;;  %v2824_v57 = vrot.slane %v4526_v37, 5  ;;  %v2693_v31 = vsel %vm5270_vm5, %v2690_v14, %v2692_v42  ;;  %vm5277_vm2 = vmmov %vm5265_vm0 }
0x123d   : > { %v2614_v28 = vsel %vm5269_vm14, %v2595_v9, %v2597_v10  ;;  %v4609_v30 = vadd.f32 %v2469_v48, %v2461_v23  ;;  %v2825_v54 = vrot.slane %v2815_v52, 5  ;;  %v2830_v56 = vrot.slane %v2815_v52, 3  ;;  %vm5278_vm7 = vmmov %vm5275_vm4 }
0x123e   : > { %v2615_v32 = vsel %vm5271_vm6, %v2614_v28, %v2599_v24  ;;  %v2675_v22 = vadd.f32 %v2671_v60, %v2666_v49  ;;  %v2832_v63 = vrot.slane %v2815_v52, 1  ;;  %v2834_v50 = vrot.slane %v2815_v52, 7  ;;  %vm5279_vm1 = vmmov %vm5266_vm13 }
0x123f   : > { %v2616_v59 = vsel %vm5272_vm15, %v2615_v32, %v2602_v1  ;;  %2478 = vrot.lane.b32.xlu0 %v4609_v30, %s3461_s25  ;;  %v2826_v3 = vsel %vm5273_vm8, %v2824_v57, %v2825_v54  ;;  %v2839_v38 = vsel %vm5274_vm10, %v2825_v54, %v2830_v56  ;;  %v2817_v6 = vrot.slane %v4526_v37, 3  ;;  %vm5280_vm3 = vmmov %vm5273_vm8 }
0x1240   : > { %v2620_v51 = vmul.f32 0.036632847, %v2616_v59  ;;  %v2622_v26 = vmul.f32 0.11128076, %v2616_v59  ;;  %v2637_v33 = vmul.f32 0.21674532, %v2616_v59  ;;  %v2684_v35 = vadd.f32 %v2680_v40, %v2675_v22  ;;  %vm5281_vm0 = vmmov %vm5279_vm1 }
0x1241   : > { %v2652_v27 = vmul.f32 0.27068216, %v2616_v59  ;;  %v2840_v41 = vsel %vm5275_vm4, %v2839_v38, %v2832_v63  ;;  %vm5282_vm13 = vmmov %vm5270_vm5  ;;  %v4639_v29 = vmul.f32 0.036632847, %v2826_v3  ;;  %v2875_v2 = vmul.f32 0.27068216, %v2826_v3 }
0x1242   : > { %v2628_v20 = vrot.slane %v2622_v26, 1  ;;  %v2643_v43 = vrot.slane %v2637_v33, 2  ;;  %v2667_v1 = vrot.slane %v2637_v33, 4  ;;  %v2676_v45 = vrot.slane %v2622_v26, 5  ;;  %vm5283_vm9 = vmmov %vm5276_vm11 }
0x1243   : > { %v4622_v46 = vadd.f32 %v2693_v31, %v2684_v35  ;;  %v2658_v48 = vrot.slane %v2652_v27, 3  ;;  %v2689_v53 = vrot.slane %v2620_v51, 6  ;;  %2484 = vrot.lane.b32.xlu0 %v4609_v30, %s3456_s16  ;;  %v2841_v39 = vsel %vm5281_vm0, %v2840_v41, %v2834_v50  ;;  %vm5284_vm12 = vmmov %vm5277_vm2 }
0x1244   : > { %v2630_v47 = vsel %vm5276_vm11, %v2628_v20, %v2629_v21  ;;  %v2645_v18 = vsel %vm5277_vm2, %v2643_v43, %v2644_v44  ;;  %v2669_v55 = vsel %vm5278_vm7, %v2667_v1, %v2668_v58  ;;  %v2678_v16 = vsel %vm5280_vm3, %v2676_v45, %v2677_v0  ;;  %vm5285_vm14 = vmmov %vm5281_vm0 }
0x1245   : > { %2702 = vrot.lane.b32.xlu1 %v4622_v46, %s3461_s25  ;;  %v2635_v4 = vadd.f32 %v2630_v47, %v2620_v51  ;;  %v2660_v25 = vsel %vm5279_vm1, %v2658_v48, %v2659_v61  ;;  %v2691_v34 = vsel %vm5282_vm13, %v2689_v53, %v2690_v14  ;;  %v2845_v21 = vmul.f32 0.11128076, %v2826_v3  ;;  %vm5286_vm5 = vmmov %vm5275_vm4 }
0x1246   : > { %v2846_v44 = vmul.f32 0.11128076, %v2841_v39  ;;  %v2860_v58 = vmul.f32 0.21674532, %v2826_v3  ;;  %v2861_v62 = vmul.f32 0.21674532, %v2841_v39  ;;  %vm5287_vm6 = vmmov %vm5280_vm3 }
0x1247   : > { %v2650_v12 = vadd.f32 %v2645_v18, %v2635_v4  ;;  %v2851_v7 = vrot.slane %v2845_v21, 1  ;;  %v2876_v11 = vmul.f32 0.27068216, %v2841_v39  ;;  %v2899_v19 = vrot.slane %v2845_v21, 5  ;;  %vm5289_vm8 = vmmov %vm5282_vm13 }
0x1248   : > { %v2853_v8 = vrot.slane %v2846_v44, 1  ;;  %v2866_v61 = vrot.slane %v2860_v58, 2  ;;  %v2868_v0 = vrot.slane %v2861_v62, 2  ;;  %v2881_v9 = vrot.slane %v2875_v2, 3  ;;  %vm5290_vm10 = vmmov %vm5289_vm8 }
0x1249   : > { %v2665_v60 = vadd.f32 %v2660_v25, %v2650_v12  ;;  %2708 = vrot.lane.b32.xlu1 %v4622_v46, %s3456_s16  ;;  %v2883_v10 = vrot.slane %v2876_v11, 3  ;;  %v2890_v23 = vrot.slane %v2860_v58, 4  ;;  %v2892_v42 = vrot.slane %v2861_v62, 4  ;;  %vm5291_vm4 = vmmov %vm5280_vm3 }
0x124a   : > { %v2854_v14 = vsel %vm5283_vm9, %v2851_v7, %v2853_v8  ;;  %v2869_v49 = vsel %vm5284_vm12, %v2866_v61, %v2868_v0  ;;  %v2901_v40 = vrot.slane %v2846_v44, 5  ;;  %v2907_v32 = vmul.f32 0.036632847, %v2841_v39  ;;  %vm5292_vm11 = vmmov %vm5283_vm9 }
0x124b   : > { %v2674_v24 = vadd.f32 %v2669_v55, %v2665_v60  ;;  %v2858_v52 = vadd.f32 %v2854_v14, %v4639_v29  ;;  %v2884_v28 = vsel %vm5285_vm14, %v2881_v9, %v2883_v10  ;;  %v2893_v31 = vsel %vm5286_vm5, %v2890_v23, %v2892_v42  ;;  %vm5293_vm7 = vmmov %vm5286_vm5 }
0x124c   : > { %v2912_v54 = vrot.slane %v4639_v29, 6  ;;  %v2902_v56 = vsel %vm5287_vm6, %v2899_v19, %v2901_v40  ;;  %v2819_v63 = vrot.slane %v4526_v37, 1  ;;  %v2914_v51 = vrot.slane %v2907_v32, 6  ;;  %vm5294_vm1 = vmmov %vm5280_vm3 }
0x124d   : > { %v2683_v22 = vadd.f32 %v2678_v16, %v2674_v24  ;;  %2051 = vrot.lane.b32.xlu1 %v4455_v36, %s3457_s23  ;;  %v2873_v59 = vadd.f32 %v2869_v49, %v2858_v52  ;;  %v2821_v26 = vrot.slane %v4526_v37, 7  ;;  %vm5288_vm15 = vcmask 1040384   ;;  %vm5295_vm3 = vmmov %vm5281_vm0 }
0x124e   : > { %v2836_v35 = vsel %vm5288_vm15, %v2817_v6, %v2819_v63  ;;  %v2915_v27 = vsel %vm5289_vm8, %v2912_v54, %v2914_v51  ;;  %vm5296_vm0 = vmmov %vm5289_vm8  ;;  %vm5297_vm13 = vcmask 7168   ;;  %vm2071_vm9 = vcmask 23552  }
0x124f   : > { %v4654_v33 = vadd.f32 %v2691_v34, %v2683_v22  ;;  %v2888_v3 = vadd.f32 %v2884_v28, %v2873_v59  ;;  %v2837_v50 = vsel %vm5290_vm10, %v2836_v35, %v2821_v26  ;;  %vm5298_vm12 = vcmask 15360   ;;  %vm5300_vm15 = vmmov %vm5297_vm13 }
0x1250   : > { %v2838_v20 = vsel %vm5291_vm4, %v2837_v50, %v2824_v57  ;;  %vm2076_vm14 = vcmask 162816   ;;  %vm2079_vm5 = vcmask 171008   ;;  %vm5299_vm6 = vcmask 154624   ;;  %vm5301_vm8 = vmmov %vm5297_vm13 }
0x1251   : > { %2700 = vrot.lane.b32.xlu0 %v4654_v33, %s3461_s25  ;;  %2272 = vrot.lane.b32.xlu1 %v4496_v13, %s3457_s23  ;;  %v2897_v38 = vadd.f32 %v2893_v31, %v2888_v3  ;;  %v2844_v43 = vmul.f32 0.11128076, %v2838_v20  ;;  %v2859_v1 = vmul.f32 0.21674532, %v2838_v20  ;;  %v2842_v48 = vmul.f32 0.036632847, %v2838_v20  ;;  %vm5302_vm10 = vmmov %vm5298_vm12 }
0x1252   : > { %v2874_v53 = vmul.f32 0.27068216, %v2838_v20  ;;  %vm5303_vm4 = vmmov %vm5302_vm10 }
0x1253   : > { %v2906_v45 = vadd.f32 %v2902_v56, %v2897_v38  ;;  %v2850_v41 = vrot.slane %v2844_v43, 1  ;;  %v2865_v47 = vrot.slane %v2859_v1, 2  ;;  %v2889_v18 = vrot.slane %v2859_v1, 4 }
0x1254   : > { %v2898_v55 = vrot.slane %v2844_v43, 5  ;;  %v2880_v37 = vrot.slane %v2874_v53, 3  ;;  %v2911_v4 = vrot.slane %v2842_v48, 6 }
0x1255   : > { %2706 = vrot.lane.b32.xlu0 %v4654_v33, %s3456_s16  ;;  %2057 = vrot.lane.b32.xlu1 %v4455_v36, %s3458_s29  ;;  %v4670_v6 = vadd.f32 %v2915_v27, %v2906_v45  ;;  %v2852_v57 = vsel %vm5292_vm11, %v2850_v41, %v2851_v7  ;;  %v2867_v25 = vsel %vm5277_vm2, %v2865_v47, %v2866_v61  ;;  %vm5304_vm11 = vmmov %vm5299_vm6 }
0x1256   : > { %v2891_v16 = vsel %vm5293_vm7, %v2889_v18, %v2890_v23  ;;  %v2900_v39 = vsel %vm5294_vm1, %v2898_v55, %v2899_v19  ;;  %v2857_v34 = vadd.f32 %v2852_v57, %v2842_v48  ;;  %v2882_v29 = vsel %vm5295_vm3, %v2880_v37, %v2881_v9  ;;  %vm5305_vm2 = vmmov %vm5299_vm6 }
0x1257   : > { %v2913_v21 = vsel %vm5296_vm0, %v2911_v4, %v2912_v54  ;;  %vm5306_vm7 = vmmov %vm5301_vm8 }
0x1258   : > { %v2872_v44 = vadd.f32 %v2867_v25, %v2857_v34  ;;  %vm5307_vm1 = vmmov %vm5306_vm7 }
0x1259   : > { %2049 = vrot.lane.b32.xlu0 %v4436_v15, %s3457_s23  ;;  %2278 = vrot.lane.b32.xlu1 %v4496_v13, %s3458_s29  ;;  %vm5308_vm3 = vmmov %vm5303_vm4 }
0x125a   : > { %v2887_v12 = vadd.f32 %v2882_v29, %v2872_v44  ;;  %vm5309_vm0 = vmmov %vm5308_vm3 }
0x125c   : > { %v2896_v58 = vadd.f32 %v2891_v16, %v2887_v12 }
0x125d   : > { %2270 = vrot.lane.b32.xlu0 %v4544_v5, %s3457_s23  ;;  %2492 = vrot.lane.b32.xlu1 %v4566_v17, %s3455_s18 }
0x125e   : > { %v2905_v62 = vadd.f32 %v2900_v39, %v2896_v58 }
0x1260   : > { %v4690_v2 = vadd.f32 %v2913_v21, %v2905_v62 }
0x1261   : > { %2055 = vrot.lane.b32.xlu0 %v4436_v15, %s3458_s29  ;;  %2714 = vrot.lane.b32.xlu1 %v4622_v46, %s3455_s18 }
0x1265   : > { %2276 = vrot.lane.b32.xlu0 %v4544_v5, %s3458_s29  ;;  %2063 = vrot.lane.b32.xlu1 %v4455_v36, %s3474_s22 }
0x1269   : > { %2490 = vrot.lane.b32.xlu0 %v4609_v30, %s3455_s18  ;;  %2284 = vrot.lane.b32.xlu1 %v4496_v13, %s3474_s22 }
0x126d   : > { %2712 = vrot.lane.b32.xlu0 %v4654_v33, %s3455_s18  ;;  %2498 = vrot.lane.b32.xlu1 %v4566_v17, %s3457_s23 }
0x1271   : > { %2061 = vrot.lane.b32.xlu0 %v4436_v15, %s3474_s22  ;;  %2720 = vrot.lane.b32.xlu1 %v4622_v46, %s3457_s23 }
0x1275   : > { %2282 = vrot.lane.b32.xlu0 %v4544_v5, %s3474_s22  ;;  %2504 = vrot.lane.b32.xlu1 %v4566_v17, %s3458_s29 }
0x1279   : > { %2496 = vrot.lane.b32.xlu0 %v4609_v30, %s3457_s23  ;;  %2726 = vrot.lane.b32.xlu1 %v4622_v46, %s3458_s29 }
0x127d   : > { %2718 = vrot.lane.b32.xlu0 %v4654_v33, %s3457_s23  ;;  %2510 = vrot.lane.b32.xlu1 %v4566_v17, %s3474_s22 }
0x1281   : > { %2502 = vrot.lane.b32.xlu0 %v4609_v30, %s3458_s29  ;;  %2732 = vrot.lane.b32.xlu1 %v4622_v46, %s3474_s22 }
0x1285   : > { %2724 = vrot.lane.b32.xlu0 %v4654_v33, %s3458_s29  ;;  %2924 = vrot.lane.b32.xlu1 %v4670_v6, %s3461_s25  ;;  %v2038_v7 = vpop.permute.xlu1 %2037  ;;  %v2032_v11 = vpop.permute.xlu0 %2031 }
0x1286   : > { %v2067_v55 = vsel %vm5301_vm8, %v2032_v11, %v2038_v7  ;;  %vm5314_vm8 = vmmov %vm5305_vm2 }
0x1287   : > { %v2069_v39 = vsel %vm5303_vm4, %v2067_v55, %v4436_v15  ;;  %vm5316_vm4 = vmmov %vm5309_vm0 }
0x1289   : > { %2508 = vrot.lane.b32.xlu0 %v4609_v30, %s3474_s22  ;;  %2930 = vrot.lane.b32.xlu1 %v4670_v6, %s3456_s16 }
0x128a   : > { %v2040_v8 = vpop.permute.xlu1 %2039  ;;  %v2034_v60 = vpop.permute.xlu0 %2033 }
0x128b   : > { %v2068_v35 = vsel %vm5297_vm13, %v2034_v60, %v2040_v8  ;;  %vm5310_vm13 = vmmov %vm5307_vm1 }
0x128c   : > { %v2070_v38 = vsel %vm5298_vm12, %v2068_v35, %v4455_v36  ;;  %vm5311_vm12 = vmmov %vm5305_vm2 }
0x128d   : > { %2730 = vrot.lane.b32.xlu0 %v4654_v33, %s3474_s22  ;;  %2936 = vrot.lane.b32.xlu1 %v4670_v6, %s3455_s18 }
0x128e   : > { %v2046_v19 = vpop.permute.xlu1 %2045  ;;  %v2044_v0 = vpop.permute.xlu0 %2043 }
0x128f   : > { %v2073_v20 = vsel %vm2071_vm9, %v2070_v38, %v2046_v19  ;;  %v2072_v29 = vsel %vm2071_vm9, %v2069_v39, %v2044_v0 }
0x1291   : > { %2922 = vrot.lane.b32.xlu0 %v4690_v2, %s3461_s25  ;;  %2942 = vrot.lane.b32.xlu1 %v4670_v6, %s3457_s23 }
0x1293   : > { %v2255_v61 = vpop.permute.xlu1 %2254 }
0x1295   : > { %2928 = vrot.lane.b32.xlu0 %v4690_v2, %s3456_s16  ;;  %2948 = vrot.lane.b32.xlu1 %v4670_v6, %s3458_s29 }
0x1297   : > { %v2261_v9 = vpop.permute.xlu1 %2260 }
0x1298   : > { %v2289_v47 = vsel %vm5300_vm15, %v2255_v61, %v2261_v9  ;;  %vm5313_vm15 = vmmov %vm5309_vm0 }
0x1299   : > { %2934 = vrot.lane.b32.xlu0 %v4690_v2, %s3455_s18  ;;  %2954 = vrot.lane.b32.xlu1 %v4670_v6, %s3474_s22  ;;  %v2291_v4 = vsel %vm5302_vm10, %v2289_v47, %v4496_v13  ;;  %vm5315_vm10 = vmmov %vm5307_vm1  ;;  %s3476_s18 = smov 122  }
0x129b   : > { %v2267_v10 = vpop.permute.xlu1 %2266 }
0x129c   : > { %v2293_v57 = vsel %vm2071_vm9, %v2291_v4, %v2267_v10 }
0x129d   : > { %2940 = vrot.lane.b32.xlu0 %v4690_v2, %s3457_s23 }
0x129f   : > { %v2253_v14 = vpop.permute.xlu0 %2252 }
0x12a1   : > { %2946 = vrot.lane.b32.xlu0 %v4690_v2, %s3458_s29 }
0x12a3   : > { %v2259_v23 = vpop.permute.xlu0 %2258 }
0x12a4   : > { %v2288_v19 = vsel %vm5306_vm7, %v2253_v14, %v2259_v23  ;;  %vm5318_vm7 = vmmov %vm5309_vm0 }
0x12a5   : > { %2952 = vrot.lane.b32.xlu0 %v4690_v2, %s3474_s22  ;;  %v2481_v42 = vpop.permute.xlu1 %2480 }
0x12a7   : > { %v4754_v24 = vpop.permute.xlu0 %2264 }
0x12a9   : > { %v2487_v52 = vpop.permute.xlu1 %2486 }
0x12aa   : > { %v2515_v0 = vsel %vm5307_vm1, %v2481_v42, %v2487_v52 }
0x12ab   : > { %v2517_v52 = vsel %vm5309_vm0, %v2515_v0, %v4566_v17 }
0x12b1   : > { %v4756_v49 = vpop.permute.xlu0 %2478 }
0x12b5   : > { %v4762_v31 = vpop.permute.xlu0 %2484 }
0x12b6   : > { %v2514_v47 = vsel %vm5315_vm10, %v4756_v49, %v4762_v31 }
0x12b7   : > { %v4758_v40 = vpop.permute.xlu1 %2702 }
0x12bb   : > { %v4760_v28 = vpop.permute.xlu1 %2708 }
0x12bf   : > { %v2052_v32 = vpop.permute.xlu1 %2051 }
0x12c0   : > { %v2075_v43 = vsel %vm5299_vm6, %v2073_v20, %v2052_v32  ;;  %v2290_v32 = vsel %vm5308_vm3, %v2288_v19, %v4544_v5  ;;  %vm5312_vm6 = vmmov %vm5305_vm2 }
0x12c1   : > { %v2292_v14 = vsel %vm2071_vm9, %v2290_v32, %v4754_v24  ;;  %vm5320_vm3 = vmmov %vm5315_vm10 }
0x12c3   : > { %v4764_v54 = vpop.permute.xlu0 %2700  ;;  %v2273_v22 = vpop.permute.xlu1 %2272 }
0x12c4   : > { %v2295_v34 = vsel %vm5304_vm11, %v2293_v57, %v2273_v22  ;;  %v2737_v22 = vsel %vm5310_vm13, %v4758_v40, %v4760_v28  ;;  %v2516_v57 = vsel %vm5316_vm4, %v2514_v47, %v4609_v30  ;;  %vm5317_vm11 = vmmov %vm5307_vm1 }
0x12c5   : > { %vm5319_vm1 = vmmov %vm5305_vm2 }
0x12c6   : > { %vm5321_vm13 = vmmov %vm5319_vm1 }
0x12c7   : > { %v4766_v59 = vpop.permute.xlu0 %2706  ;;  %v2058_v56 = vpop.permute.xlu1 %2057 }
0x12c8   : > { %v2078_v1 = vsel %vm2076_vm14, %v2075_v43, %v2058_v56 }
0x12cb   : > { %v2050_v63 = vpop.permute.xlu0 %2049  ;;  %v2279_v51 = vpop.permute.xlu1 %2278 }
0x12cc   : > { %v2297_v21 = vsel %vm2076_vm14, %v2295_v34, %v2279_v51  ;;  %v2074_v13 = vsel %vm5305_vm2, %v2072_v29, %v2050_v63 }
0x12cf   : > { %v2271_v26 = vpop.permute.xlu0 %2270  ;;  %v2493_v3 = vpop.permute.xlu1 %2492 }
0x12d0   : > { %v2294_v5 = vsel %vm5311_vm12, %v2292_v14, %v2271_v26  ;;  %v2519_v24 = vsel %vm2071_vm9, %v2517_v52, %v2493_v3  ;;  %v2739_v26 = vsel %vm5313_vm15, %v2737_v22, %v4622_v46  ;;  %vm5322_vm12 = vmmov %vm5320_vm3 }
0x12d1   : > { %vm5324_vm15 = vmmov %vm5319_vm1 }
0x12d3   : > { %v2056_v27 = vpop.permute.xlu0 %2055  ;;  %v4769_v50 = vpop.permute.xlu1 %2714 }
0x12d4   : > { %v2077_v58 = vsel %vm2076_vm14, %v2074_v13, %v2056_v27  ;;  %v2741_v38 = vsel %vm2071_vm9, %v2739_v26, %v4769_v50 }
0x12d7   : > { %v2277_v45 = vpop.permute.xlu0 %2276  ;;  %v2064_v48 = vpop.permute.xlu1 %2063 }
0x12d8   : > { %v4777_v53 = vsel %vm2079_vm5, %v2078_v1, %v2064_v48  ;;  %v2296_v56 = vsel %vm2076_vm14, %v2294_v5, %v2277_v45 }
0x12d9   : > { %v4780_v41 = vmul.f32 0.11128076, %v4777_v53  ;;  %v4789_v37 = vmul.f32 0.21674532, %v4777_v53  ;;  %v2109_v44 = vmul.f32 0.27068216, %v4777_v53 }
0x12da   : > { %v2083_v14 = vmul.f32 0.036632847, %v4777_v53 }
0x12db   : > { %v4783_v18 = vpop.permute.xlu0 %2490  ;;  %2090 = vrot.lane.b32.xlu1 %v4780_v41, %s3459_s30  ;;  %v2285_v36 = vpop.permute.xlu1 %2284 }
0x12dc   : > { %v4806_v12 = vsel %vm2079_vm5, %v2297_v21, %v2285_v36  ;;  %v2518_v49 = vsel %vm2071_vm9, %v2516_v57, %v4783_v18 }
0x12dd   : > { %v4817_v11 = vmul.f32 0.11128076, %v4806_v12  ;;  %v4829_v10 = vmul.f32 0.21674532, %v4806_v12  ;;  %v2327_v51 = vmul.f32 0.27068216, %v4806_v12 }
0x12df   : > { %v4794_v25 = vpop.permute.xlu0 %2712  ;;  %2102 = vrot.lane.b32.xlu1 %v4789_v37, %s3456_s16  ;;  %v2499_v16 = vpop.permute.xlu1 %2498 }
0x12e0   : > { %v2521_v27 = vsel %vm5312_vm6, %v2519_v24, %v2499_v16  ;;  %v2736_v16 = vsel %vm5317_vm11, %v4764_v54, %v4766_v59  ;;  %vm5323_vm6 = vmmov %vm5309_vm0 }
0x12e1   : > { %v2738_v30 = vsel %vm5318_vm7, %v2736_v16, %v4654_v33 }
0x12e2   : > { %v2740_v59 = vsel %vm2071_vm9, %v2738_v30, %v4794_v25 }
0x12e3   : > { %v2062_v62 = vpop.permute.xlu0 %2061  ;;  %2114 = vrot.lane.b32.xlu1 %v2109_v44, %s3460_s4  ;;  %v2721_v7 = vpop.permute.xlu1 %2720 }
0x12e4   : > { %v4811_v15 = vsel %vm2079_vm5, %v2077_v58, %v2062_v62  ;;  %v2743_v1 = vsel %vm5314_vm8, %v2741_v38, %v2721_v7 }
0x12e5   : > { %v4814_v8 = vmul.f32 0.11128076, %v4811_v15  ;;  %v4826_v9 = vmul.f32 0.21674532, %v4811_v15  ;;  %v2108_v63 = vmul.f32 0.27068216, %v4811_v15 }
0x12e6   : > { %v2082_v22 = vmul.f32 0.036632847, %v4811_v15 }
0x12e7   : > { %2088 = vrot.lane.b32.xlu0 %v4814_v8, %s3459_s30  ;;  %v2283_v60 = vpop.permute.xlu0 %2282  ;;  %2308 = vrot.lane.b32.xlu1 %v4817_v11, %s3459_s30  ;;  %v2505_v61 = vpop.permute.xlu1 %2504 }
0x12e8   : > { %v4850_v35 = vsel %vm2079_vm5, %v2296_v56, %v2283_v60  ;;  %v2523_v40 = vsel %vm2076_vm14, %v2521_v27, %v2505_v61 }
0x12e9   : > { %v4864_v20 = vmul.f32 0.11128076, %v4850_v35  ;;  %v2314_v36 = vmul.f32 0.21674532, %v4850_v35  ;;  %v2326_v31 = vmul.f32 0.27068216, %v4850_v35 }
0x12eb   : > { %2100 = vrot.lane.b32.xlu0 %v4826_v9, %s3456_s16  ;;  %v2497_v23 = vpop.permute.xlu0 %2496  ;;  %2320 = vrot.lane.b32.xlu1 %v4829_v10, %s3456_s16  ;;  %v2727_v42 = vpop.permute.xlu1 %2726 }
0x12ec   : > { %v2745_v46 = vsel %vm2076_vm14, %v2743_v1, %v2727_v42  ;;  %v2520_v34 = vsel %vm5305_vm2, %v2518_v49, %v2497_v23 }
0x12ef   : > { %2112 = vrot.lane.b32.xlu0 %v2108_v63, %s3460_s4  ;;  %v2719_v17 = vpop.permute.xlu0 %2718  ;;  %2332 = vrot.lane.b32.xlu1 %v2327_v51, %s3460_s4  ;;  %v2511_v28 = vpop.permute.xlu1 %2510 }
0x12f0   : > { %v4859_v3 = vsel %vm2079_vm5, %v2523_v40, %v2511_v28  ;;  %v2742_v13 = vsel %vm5319_vm1, %v2740_v59, %v2719_v17 }
0x12f1   : > { %v4867_v43 = vmul.f32 0.11128076, %v4859_v3  ;;  %v2541_v39 = vmul.f32 0.21674532, %v4859_v3  ;;  %v2553_v60 = vmul.f32 0.27068216, %v4859_v3 }
0x12f2   : > { %v4978_v24 = vmul.f32 0.036632847, %v4859_v3 }
0x12f3   : > { %2306 = vrot.lane.b32.xlu0 %v4864_v20, %s3459_s30  ;;  %v2503_v45 = vpop.permute.xlu0 %2502  ;;  %2534 = vrot.lane.b32.xlu1 %v4867_v43, %s3459_s30  ;;  %v2733_v48 = vpop.permute.xlu1 %2732 }
0x12f4   : > { %v4876_v50 = vsel %vm2079_vm5, %v2745_v46, %v2733_v48  ;;  %v2522_v29 = vsel %vm2076_vm14, %v2520_v34, %v2503_v45 }
0x12f5   : > { %v4883_v55 = vmul.f32 0.11128076, %v4876_v50  ;;  %v2763_v44 = vmul.f32 0.21674532, %v4876_v50  ;;  %v2775_v61 = vmul.f32 0.27068216, %v4876_v50 }
0x12f6   : > { %v2749_v17 = vmul.f32 0.036632847, %v4876_v50 }
0x12f7   : > { %2318 = vrot.lane.b32.xlu0 %v2314_v36, %s3456_s16  ;;  %v2725_v4 = vpop.permute.xlu0 %2724  ;;  %2756 = vrot.lane.b32.xlu1 %v4883_v55, %s3459_s30  ;;  %v2925_v0 = vpop.permute.xlu1 %2924 }
0x12f8   : > { %v2744_v58 = vsel %vm2076_vm14, %v2742_v13, %v2725_v4 }
0x12fb   : > { %2330 = vrot.lane.b32.xlu0 %v2326_v31, %s3460_s4  ;;  %v2509_v21 = vpop.permute.xlu0 %2508  ;;  %2546 = vrot.lane.b32.xlu1 %v2541_v39, %s3456_s16 }
0x12fc   : > { %v4904_v54 = vsel %vm2079_vm5, %v2522_v29, %v2509_v21 }
0x12fd   : > { %v4909_v18 = vmul.f32 0.11128076, %v4904_v54  ;;  %v2540_v7 = vmul.f32 0.21674532, %v4904_v54 }
0x12ff   : > { %2532 = vrot.lane.b32.xlu0 %v4909_v18, %s3459_s30  ;;  %v2731_v62 = vpop.permute.xlu0 %2730  ;;  %2768 = vrot.lane.b32.xlu1 %v2763_v44, %s3456_s16 }
0x1300   : > { %v4918_v33 = vsel %vm2079_vm5, %v2744_v58, %v2731_v62 }
0x1301   : > { %v4921_v25 = vmul.f32 0.11128076, %v4918_v33  ;;  %v2762_v19 = vmul.f32 0.21674532, %v4918_v33  ;;  %v2748_v45 = vmul.f32 0.036632847, %v4918_v33 }
0x1303   : > { %2754 = vrot.lane.b32.xlu0 %v4921_v25, %s3459_s30  ;;  %2122 = vrot.lane.b32.xlu1 %v4789_v37, %s3461_s25  ;;  %v2552_v37 = vmul.f32 0.27068216, %v4904_v54 }
0x1307   : > { %2544 = vrot.lane.b32.xlu0 %v2540_v7, %s3456_s16  ;;  %2340 = vrot.lane.b32.xlu1 %v4829_v10, %s3461_s25  ;;  %v2774_v10 = vmul.f32 0.27068216, %v4918_v33 }
0x130b   : > { %2766 = vrot.lane.b32.xlu0 %v2762_v19, %s3456_s16  ;;  %2558 = vrot.lane.b32.xlu1 %v2553_v60, %s3460_s4 }
0x130f   : > { %2120 = vrot.lane.b32.xlu0 %v4826_v9, %s3461_s25  ;;  %2780 = vrot.lane.b32.xlu1 %v2775_v61, %s3460_s4  ;;  %v2931_v9 = vpop.permute.xlu1 %2930 }
0x1310   : > { %v2959_v23 = vsel %vm5320_vm3, %v2925_v0, %v2931_v9 }
0x1311   : > { %v2961_v53 = vsel %vm5309_vm0, %v2959_v23, %v4670_v6  ;;  %v4975_v6 = vmul.f32 0.036632847, %v4850_v35 }
0x1313   : > { %2338 = vrot.lane.b32.xlu0 %v2314_v36, %s3461_s25  ;;  %2130 = vrot.lane.b32.xlu1 %v4780_v41, %s3475_s3  ;;  %v2923_v41 = vpop.permute.xlu0 %2922  ;;  %v2937_v32 = vpop.permute.xlu1 %2936 }
0x1317   : > { %2556 = vrot.lane.b32.xlu0 %v2552_v37, %s3460_s4  ;;  %2348 = vrot.lane.b32.xlu1 %v4817_v11, %s3475_s3  ;;  %v4957_v11 = vmul.f32 0.036632847, %v4806_v12  ;;  %v2929_v42 = vpop.permute.xlu0 %2928  ;;  %v2963_v12 = vsel %vm2071_vm9, %v2961_v53, %v2937_v32 }
0x1318   : > { %v2958_v63 = vsel %vm5322_vm12, %v2923_v41, %v2929_v42 }
0x1319   : > { %v2960_v35 = vsel %vm5323_vm6, %v2958_v63, %v4690_v2  ;;  %v2526_v2 = vmul.f32 0.036632847, %v4904_v54 }
0x131b   : > { %2778 = vrot.lane.b32.xlu0 %v2774_v10, %s3460_s4  ;;  %2566 = vrot.lane.b32.xlu1 %v2541_v39, %s3461_s25  ;;  %v2935_v52 = vpop.permute.xlu0 %2934 }
0x131c   : > { %v2962_v28 = vsel %vm2071_vm9, %v2960_v35, %v2935_v52  ;;  %vm5325_vm9 = vcmask 130048  }
0x131f   : > { %2128 = vrot.lane.b32.xlu0 %v4814_v8, %s3475_s3  ;;  %2788 = vrot.lane.b32.xlu1 %v2763_v44, %s3461_s25  ;;  %v2943_v8 = vpop.permute.xlu1 %2942  ;;  %v2941_v51 = vpop.permute.xlu0 %2940 }
0x1320   : > { %v2965_v56 = vsel %vm5321_vm13, %v2963_v12, %v2943_v8  ;;  %v2964_v38 = vsel %vm5324_vm15, %v2962_v28, %v2941_v51 }
0x1323   : > { %2346 = vrot.lane.b32.xlu0 %v4864_v20, %s3475_s3  ;;  %2140 = vrot.lane.b32.xlu1 %v2083_v14, %s3476_s18  ;;  %v2949_v5 = vpop.permute.xlu1 %2948  ;;  %v2947_v26 = vpop.permute.xlu0 %2946 }
0x1324   : > { %v2967_v27 = vsel %vm2076_vm14, %v2965_v56, %v2949_v5 }
0x1327   : > { %2564 = vrot.lane.b32.xlu0 %v2540_v7, %s3461_s25  ;;  %2358 = vrot.lane.b32.xlu1 %v4957_v11, %s3476_s18  ;;  %v2955_v15 = vpop.permute.xlu1 %2954  ;;  %v2953_v1 = vpop.permute.xlu0 %2952 }
0x1328   : > { %v2969_v40 = vsel %vm2079_vm5, %v2967_v27, %v2955_v15 }
0x1329   : > { %v2973_v3 = vmul.f32 0.11128076, %v2969_v40  ;;  %v2985_v20 = vmul.f32 0.21674532, %v2969_v40  ;;  %v2997_v46 = vmul.f32 0.27068216, %v2969_v40 }
0x132a   : > { %v5010_v36 = vmul.f32 0.036632847, %v2969_v40 }
0x132b   : > { %2786 = vrot.lane.b32.xlu0 %v2762_v19, %s3461_s25  ;;  %2574 = vrot.lane.b32.xlu1 %v4867_v43, %s3475_s3  ;;  %v2966_v43 = vsel %vm2076_vm14, %v2964_v38, %v2947_v26  ;;  %vm5326_vm14 = vmmov %vm5325_vm9 }
0x132c   : > { %v2968_v48 = vsel %vm2079_vm5, %v2966_v43, %v2953_v1  ;;  %vm3082_vm5 = vcmask 0  }
0x132d   : > { %v2972_v50 = vmul.f32 0.11128076, %v2968_v48  ;;  %v2984_v47 = vmul.f32 0.21674532, %v2968_v48  ;;  %v5017_v34 = vmul.f32 0.036632847, %v2968_v48 }
0x132f   : > { %2138 = vrot.lane.b32.xlu0 %v2082_v22, %s3476_s18  ;;  %2796 = vrot.lane.b32.xlu1 %v4883_v55, %s3475_s3  ;;  %v2996_v55 = vmul.f32 0.27068216, %v2968_v48 }
0x1333   : > { %2356 = vrot.lane.b32.xlu0 %v4975_v6, %s3476_s18  ;;  %2584 = vrot.lane.b32.xlu1 %v4978_v24, %s3476_s18 }
0x1337   : > { %2572 = vrot.lane.b32.xlu0 %v4909_v18, %s3475_s3  ;;  %2806 = vrot.lane.b32.xlu1 %v2749_v17, %s3476_s18 }
0x133b   : > { %2794 = vrot.lane.b32.xlu0 %v4921_v25, %s3475_s3  ;;  %2978 = vrot.lane.b32.xlu1 %v2973_v3, %s3459_s30 }
0x133f   : > { %2582 = vrot.lane.b32.xlu0 %v2526_v2, %s3476_s18  ;;  %2990 = vrot.lane.b32.xlu1 %v2985_v20, %s3456_s16 }
0x1343   : > { %2804 = vrot.lane.b32.xlu0 %v2748_v45, %s3476_s18  ;;  %3002 = vrot.lane.b32.xlu1 %v2997_v46, %s3460_s4 }
0x1347   : > { %2976 = vrot.lane.b32.xlu0 %v2972_v50, %s3459_s30  ;;  %3010 = vrot.lane.b32.xlu1 %v2985_v20, %s3461_s25 }
0x134b   : > { %2988 = vrot.lane.b32.xlu0 %v2984_v47, %s3456_s16  ;;  %3018 = vrot.lane.b32.xlu1 %v2973_v3, %s3475_s3 }
0x134d   : > { %v2091_v4 = vpop.permute.xlu1 %2090 }
0x134e   : > { %v2095_v57 = vadd.f32 %v2091_v4, %v2083_v14 }
0x134f   : > { %3000 = vrot.lane.b32.xlu0 %v2996_v55, %s3460_s4  ;;  %3028 = vrot.lane.b32.xlu1 %v5010_v36, %s3476_s18 }
0x1351   : > { %v2103_v16 = vpop.permute.xlu1 %2102 }
0x1352   : > { %v2107_v49 = vadd.f32 %v2103_v16, %v2095_v57 }
0x1353   : > { %3008 = vrot.lane.b32.xlu0 %v2984_v47, %s3461_s25 }
0x1355   : > { %v2115_v31 = vpop.permute.xlu1 %2114 }
0x1356   : > { %v2119_v39 = vadd.f32 %v2115_v31, %v2107_v49 }
0x1357   : > { %3016 = vrot.lane.b32.xlu0 %v2972_v50, %s3475_s3 }
0x1359   : > { %v2089_v29 = vpop.permute.xlu0 %2088  ;;  %v2309_v21 = vpop.permute.xlu1 %2308 }
0x135a   : > { %v2094_v30 = vadd.f32 %v2089_v29, %v2082_v22  ;;  %v2313_v54 = vadd.f32 %v2309_v21, %v4957_v11 }
0x135b   : > { %3026 = vrot.lane.b32.xlu0 %v5017_v34, %s3476_s18 }
0x135d   : > { %v2101_v59 = vpop.permute.xlu0 %2100  ;;  %v2321_v18 = vpop.permute.xlu1 %2320 }
0x135e   : > { %v2106_v44 = vadd.f32 %v2101_v59, %v2094_v30  ;;  %v2325_v13 = vadd.f32 %v2321_v18, %v2313_v54 }
0x1361   : > { %v2113_v58 = vpop.permute.xlu0 %2112  ;;  %v2333_v62 = vpop.permute.xlu1 %2332 }
0x1362   : > { %v2118_v33 = vadd.f32 %v2113_v58, %v2106_v44  ;;  %v2337_v25 = vadd.f32 %v2333_v62, %v2325_v13 }
0x1365   : > { %v2307_v7 = vpop.permute.xlu0 %2306  ;;  %v2535_v19 = vpop.permute.xlu1 %2534 }
0x1366   : > { %v2312_v60 = vadd.f32 %v2307_v7, %v4975_v6  ;;  %v2539_v61 = vadd.f32 %v2535_v19, %v4978_v24 }
0x1369   : > { %v2319_v37 = vpop.permute.xlu0 %2318  ;;  %v2757_v0 = vpop.permute.xlu1 %2756 }
0x136a   : > { %v2324_v10 = vadd.f32 %v2319_v37, %v2312_v60  ;;  %v2761_v9 = vadd.f32 %v2757_v0, %v2749_v17 }
0x136d   : > { %v2331_v41 = vpop.permute.xlu0 %2330  ;;  %v2547_v32 = vpop.permute.xlu1 %2546 }
0x136e   : > { %v2336_v14 = vadd.f32 %v2331_v41, %v2324_v10  ;;  %v2551_v16 = vadd.f32 %v2547_v32, %v2539_v61 }
0x1371   : > { %v2533_v11 = vpop.permute.xlu0 %2532  ;;  %v2769_v23 = vpop.permute.xlu1 %2768 }
0x1372   : > { %v2538_v42 = vadd.f32 %v2533_v11, %v2526_v2 }
0x1375   : > { %v2755_v8 = vpop.permute.xlu0 %2754  ;;  %v2123_v53 = vpop.permute.xlu1 %2122 }
0x1376   : > { %v5024_v52 = vadd.f32 %v2755_v8, %v2748_v45  ;;  %v2127_v26 = vadd.f32 %v2123_v53, %v2119_v39  ;;  %v2773_v39 = vadd.f32 %v2769_v23, %v2761_v9 }
0x1379   : > { %v2545_v12 = vpop.permute.xlu0 %2544  ;;  %v2341_v22 = vpop.permute.xlu1 %2340 }
0x137a   : > { %v2345_v2 = vadd.f32 %v2341_v22, %v2337_v25 }
0x137d   : > { %v2767_v5 = vpop.permute.xlu0 %2766  ;;  %v2559_v56 = vpop.permute.xlu1 %2558 }
0x137e   : > { %v2563_v29 = vadd.f32 %v2559_v56, %v2551_v16 }
0x1381   : > { %v2121_v6 = vpop.permute.xlu0 %2120  ;;  %v2781_v24 = vpop.permute.xlu1 %2780 }
0x1382   : > { %v2126_v31 = vadd.f32 %v2121_v6, %v2118_v33  ;;  %v2785_v44 = vadd.f32 %v2781_v24, %v2773_v39  ;;  %v2772_v6 = vadd.f32 %v2767_v5, %v5024_v52 }
0x1385   : > { %v2339_v63 = vpop.permute.xlu0 %2338  ;;  %v2131_v51 = vpop.permute.xlu1 %2130 }
0x1386   : > { %v2135_v20 = vadd.f32 %v2131_v51, %v2127_v26  ;;  %v2344_v54 = vadd.f32 %v2339_v63, %v2336_v14  ;;  %v2550_v14 = vadd.f32 %v2545_v12, %v2538_v42 }
0x1389   : > { %v2557_v27 = vpop.permute.xlu0 %2556  ;;  %v2349_v15 = vpop.permute.xlu1 %2348 }
0x138a   : > { %v2353_v43 = vadd.f32 %v2349_v15, %v2345_v2  ;;  %v2562_v8 = vadd.f32 %v2557_v27, %v2550_v14 }
0x138d   : > { %v2779_v17 = vpop.permute.xlu0 %2778  ;;  %v2567_v35 = vpop.permute.xlu1 %2566 }
0x138e   : > { %v2571_v18 = vadd.f32 %v2567_v35, %v2563_v29  ;;  %v2784_v51 = vadd.f32 %v2779_v17, %v2772_v6 }
0x1391   : > { %v2129_v40 = vpop.permute.xlu0 %2128  ;;  %v2789_v28 = vpop.permute.xlu1 %2788 }
0x1392   : > { %v2134_v59 = vadd.f32 %v2129_v40, %v2126_v31  ;;  %v2793_v25 = vadd.f32 %v2789_v28, %v2785_v44 }
0x1395   : > { %v2347_v3 = vpop.permute.xlu0 %2346  ;;  %v2141_v38 = vpop.permute.xlu1 %2140 }
0x1396   : > { %v2145_v1 = vadd.f32 %v2141_v38, %v2135_v20  ;;  %v2352_v13 = vadd.f32 %v2347_v3, %v2344_v54 }
0x1398   : > { %v2365_v50 = vmul.f32 %v2145_v1, %v2145_v1 }
0x1399   : > { %v2565_v45 = vpop.permute.xlu0 %2564  ;;  %v2359_v46 = vpop.permute.xlu1 %2358 }
0x139a   : > { %v2363_v48 = vadd.f32 %v2359_v46, %v2353_v43  ;;  %v2570_v24 = vadd.f32 %v2565_v45, %v2562_v8 }
0x139c   : > { %v2367_v47 = vmul.f32 %v2363_v48, %v2363_v48  ;;  %v5026_v55 = vmul.f32 %v2363_v48, %v2145_v1 }
0x139d   : > { %v2787_v4 = vpop.permute.xlu0 %2786  ;;  %v2575_v57 = vpop.permute.xlu1 %2574 }
0x139e   : > { %v3047_v49 = vadd.f32 %v2367_v47, %v2365_v50  ;;  %v2579_v62 = vadd.f32 %v2575_v57, %v2571_v18  ;;  %v2792_v3 = vadd.f32 %v2787_v4, %v2784_v51 }
0x13a0   : > { %v3049_v15 = vadd.f32 0.0001, %v3047_v49 }
0x13a1   : > { %v2139_v21 = vpop.permute.xlu0 %2138  ;;  %v2797_v30 = vpop.permute.xlu1 %2796 }
0x13a2   : > { %v2144_v58 = vadd.f32 %v2139_v21, %v2134_v59  ;;  %v2801_v0 = vadd.f32 %v2797_v30, %v2793_v25  ;;  %v3037_v30 = vmul.f32 2.0, %v5026_v55 }
0x13a4   : > { %v2364_v61 = vmul.f32 %v2144_v58, %v2144_v58 }
0x13a5   : > { %v2357_v7 = vpop.permute.xlu0 %2356  ;;  %v2585_v19 = vpop.permute.xlu1 %2584 }
0x13a6   : > { %v2362_v60 = vadd.f32 %v2357_v7, %v2352_v13  ;;  %v2589_v37 = vadd.f32 %v2585_v19, %v2579_v62  ;;  %v3039_v13 = vadd.f32 0.0001, %v3037_v30 }
0x13a8   : > { %v2366_v10 = vmul.f32 %v2362_v60, %v2362_v60  ;;  %v5028_v33 = vmul.f32 %v2362_v60, %v2144_v58  ;;  %v2591_v9 = vsub.f32 %v2589_v37, %v2365_v50 }
0x13a9   : > { %v2573_v41 = vpop.permute.xlu0 %2572  ;;  %v2807_v32 = vpop.permute.xlu1 %2806 }
0x13aa   : > { %v3046_v11 = vadd.f32 %v2366_v10, %v2364_v61  ;;  %v2811_v23 = vadd.f32 %v2807_v32, %v2801_v0  ;;  %v2578_v35 = vadd.f32 %v2573_v41, %v2570_v24 }
0x13ac   : > { %v2813_v53 = vsub.f32 %v2811_v23, %v2367_v47  ;;  %v3048_v48 = vadd.f32 0.0001, %v3046_v11 }
0x13ad   : > { %v2795_v22 = vpop.permute.xlu0 %2794  ;;  %v2979_v56 = vpop.permute.xlu1 %2978 }
0x13ae   : > { %v3051_v63 = vadd.f32 %v2813_v53, %v2591_v9  ;;  %v2800_v42 = vadd.f32 %v2795_v22, %v2792_v3  ;;  %v2983_v46 = vadd.f32 %v2979_v56, %v5010_v36  ;;  %v3036_v9 = vmul.f32 2.0, %v5028_v33 }
0x13b0   : > { %v3053_v40 = vadd.f32 0.0009, %v3051_v63  ;;  %v3038_v32 = vadd.f32 0.0001, %v3036_v9 }
0x13b1   : > { %v2583_v28 = vpop.permute.xlu0 %2582  ;;  %v2991_v26 = vpop.permute.xlu1 %2990 }
0x13b2   : > { %v2588_v38 = vadd.f32 %v2583_v28, %v2578_v35  ;;  %v3055_v2 = vmul.f32 %v3053_v40, %v3049_v15  ;;  %v2995_v17 = vadd.f32 %v2991_v26, %v2983_v46 }
0x13b4   : > { %v2590_v12 = vsub.f32 %v2588_v38, %v2364_v61  ;;  %3335 = vrcp.f32 %v3055_v2 }
0x13b5   : > { %v2805_v20 = vpop.permute.xlu0 %2804  ;;  %v3003_v27 = vpop.permute.xlu1 %3002 }
0x13b6   : > { %v2810_v43 = vadd.f32 %v2805_v20, %v2800_v42  ;;  %v3007_v47 = vadd.f32 %v3003_v27, %v2995_v17 }
0x13b8   : > { %v2812_v1 = vsub.f32 %v2810_v43, %v2366_v10 }
0x13b9   : > { %v2977_v52 = vpop.permute.xlu0 %2976  ;;  %v3011_v5 = vpop.permute.xlu1 %3010 }
0x13ba   : > { %v3050_v45 = vadd.f32 %v2812_v1, %v2590_v12  ;;  %v3015_v49 = vadd.f32 %v3011_v5, %v3007_v47  ;;  %v2982_v36 = vadd.f32 %v2977_v52, %v5017_v34 }
0x13bc   : > { %v3052_v50 = vadd.f32 0.0009, %v3050_v45 }
0x13bd   : > { %v2989_v57 = vpop.permute.xlu0 %2988  ;;  %v3019_v16 = vpop.permute.xlu1 %3018 }
0x13be   : > { %v3054_v4 = vmul.f32 %v3052_v50, %v3048_v48  ;;  %v3023_v31 = vadd.f32 %v3019_v16, %v3015_v49  ;;  %v2994_v18 = vadd.f32 %v2989_v57, %v2982_v36 }
0x13c0   : > { %3337 = vrcp.f32 %v3054_v4 }
0x13c1   : > { %v3001_v29 = vpop.permute.xlu0 %3000  ;;  %v3029_v39 = vpop.permute.xlu1 %3028 }
0x13c2   : > { %v3033_v21 = vadd.f32 %v3029_v39, %v3023_v31  ;;  %v3006_v58 = vadd.f32 %v3001_v29, %v2994_v18  ;;  %v3336_v60 = vpop.eup %3335 }
0x13c4   : > { %v3035_v54 = vsub.f32 %v3033_v21, %v5026_v55 }
0x13c5   : > { %v3009_v59 = vpop.permute.xlu0 %3008 }
0x13c6   : > { %v3041_v44 = vmul.f32 2.0, %v3035_v54  ;;  %v3014_v7 = vadd.f32 %v3009_v59, %v3006_v58 }
0x13c8   : > { %v3043_v62 = vadd.f32 0.0009, %v3041_v44 }
0x13c9   : > { %v3017_v25 = vpop.permute.xlu0 %3016 }
0x13ca   : > { %v3045_v19 = vmul.f32 %v3043_v62, %v3039_v13  ;;  %v3022_v37 = vadd.f32 %v3017_v25, %v3014_v7 }
0x13cc   : > { %v3059_v0 = vmul.f32 %v3336_v60, %v3045_v19 }
0x13cd   : > { %v3027_v61 = vpop.permute.xlu0 %3026  ;;  %v3338_v8 = vpop.eup %3337 }
0x13ce   : > { %v3032_v10 = vadd.f32 %v3027_v61, %v3022_v37  ;;  %v3061_v55 = vsub.f32 1.0, %v3059_v0 }
0x13d0   : > { %v3034_v34 = vsub.f32 %v3032_v10, %v5028_v33  ;;  %v3063_v11 = vmul.f32 0.5, %v3061_v55 }
0x13d2   : > { %v3040_v41 = vmul.f32 2.0, %v3034_v34  ;;  %v3065_v22 = vmax.f32 %v3063_v11, 0.0 }
0x13d4   : > { %v3042_v14 = vadd.f32 0.0009, %v3040_v41  ;;  %v3067_v24 = vmin.f32 %v3065_v22, 1.0 }
0x13d6   : > { %v3044_v23 = vmul.f32 %v3042_v14, %v3038_v32  ;;  %v3070_v15 = vsel %vm5325_vm9, %v3067_v24, 0.0 }
0x13d8   : > { %v3057_v53 = vmul.f32 %v3338_v8, %v3044_v23 }
0x13da   : > { %v3060_v56 = vsub.f32 1.0, %v3057_v53 }
0x13dc   : > { %v3062_v6 = vmul.f32 0.5, %v3060_v56 }
0x13de   : > { %v3064_v63 = vmax.f32 %v3062_v6, 0.0 }
0x13e0   : > { %v3066_v51 = vmin.f32 %v3064_v63, 1.0 }
0x13e2   : > { %v3069_v35 = vsel %vm5326_vm14, %v3066_v51, 0.0 }
0x13e3   : > { %v3071_v33 = vadd.f32 %v3070_v15, %v3069_v35 }
0x13e5   : > { %3072 = vadd.xlane.f32.xlu0 %v3071_v33 }
0x146e   : > { %v3073_v40 = vpop.xlane.xlu0 %3072 }
0x146f   : > { %v3074_v28 = vrot.slane %v3073_v40, 4 }
0x1471   : > { %v3075_v26 = vadd.f32 %v3074_v28, %v3073_v40 }
0x1473   : > { %v3076_v3 = vrot.slane %v3075_v26, 2 }
0x1475   : > { %v3077_v38 = vadd.f32 %v3076_v3, %v3075_v26 }
0x1477   : > { %v3078_v2 = vrot.slane %v3077_v38, 1 }
0x1479   : > { %v3079_v42 = vadd.f32 %v3078_v2, %v3077_v38 }
0x147b   : > { %3211 = vpush %v3079_v42 }
0x14ac   : > { %s3212_s16 = spop %3211 }
0x14ad   : > { %v3081_v12 = vstv %s3212_s16 }
0x14ae   : > { %3083 = vst.msk [vmem:[%s199_s28] sm:$0x1] %vm3082_vm5, %v3081_v12 }
0x14af PF: > { %p15_p0 = scmp.ge.s32.totalorder %s3514_s14, 4   ;;  %s5327_s9 = smov %s3433_s10 }
0x14b0   : > { %s5328_s10 = smov %s3437_s11  ;;  %s5329_s11 = smov %s3524_s17 }
0x14b1   : > { %s5330_s12 = smov %s3514_s14  ;;  %17 = sbr.rel (!%p15_p0) target bundleno = 5 (0x5), region = 121 }
0x14b6   :  { %3101 = vsyncpa [#allocation4], 1 }
0x14b7   :  { %3103 = vsyncpa [#allocation4 + $0x1], 1 }
0x14b8   :  { %3104 = vsyncpa [#allocation6], 1 }
0x14b9   :  { %3106 = vsyncpa [#allocation6 + $0x1], 1 }

</bundles_post_ra>
